<compile_context>
chip_gen: v7x
topology: tpu7x:2x2x1
jax: 0.10.0
libtpu: 0.0.40
codegen_flags: <defaults>
</compile_context>

<pallas_src>
import functools
import math

import jax
import jax.numpy as jnp
import numpy as np
from jax.experimental import pallas as pl
from jax.experimental.pallas import tpu as pltpu

DILATIONS = (1, 3, 9)
K7 = 7  # kernel size of the dilated convs inside ResidualUnit


def _round_up(x, m):
    return (x + m - 1) // m * m


def _snake(x, alpha, inv_alpha):
    # Snake1d: x + (alpha + 1e-9)^-1 * sin(alpha * x)^2   (maps 0 -> 0 exactly)
    return x + inv_alpha * jnp.square(jnp.sin(alpha * x))


def _encoder_block_kernel(
    x_ref, m_ref, a1_ref, ia1_ref, w7_ref, b7_ref, a2_ref, ia2_ref,
    w1_ref, b1_ref, af_ref, iaf_ref, wf_ref, bf_ref,
    o_ref, work_ref,
    *, halo_t, guard, pad_final, k_final, stride,
):
    c_in, T = x_ref.shape
    c_out, wt_out = o_ref.shape
    tile_w = wt_out * stride
    cdt = work_ref.dtype  # compute dtype for MXU operands (bf16 by default)

    # Keep the guard bands of the tap scratch zeroed.  Only the two guard
    # slabs are touched; the payload is fully overwritten before every read.
    zeros_g = jnp.zeros((c_in, guard), cdt)
    work_ref[:, :guard] = zeros_g
    work_ref[:, guard + T:] = zeros_g

    x = x_ref[...]     # (c_in, T) f32, zero-haloed tile
    mask = m_ref[...]  # (1, T): 1.0 on segment payload columns, 0.0 on pads

    # ---- three residual units (dilations 1, 3, 9) ----
    # TODO(synk): the shifted tap reads below are lane-unaligned slice
    # realignments; pltpu.roll of the in-register activation would move that
    # work onto the idle XLU slot (biggest relative win on v5e).
    for u, d in enumerate(DILATIONS):
        y = _snake(x, a1_ref[u], ia1_ref[u])
        work_ref[:, guard:guard + T] = y.astype(cdt)
        # K=7 dilated 'same' conv: one small MXU matmul per tap, accumulated in
        # f32 -- no (K7*c_in, T) concatenation is ever materialized.
        acc = jnp.zeros((c_in, T), jnp.float32)
        for k in range(K7):
            off = (k - K7 // 2) * d
            tap = work_ref[:, guard + off:guard + off + T]
            acc = acc + jnp.dot(w7_ref[u * K7 + k], tap,
                                preferred_element_type=jnp.float32)
        z = _snake(acc + b7_ref[u], a2_ref[u], ia2_ref[u])
        z = jnp.dot(w1_ref[u], z.astype(cdt),
                    preferred_element_type=jnp.float32) + b1_ref[u]
        # Residual add; the mask keeps inter-segment padding columns exactly
        # zero so later taps see the correct 'same' zero padding between
        # batch segments folded onto the lane axis.
        x = x + z * mask

    # ---- final Snake + strided output conv (c_in -> c_out) ----
    y = _snake(x, af_ref[...], iaf_ref[...])
    work_ref[:, guard:guard + T] = y.astype(cdt)
    acc = jnp.zeros((c_out, wt_out), jnp.float32)
    if stride == 1:
        base = guard + halo_t - pad_final
        for k in range(k_final):
            tap = work_ref[:, base + k:base + k + tile_w]
            acc = acc + jnp.dot(wf_ref[k], tap,
                                preferred_element_type=jnp.float32)
    else:
        # Polyphase: one strided read per phase, then every tap is a
        # contiguous slice of its phase (k_final taps share `stride` reads).
        n_ph = T // stride
        phases = [work_ref[:, pl.ds(guard + r, n_ph, stride=stride)]
                  for r in range(stride)]
        for k in range(k_final):
            off = halo_t - pad_final + k
            r, q = off % stride, off // stride
            acc = acc + jnp.dot(wf_ref[k], phases[r][:, q:q + wt_out],
                                preferred_element_type=jnp.float32)
    o_ref[...] = acc + bf_ref[...]


def _auto_tile_w(Lp, stride, max_out_lanes=512):
    # Largest power-of-two multiple of 128*stride that divides the per-segment
    # width and keeps the output tile at <= max_out_lanes lanes.
    t = 128 * stride
    while Lp % (2 * t) == 0 and (2 * t) // stride <= max_out_lanes:
        t *= 2
    return t


def encoder_block_forward(x, params, *, dim, stride, tile_w=None,
                          compute_dtype=jnp.bfloat16):
    B, c_in, L = x.shape
    assert c_in == dim // 2
    c_out = dim
    k_final = 2 * stride
    pad_final = math.ceil(stride / 2)
    l_out = (L + 2 * pad_final - k_final) // stride + 1

    ru_radius = 3 * sum(DILATIONS)    # 39: receptive radius of the 3 residual units
    unit_radius = 3 * max(DILATIONS)  # 27: radius of a single dilated conv

    # Per-segment layout [HL | payload L | HR]: the zero gaps between folded
    # batch segments double as the convs' 'same' zero padding.  HL is a
    # multiple of `stride` so the strided output grid stays segment-aligned.
    HL = _round_up(max(unit_radius, pad_final), stride)
    Lp = _round_up(L + HL + unit_radius, 128 * stride)
    HR = Lp - L - HL
    W = B * Lp
    W_out = W // stride
    assert HR >= unit_radius and HR >= pad_final
    assert HL // stride + l_out <= Lp // stride

    # Per-tile halo = cumulative receptive field of the whole block; multiple
    # of 64 keeps the tile width a multiple of 128 lanes, multiple of `stride`
    # keeps the polyphase split exact.
    halo_t = _round_up(ru_radius + pad_final, 64)
    while halo_t % stride:
        halo_t += 64
    guard = _round_up(unit_radius, 16)   # scratch guard band for tap shifts
    assert guard >= unit_radius
    assert halo_t >= ru_radius + pad_final

    if tile_w is None:
        tile_w = _auto_tile_w(Lp, stride)
    assert tile_w % (128 * stride) == 0 and W % tile_w == 0
    n_tiles = W // tile_w
    T = tile_w + 2 * halo_t
    wt_out = tile_w // stride
    if stride > 1:
        assert T % stride == 0
    # Final-conv tap window of every (kept or discarded) output column of a
    # tile must stay inside the stored [0, T) payload of the tap scratch.
    assert halo_t - pad_final >= 0
    assert halo_t - pad_final + k_final - 1 + (wt_out - 1) * stride < T

    a1, w7, b7, a2, w1, b1, af, wf, bf = params
    cdt = compute_dtype
    # One (c_out, c_in) matrix per tap (bf16 MXU operands, f32 accumulation)
    # and precomputed Snake reciprocals -- wrapper-side layout plumbing.
    w7b = jnp.transpose(w7, (0, 3, 1, 2)).reshape(3 * K7, c_in, c_in).astype(cdt)
    w1b = w1.astype(cdt)                              # (3, c_in, c_in)
    wfb = jnp.transpose(wf, (2, 0, 1)).astype(cdt)    # (k_final, c_out, c_in)
    ia1 = 1.0 / (a1 + 1e-9)
    ia2 = 1.0 / (a2 + 1e-9)
    iaf = 1.0 / (af + 1e-9)

    # Lane-dense, zero-haloed layout (B, c, L) -> (c, B*Lp), then gather the
    # overlapping per-tile windows so BlockSpec can pipeline them.
    # TODO(synk): replace the wrapper-side halo gather with manual overlapping
    # DMAs (memory_space=pl.ANY + make_async_copy) to avoid duplicating halo
    # columns in HBM at very long sequence lengths.
    xt = jnp.transpose(x, (1, 0, 2)).astype(jnp.float32)
    xp = jnp.pad(xt, ((0, 0), (0, 0), (HL, HR))).reshape(c_in, W)
    mp = jnp.pad(jnp.ones((1, B, L), jnp.float32),
                 ((0, 0), (0, 0), (HL, HR))).reshape(1, W)
    xg = jnp.pad(xp, ((0, 0), (halo_t, halo_t)))
    mg = jnp.pad(mp, ((0, 0), (halo_t, halo_t)))
    idx = (jnp.arange(n_tiles) * tile_w)[:, None] + jnp.arange(T)[None, :]
    x_tiles = jnp.transpose(xg[:, idx], (1, 0, 2))    # (n_tiles, c_in, T)
    m_tiles = jnp.transpose(mg[:, idx], (1, 0, 2))    # (n_tiles, 1, T)

    inputs = (x_tiles, m_tiles, a1, ia1, w7b, b7, a2, ia2, w1b, b1,
              af, iaf, wfb, bf)

    def _resident(arr):
        zeros = (0,) * arr.ndim
        return pl.BlockSpec(arr.shape, lambda i: zeros)

    in_specs = [
        pl.BlockSpec((None, c_in, T), lambda i: (i, 0, 0)),
        pl.BlockSpec((None, 1, T), lambda i: (i, 0, 0)),
    ] + [_resident(a) for a in inputs[2:]]
    out_spec = pl.BlockSpec((c_out, wt_out), lambda i: (0, i))

    kernel = functools.partial(
        _encoder_block_kernel, halo_t=halo_t, guard=guard,
        pad_final=pad_final, k_final=k_final, stride=stride)

    # Explicit VMEM budget: double-buffered x/mask/output tiles + resident
    # weights + tap scratch + headroom for the in-kernel f32 temporaries.
    itemsize = jnp.dtype(cdt).itemsize
    w_bytes = sum(int(a.size) * a.dtype.itemsize for a in inputs[2:])
    tile_bytes = (2 * (c_in + 1) * T * 4 + 2 * c_out * wt_out * 4
                  + 2 * w_bytes + c_in * (T + 2 * guard) * itemsize
                  + 8 * c_in * T * 4)
    vmem_limit = int(min(64 << 20, max(32 << 20, 2 * tile_bytes)))

    flops = int(n_tiles * (2 * 3 * (K7 + 1) * c_in * c_in * T
                           + 2 * k_final * c_in * c_out * wt_out))
    transcendentals = int(n_tiles * 7 * c_in * T)   # one sin() per Snake element
    bytes_accessed = int(sum(int(a.size) * a.dtype.itemsize for a in inputs)
                         + 4 * c_out * W_out)

    out_buf = pl.pallas_call(
        kernel,
        out_shape=jax.ShapeDtypeStruct((c_out, W_out), jnp.float32),
        grid=(n_tiles,),
        in_specs=in_specs,
        out_specs=out_spec,
        scratch_shapes=[pltpu.VMEM((c_in, T + 2 * guard), cdt)],
        compiler_params=pltpu.CompilerParams(
            dimension_semantics=("parallel",),   # tiles are independent (v7x: 2 TCs)
            vmem_limit_bytes=vmem_limit),
        cost_estimate=pl.CostEstimate(flops=flops,
                                      transcendentals=transcendentals,
                                      bytes_accessed=bytes_accessed),
    )(*inputs)

    # Extract the l_out valid output columns of each batch segment
    # (wrapper-side plumbing; the kernel's stores stay lane-dense).
    out = out_buf.reshape(c_out, B, Lp // stride)
    out = out[:, :, HL // stride:HL // stride + l_out]
    return jnp.transpose(out, (1, 0, 2))


# ------------------- parameter init (deterministic, synthetic) -------------------
def init_params(key, dim, stride):
    c = dim // 2
    k_final = 2 * stride
    keys = jax.random.split(key, 12)

    def weight_norm(v, g):
        # PyTorch weight_norm(dim=0): per-output-channel norm over (in, kernel)
        norm = jnp.sqrt(jnp.sum(v * v, axis=(1, 2), keepdims=True))
        return g * v / norm

    a1 = 1.0 + 0.1 * jax.random.normal(keys[0], (3, c, 1))
    a2 = 1.0 + 0.1 * jax.random.normal(keys[1], (3, c, 1))

    v7 = 0.3 * jax.random.normal(keys[2], (3, c, c, K7))
    g7 = 1.0 + 0.1 * jax.random.normal(keys[3], (3, c, 1, 1))
    w7 = jax.vmap(weight_norm)(v7, g7)                      # (3, c, c, 7)
    b7 = 0.1 * jax.random.normal(keys[4], (3, c, 1))

    v1 = 0.3 * jax.random.normal(keys[5], (3, c, c, 1))
    g1 = 1.0 + 0.1 * jax.random.normal(keys[6], (3, c, 1, 1))
    w1 = jax.vmap(weight_norm)(v1, g1)[..., 0]              # (3, c, c)
    b1 = 0.1 * jax.random.normal(keys[7], (3, c, 1))

    af = 1.0 + 0.1 * jax.random.normal(keys[8], (c, 1))
    vf = 0.3 * jax.random.normal(keys[9], (dim, c, k_final))
    gf = 1.0 + 0.1 * jax.random.normal(keys[10], (dim, 1, 1))
    wf = weight_norm(vf, gf)                                # (dim, c, k_final)
    bf = 0.1 * jax.random.normal(keys[11], (dim, 1))

    return (a1, w7, b7, a2, w1, b1, af, wf, bf)


# ------------------------- pure-JAX reference for checking -------------------------
def _snake_ref(x, alpha):
    return x + (1.0 / (alpha + 1e-9)) * jnp.square(jnp.sin(alpha * x))


def _conv1d_ref(x, w, b, *, stride=1, padding=0, dilation=1, dtype=jnp.float32):
    out = jax.lax.conv_general_dilated(
        x.astype(dtype), w.astype(dtype), window_strides=(stride,),
        padding=[(padding, padding)], rhs_dilation=(dilation,),
        dimension_numbers=('NCH', 'OIH', 'NCH'),
        preferred_element_type=jnp.float32,
        precision=jax.lax.Precision.HIGHEST)
    return out + b[None]


def encoder_block_ref(x, params, *, dim, stride, compute_dtype=jnp.float32):
    a1, w7, b7, a2, w1, b1, af, wf, bf = params
    cd = compute_dtype
    for u, d in enumerate(DILATIONS):
        y = _snake_ref(x, a1[u][None])
        y = _conv1d_ref(y, w7[u], b7[u], padding=3 * d, dilation=d, dtype=cd)
        y = _snake_ref(y, a2[u][None])
        y = _conv1d_ref(y, w1[u][..., None], b1[u], dtype=cd)
        x = x + y
    y = _snake_ref(x, af[None])
    return _conv1d_ref(y, wf, bf, stride=stride, padding=math.ceil(stride / 2),
                       dtype=cd)


if __name__ == "__main__":
    dim = 16        # module default -> internal channels dim//2 = 8
    stride = 1      # module default -> output conv k=2, stride=1, pad=1
    B, L = 2, 64    # small demo shape -> 2 lane tiles in the pipelined grid

    key = jax.random.PRNGKey(0)
    kp, kx = jax.random.split(key)
    params = init_params(kp, dim, stride)
    x = jax.random.normal(kx, (B, dim // 2, L), dtype=jnp.float32)

    # 1) f32 compute path vs. the f32 (HIGHEST precision) reference.
    fwd_f32 = jax.jit(functools.partial(
        encoder_block_forward, dim=dim, stride=stride,
        compute_dtype=jnp.float32))
    out_f32 = jax.block_until_ready(fwd_f32(x, params))
    ref_f32 = encoder_block_ref(x, params, dim=dim, stride=stride)
    np.testing.assert_allclose(np.asarray(out_f32), np.asarray(ref_f32),
                               rtol=1e-2, atol=1e-2)

    # 2) bf16 MXU-operand path (the performance configuration) vs. a reference
    #    that rounds conv operands at the same points (f32 accumulation).
    fwd_bf16 = jax.jit(functools.partial(
        encoder_block_forward, dim=dim, stride=stride,
        compute_dtype=jnp.bfloat16))
    out_bf16 = jax.block_until_ready(fwd_bf16(x, params))
    ref_bf16 = encoder_block_ref(x, params, dim=dim, stride=stride,
                                 compute_dtype=jnp.bfloat16)
    np.testing.assert_allclose(np.asarray(out_bf16), np.asarray(ref_bf16),
                               rtol=1e-2, atol=1e-2)

    print("KERNEL_OK")
</pallas_src>

<mosaic_0001>
module attributes {stable_mosaic.version = 11 : i64} {
  func.func @_encoder_block_kernel(%arg0: i32, %arg1: memref<1x8x256xf32, #tpu.memory_space<vmem>>, %arg2: memref<1x1x256xf32, #tpu.memory_space<vmem>>, %arg3: memref<3x8x1xf32, #tpu.memory_space<vmem>>, %arg4: memref<3x8x1xf32, #tpu.memory_space<vmem>>, %arg5: memref<21x8x8xf32, #tpu.memory_space<vmem>>, %arg6: memref<3x8x1xf32, #tpu.memory_space<vmem>>, %arg7: memref<3x8x1xf32, #tpu.memory_space<vmem>>, %arg8: memref<3x8x1xf32, #tpu.memory_space<vmem>>, %arg9: memref<3x8x8xf32, #tpu.memory_space<vmem>>, %arg10: memref<3x8x1xf32, #tpu.memory_space<vmem>>, %arg11: memref<8x1xf32, #tpu.memory_space<vmem>>, %arg12: memref<8x1xf32, #tpu.memory_space<vmem>>, %arg13: memref<2x16x8xf32, #tpu.memory_space<vmem>>, %arg14: memref<16x1xf32, #tpu.memory_space<vmem>>, %arg15: memref<16x128xf32, #tpu.memory_space<vmem>>, %arg16: memref<8x320xf32, #tpu.memory_space<vmem>>) attributes {dimension_semantics = [#tpu.dimension_semantics<parallel>], iteration_bounds = array<i64: 2>, scalar_prefetch = 0 : i64, scratch_operands = 1 : i64, tpu.core_type = #tpu.core_type<tc>, window_params = [{transform_indices = @transform_0, window_bounds = array<i64: 1, 8, 256>}, {transform_indices = @transform_1, window_bounds = array<i64: 1, 1, 256>}, {pipeline_mode = #tpu.pipeline_mode<synchronous>, transform_indices = @transform_2, window_bounds = array<i64: 3, 8, 1>}, {pipeline_mode = #tpu.pipeline_mode<synchronous>, transform_indices = @transform_3, window_bounds = array<i64: 3, 8, 1>}, {pipeline_mode = #tpu.pipeline_mode<synchronous>, transform_indices = @transform_4, window_bounds = array<i64: 21, 8, 8>}, {pipeline_mode = #tpu.pipeline_mode<synchronous>, transform_indices = @transform_5, window_bounds = array<i64: 3, 8, 1>}, {pipeline_mode = #tpu.pipeline_mode<synchronous>, transform_indices = @transform_6, window_bounds = array<i64: 3, 8, 1>}, {pipeline_mode = #tpu.pipeline_mode<synchronous>, transform_indices = @transform_7, window_bounds = array<i64: 3, 8, 1>}, {pipeline_mode = #tpu.pipeline_mode<synchronous>, transform_indices = @transform_8, window_bounds = array<i64: 3, 8, 8>}, {pipeline_mode = #tpu.pipeline_mode<synchronous>, transform_indices = @transform_9, window_bounds = array<i64: 3, 8, 1>}, {pipeline_mode = #tpu.pipeline_mode<synchronous>, transform_indices = @transform_10, window_bounds = array<i64: 8, 1>}, {pipeline_mode = #tpu.pipeline_mode<synchronous>, transform_indices = @transform_11, window_bounds = array<i64: 8, 1>}, {pipeline_mode = #tpu.pipeline_mode<synchronous>, transform_indices = @transform_12, window_bounds = array<i64: 2, 16, 8>}, {pipeline_mode = #tpu.pipeline_mode<synchronous>, transform_indices = @transform_13, window_bounds = array<i64: 16, 1>}, {transform_indices = @transform_14, window_bounds = array<i64: 16, 128>}]} {
    %cst = arith.constant 0.000000e+00 : f32
    %0 = vector.broadcast %cst : f32 to vector<8x32xf32>
    %c0 = arith.constant 0 : index
    %c0_0 = arith.constant 0 : index
    %1 = vector.load %arg16[%c0, %c0_0] : memref<8x320xf32, #tpu.memory_space<vmem>>, vector<8x32xf32>
    tpu.vector_store %arg16[%c0, %c0_0], %0 {strides = array<i32>} : memref<8x320xf32, #tpu.memory_space<vmem>>, vector<8x32xf32>,
    %c0_1 = arith.constant 0 : index
    %c288 = arith.constant 288 : index
    %2 = vector.load %arg16[%c0_1, %c288] : memref<8x320xf32, #tpu.memory_space<vmem>>, vector<8x32xf32>
    tpu.vector_store %arg16[%c0_1, %c288], %0 {strides = array<i32>} : memref<8x320xf32, #tpu.memory_space<vmem>>, vector<8x32xf32>,
    %c0_2 = arith.constant 0 : index
    %c0_3 = arith.constant 0 : index
    %c0_4 = arith.constant 0 : index
    %3 = vector.load %arg1[%c0_2, %c0_3, %c0_4] : memref<1x8x256xf32, #tpu.memory_space<vmem>>, vector<1x8x256xf32>
    %4 = vector.shape_cast %3 : vector<1x8x256xf32> to vector<8x256xf32>
    %c0_5 = arith.constant 0 : index
    %c0_6 = arith.constant 0 : index
    %c0_7 = arith.constant 0 : index
    %5 = vector.load %arg2[%c0_5, %c0_6, %c0_7] : memref<1x1x256xf32, #tpu.memory_space<vmem>>, vector<1x1x256xf32>
    %6 = vector.shape_cast %5 : vector<1x1x256xf32> to vector<1x256xf32>
    %c0_8 = arith.constant 0 : index
    %c0_9 = arith.constant 0 : index
    %c0_10 = arith.constant 0 : index
    %7 = vector.load %arg3[%c0_8, %c0_9, %c0_10] : memref<3x8x1xf32, #tpu.memory_space<vmem>>, vector<1x8x1xf32>
    %8 = vector.shape_cast %7 : vector<1x8x1xf32> to vector<8x1xf32>
    %c0_11 = arith.constant 0 : index
    %c0_12 = arith.constant 0 : index
    %c0_13 = arith.constant 0 : index
    %9 = vector.load %arg4[%c0_11, %c0_12, %c0_13] : memref<3x8x1xf32, #tpu.memory_space<vmem>>, vector<1x8x1xf32>
    %10 = vector.shape_cast %9 : vector<1x8x1xf32> to vector<8x1xf32>
    %11 = vector.broadcast %8 : vector<8x1xf32> to vector<8x256xf32>
    %12 = arith.mulf %11, %4 : vector<8x256xf32>
    %13 = math.sin %12 : vector<8x256xf32>
    %14 = arith.mulf %13, %13 : vector<8x256xf32>
    %15 = vector.broadcast %10 : vector<8x1xf32> to vector<8x256xf32>
    %16 = arith.mulf %15, %14 : vector<8x256xf32>
    %17 = arith.addf %4, %16 : vector<8x256xf32>
    %c0_14 = arith.constant 0 : index
    %c32 = arith.constant 32 : index
    %18 = vector.load %arg16[%c0_14, %c32] : memref<8x320xf32, #tpu.memory_space<vmem>>, vector<8x256xf32>
    tpu.vector_store %arg16[%c0_14, %c32], %17 {strides = array<i32>} : memref<8x320xf32, #tpu.memory_space<vmem>>, vector<8x256xf32>,
    %cst_15 = arith.constant 0.000000e+00 : f32
    %19 = vector.broadcast %cst_15 : f32 to vector<8x256xf32>
    %c0_16 = arith.constant 0 : index
    %c29 = arith.constant 29 : index
    %20 = vector.load %arg16[%c0_16, %c29] : memref<8x320xf32, #tpu.memory_space<vmem>>, vector<8x256xf32>
    %c0_17 = arith.constant 0 : index
    %c0_18 = arith.constant 0 : index
    %c0_19 = arith.constant 0 : index
    %21 = vector.load %arg5[%c0_17, %c0_18, %c0_19] : memref<21x8x8xf32, #tpu.memory_space<vmem>>, vector<1x8x8xf32>
    %22 = vector.shape_cast %21 : vector<1x8x8xf32> to vector<8x8xf32>
    %cst_20 = arith.constant dense<0.000000e+00> : vector<8x256xf32>
    %23 = tpu.matmul %22, %20, %cst_20 {dimension_numbers = #tpu.dot_dimension_numbers<[1], [0], [0], [1], [0, 0, 1, 1], [], []>} : vector<8x8xf32>, vector<8x256xf32>, vector<8x256xf32> -> vector<8x256xf32>
    %24 = arith.addf %19, %23 : vector<8x256xf32>
    %c0_21 = arith.constant 0 : index
    %c30 = arith.constant 30 : index
    %25 = vector.load %arg16[%c0_21, %c30] : memref<8x320xf32, #tpu.memory_space<vmem>>, vector<8x256xf32>
    %c1 = arith.constant 1 : index
    %c0_22 = arith.constant 0 : index
    %c0_23 = arith.constant 0 : index
    %26 = vector.load %arg5[%c1, %c0_22, %c0_23] : memref<21x8x8xf32, #tpu.memory_space<vmem>>, vector<1x8x8xf32>
    %27 = vector.shape_cast %26 : vector<1x8x8xf32> to vector<8x8xf32>
    %cst_24 = arith.constant dense<0.000000e+00> : vector<8x256xf32>
    %28 = tpu.matmul %27, %25, %cst_24 {dimension_numbers = #tpu.dot_dimension_numbers<[1], [0], [0], [1], [0, 0, 1, 1], [], []>} : vector<8x8xf32>, vector<8x256xf32>, vector<8x256xf32> -> vector<8x256xf32>
    %29 = arith.addf %24, %28 : vector<8x256xf32>
    %c0_25 = arith.constant 0 : index
    %c31 = arith.constant 31 : index
    %30 = vector.load %arg16[%c0_25, %c31] : memref<8x320xf32, #tpu.memory_space<vmem>>, vector<8x256xf32>
    %c2 = arith.constant 2 : index
    %c0_26 = arith.constant 0 : index
    %c0_27 = arith.constant 0 : index
    %31 = vector.load %arg5[%c2, %c0_26, %c0_27] : memref<21x8x8xf32, #tpu.memory_space<vmem>>, vector<1x8x8xf32>
    %32 = vector.shape_cast %31 : vector<1x8x8xf32> to vector<8x8xf32>
    %cst_28 = arith.constant dense<0.000000e+00> : vector<8x256xf32>
    %33 = tpu.matmul %32, %30, %cst_28 {dimension_numbers = #tpu.dot_dimension_numbers<[1], [0], [0], [1], [0, 0, 1, 1], [], []>} : vector<8x8xf32>, vector<8x256xf32>, vector<8x256xf32> -> vector<8x256xf32>
    %34 = arith.addf %29, %33 : vector<8x256xf32>
    %c0_29 = arith.constant 0 : index
    %c32_30 = arith.constant 32 : index
    %35 = vector.load %arg16[%c0_29, %c32_30] : memref<8x320xf32, #tpu.memory_space<vmem>>, vector<8x256xf32>
    %c3 = arith.constant 3 : index
    %c0_31 = arith.constant 0 : index
    %c0_32 = arith.constant 0 : index
    %36 = vector.load %arg5[%c3, %c0_31, %c0_32] : memref<21x8x8xf32, #tpu.memory_space<vmem>>, vector<1x8x8xf32>
    %37 = vector.shape_cast %36 : vector<1x8x8xf32> to vector<8x8xf32>
    %cst_33 = arith.constant dense<0.000000e+00> : vector<8x256xf32>
    %38 = tpu.matmul %37, %35, %cst_33 {dimension_numbers = #tpu.dot_dimension_numbers<[1], [0], [0], [1], [0, 0, 1, 1], [], []>} : vector<8x8xf32>, vector<8x256xf32>, vector<8x256xf32> -> vector<8x256xf32>
    %39 = arith.addf %34, %38 : vector<8x256xf32>
    %c0_34 = arith.constant 0 : index
    %c33 = arith.constant 33 : index
    %40 = vector.load %arg16[%c0_34, %c33] : memref<8x320xf32, #tpu.memory_space<vmem>>, vector<8x256xf32>
    %c4 = arith.constant 4 : index
    %c0_35 = arith.constant 0 : index
    %c0_36 = arith.constant 0 : index
    %41 = vector.load %arg5[%c4, %c0_35, %c0_36] : memref<21x8x8xf32, #tpu.memory_space<vmem>>, vector<1x8x8xf32>
    %42 = vector.shape_cast %41 : vector<1x8x8xf32> to vector<8x8xf32>
    %cst_37 = arith.constant dense<0.000000e+00> : vector<8x256xf32>
    %43 = tpu.matmul %42, %40, %cst_37 {dimension_numbers = #tpu.dot_dimension_numbers<[1], [0], [0], [1], [0, 0, 1, 1], [], []>} : vector<8x8xf32>, vector<8x256xf32>, vector<8x256xf32> -> vector<8x256xf32>
    %44 = arith.addf %39, %43 : vector<8x256xf32>
    %c0_38 = arith.constant 0 : index
    %c34 = arith.constant 34 : index
    %45 = vector.load %arg16[%c0_38, %c34] : memref<8x320xf32, #tpu.memory_space<vmem>>, vector<8x256xf32>
    %c5 = arith.constant 5 : index
    %c0_39 = arith.constant 0 : index
    %c0_40 = arith.constant 0 : index
    %46 = vector.load %arg5[%c5, %c0_39, %c0_40] : memref<21x8x8xf32, #tpu.memory_space<vmem>>, vector<1x8x8xf32>
    %47 = vector.shape_cast %46 : vector<1x8x8xf32> to vector<8x8xf32>
    %cst_41 = arith.constant dense<0.000000e+00> : vector<8x256xf32>
    %48 = tpu.matmul %47, %45, %cst_41 {dimension_numbers = #tpu.dot_dimension_numbers<[1], [0], [0], [1], [0, 0, 1, 1], [], []>} : vector<8x8xf32>, vector<8x256xf32>, vector<8x256xf32> -> vector<8x256xf32>
    %49 = arith.addf %44, %48 : vector<8x256xf32>
    %c0_42 = arith.constant 0 : index
    %c35 = arith.constant 35 : index
    %50 = vector.load %arg16[%c0_42, %c35] : memref<8x320xf32, #tpu.memory_space<vmem>>, vector<8x256xf32>
    %c6 = arith.constant 6 : index
    %c0_43 = arith.constant 0 : index
    %c0_44 = arith.constant 0 : index
    %51 = vector.load %arg5[%c6, %c0_43, %c0_44] : memref<21x8x8xf32, #tpu.memory_space<vmem>>, vector<1x8x8xf32>
    %52 = vector.shape_cast %51 : vector<1x8x8xf32> to vector<8x8xf32>
    %cst_45 = arith.constant dense<0.000000e+00> : vector<8x256xf32>
    %53 = tpu.matmul %52, %50, %cst_45 {dimension_numbers = #tpu.dot_dimension_numbers<[1], [0], [0], [1], [0, 0, 1, 1], [], []>} : vector<8x8xf32>, vector<8x256xf32>, vector<8x256xf32> -> vector<8x256xf32>
    %54 = arith.addf %49, %53 : vector<8x256xf32>
    %c0_46 = arith.constant 0 : index
    %c0_47 = arith.constant 0 : index
    %c0_48 = arith.constant 0 : index
    %55 = vector.load %arg6[%c0_46, %c0_47, %c0_48] : memref<3x8x1xf32, #tpu.memory_space<vmem>>, vector<1x8x1xf32>
    %56 = vector.shape_cast %55 : vector<1x8x1xf32> to vector<8x1xf32>
    %57 = vector.broadcast %56 : vector<8x1xf32> to vector<8x256xf32>
    %58 = arith.addf %54, %57 : vector<8x256xf32>
    %c0_49 = arith.constant 0 : index
    %c0_50 = arith.constant 0 : index
    %c0_51 = arith.constant 0 : index
    %59 = vector.load %arg7[%c0_49, %c0_50, %c0_51] : memref<3x8x1xf32, #tpu.memory_space<vmem>>, vector<1x8x1xf32>
    %60 = vector.shape_cast %59 : vector<1x8x1xf32> to vector<8x1xf32>
    %c0_52 = arith.constant 0 : index
    %c0_53 = arith.constant 0 : index
    %c0_54 = arith.constant 0 : index
    %61 = vector.load %arg8[%c0_52, %c0_53, %c0_54] : memref<3x8x1xf32, #tpu.memory_space<vmem>>, vector<1x8x1xf32>
    %62 = vector.shape_cast %61 : vector<1x8x1xf32> to vector<8x1xf32>
    %63 = vector.broadcast %60 : vector<8x1xf32> to vector<8x256xf32>
    %64 = arith.mulf %63, %58 : vector<8x256xf32>
    %65 = math.sin %64 : vector<8x256xf32>
    %66 = arith.mulf %65, %65 : vector<8x256xf32>
    %67 = vector.broadcast %62 : vector<8x1xf32> to vector<8x256xf32>
    %68 = arith.mulf %67, %66 : vector<8x256xf32>
    %69 = arith.addf %58, %68 : vector<8x256xf32>
    %c0_55 = arith.constant 0 : index
    %c0_56 = arith.constant 0 : index
    %c0_57 = arith.constant 0 : index
    %70 = vector.load %arg9[%c0_55, %c0_56, %c0_57] : memref<3x8x8xf32, #tpu.memory_space<vmem>>, vector<1x8x8xf32>
    %71 = vector.shape_cast %70 : vector<1x8x8xf32> to vector<8x8xf32>
    %cst_58 = arith.constant dense<0.000000e+00> : vector<8x256xf32>
    %72 = tpu.matmul %71, %69, %cst_58 {dimension_numbers = #tpu.dot_dimension_numbers<[1], [0], [0], [1], [0, 0, 1, 1], [], []>} : vector<8x8xf32>, vector<8x256xf32>, vector<8x256xf32> -> vector<8x256xf32>
    %c0_59 = arith.constant 0 : index
    %c0_60 = arith.constant 0 : index
    %c0_61 = arith.constant 0 : index
    %73 = vector.load %arg10[%c0_59, %c0_60, %c0_61] : memref<3x8x1xf32, #tpu.memory_space<vmem>>, vector<1x8x1xf32>
    %74 = vector.shape_cast %73 : vector<1x8x1xf32> to vector<8x1xf32>
    %75 = vector.broadcast %74 : vector<8x1xf32> to vector<8x256xf32>
    %76 = arith.addf %72, %75 : vector<8x256xf32>
    %77 = vector.broadcast %6 : vector<1x256xf32> to vector<8x256xf32>
    %78 = arith.mulf %76, %77 : vector<8x256xf32>
    %79 = arith.addf %4, %78 : vector<8x256xf32>
    %c1_62 = arith.constant 1 : index
    %c0_63 = arith.constant 0 : index
    %c0_64 = arith.constant 0 : index
    %80 = vector.load %arg3[%c1_62, %c0_63, %c0_64] : memref<3x8x1xf32, #tpu.memory_space<vmem>>, vector<1x8x1xf32>
    %81 = vector.shape_cast %80 : vector<1x8x1xf32> to vector<8x1xf32>
    %c1_65 = arith.constant 1 : index
    %c0_66 = arith.constant 0 : index
    %c0_67 = arith.constant 0 : index
    %82 = vector.load %arg4[%c1_65, %c0_66, %c0_67] : memref<3x8x1xf32, #tpu.memory_space<vmem>>, vector<1x8x1xf32>
    %83 = vector.shape_cast %82 : vector<1x8x1xf32> to vector<8x1xf32>
    %84 = vector.broadcast %81 : vector<8x1xf32> to vector<8x256xf32>
    %85 = arith.mulf %84, %79 : vector<8x256xf32>
    %86 = math.sin %85 : vector<8x256xf32>
    %87 = arith.mulf %86, %86 : vector<8x256xf32>
    %88 = vector.broadcast %83 : vector<8x1xf32> to vector<8x256xf32>
    %89 = arith.mulf %88, %87 : vector<8x256xf32>
    %90 = arith.addf %79, %89 : vector<8x256xf32>
    %c0_68 = arith.constant 0 : index
    %c32_69 = arith.constant 32 : index
    %91 = vector.load %arg16[%c0_68, %c32_69] : memref<8x320xf32, #tpu.memory_space<vmem>>, vector<8x256xf32>
    tpu.vector_store %arg16[%c0_68, %c32_69], %90 {strides = array<i32>} : memref<8x320xf32, #tpu.memory_space<vmem>>, vector<8x256xf32>,
    %cst_70 = arith.constant 0.000000e+00 : f32
    %92 = vector.broadcast %cst_70 : f32 to vector<8x256xf32>
    %c0_71 = arith.constant 0 : index
    %c23 = arith.constant 23 : index
    %93 = vector.load %arg16[%c0_71, %c23] : memref<8x320xf32, #tpu.memory_space<vmem>>, vector<8x256xf32>
    %c7 = arith.constant 7 : index
    %c0_72 = arith.constant 0 : index
    %c0_73 = arith.constant 0 : index
    %94 = vector.load %arg5[%c7, %c0_72, %c0_73] : memref<21x8x8xf32, #tpu.memory_space<vmem>>, vector<1x8x8xf32>
    %95 = vector.shape_cast %94 : vector<1x8x8xf32> to vector<8x8xf32>
    %cst_74 = arith.constant dense<0.000000e+00> : vector<8x256xf32>
    %96 = tpu.matmul %95, %93, %cst_74 {dimension_numbers = #tpu.dot_dimension_numbers<[1], [0], [0], [1], [0, 0, 1, 1], [], []>} : vector<8x8xf32>, vector<8x256xf32>, vector<8x256xf32> -> vector<8x256xf32>
    %97 = arith.addf %92, %96 : vector<8x256xf32>
    %c0_75 = arith.constant 0 : index
    %c26 = arith.constant 26 : index
    %98 = vector.load %arg16[%c0_75, %c26] : memref<8x320xf32, #tpu.memory_space<vmem>>, vector<8x256xf32>
    %c8 = arith.constant 8 : index
    %c0_76 = arith.constant 0 : index
    %c0_77 = arith.constant 0 : index
    %99 = vector.load %arg5[%c8, %c0_76, %c0_77] : memref<21x8x8xf32, #tpu.memory_space<vmem>>, vector<1x8x8xf32>
    %100 = vector.shape_cast %99 : vector<1x8x8xf32> to vector<8x8xf32>
    %cst_78 = arith.constant dense<0.000000e+00> : vector<8x256xf32>
    %101 = tpu.matmul %100, %98, %cst_78 {dimension_numbers = #tpu.dot_dimension_numbers<[1], [0], [0], [1], [0, 0, 1, 1], [], []>} : vector<8x8xf32>, vector<8x256xf32>, vector<8x256xf32> -> vector<8x256xf32>
    %102 = arith.addf %97, %101 : vector<8x256xf32>
    %c0_79 = arith.constant 0 : index
    %c29_80 = arith.constant 29 : index
    %103 = vector.load %arg16[%c0_79, %c29_80] : memref<8x320xf32, #tpu.memory_space<vmem>>, vector<8x256xf32>
    %c9 = arith.constant 9 : index
    %c0_81 = arith.constant 0 : index
    %c0_82 = arith.constant 0 : index
    %104 = vector.load %arg5[%c9, %c0_81, %c0_82] : memref<21x8x8xf32, #tpu.memory_space<vmem>>, vector<1x8x8xf32>
    %105 = vector.shape_cast %104 : vector<1x8x8xf32> to vector<8x8xf32>
    %cst_83 = arith.constant dense<0.000000e+00> : vector<8x256xf32>
    %106 = tpu.matmul %105, %103, %cst_83 {dimension_numbers = #tpu.dot_dimension_numbers<[1], [0], [0], [1], [0, 0, 1, 1], [], []>} : vector<8x8xf32>, vector<8x256xf32>, vector<8x256xf32> -> vector<8x256xf32>
    %107 = arith.addf %102, %106 : vector<8x256xf32>
    %c0_84 = arith.constant 0 : index
    %c32_85 = arith.constant 32 : index
    %108 = vector.load %arg16[%c0_84, %c32_85] : memref<8x320xf32, #tpu.memory_space<vmem>>, vector<8x256xf32>
    %c10 = arith.constant 10 : index
    %c0_86 = arith.constant 0 : index
    %c0_87 = arith.constant 0 : index
    %109 = vector.load %arg5[%c10, %c0_86, %c0_87] : memref<21x8x8xf32, #tpu.memory_space<vmem>>, vector<1x8x8xf32>
    %110 = vector.shape_cast %109 : vector<1x8x8xf32> to vector<8x8xf32>
    %cst_88 = arith.constant dense<0.000000e+00> : vector<8x256xf32>
    %111 = tpu.matmul %110, %108, %cst_88 {dimension_numbers = #tpu.dot_dimension_numbers<[1], [0], [0], [1], [0, 0, 1, 1], [], []>} : vector<8x8xf32>, vector<8x256xf32>, vector<8x256xf32> -> vector<8x256xf32>
    %112 = arith.addf %107, %111 : vector<8x256xf32>
    %c0_89 = arith.constant 0 : index
    %c35_90 = arith.constant 35 : index
    %113 = vector.load %arg16[%c0_89, %c35_90] : memref<8x320xf32, #tpu.memory_space<vmem>>, vector<8x256xf32>
    %c11 = arith.constant 11 : index
    %c0_91 = arith.constant 0 : index
    %c0_92 = arith.constant 0 : index
    %114 = vector.load %arg5[%c11, %c0_91, %c0_92] : memref<21x8x8xf32, #tpu.memory_space<vmem>>, vector<1x8x8xf32>
    %115 = vector.shape_cast %114 : vector<1x8x8xf32> to vector<8x8xf32>
    %cst_93 = arith.constant dense<0.000000e+00> : vector<8x256xf32>
    %116 = tpu.matmul %115, %113, %cst_93 {dimension_numbers = #tpu.dot_dimension_numbers<[1], [0], [0], [1], [0, 0, 1, 1], [], []>} : vector<8x8xf32>, vector<8x256xf32>, vector<8x256xf32> -> vector<8x256xf32>
    %117 = arith.addf %112, %116 : vector<8x256xf32>
    %c0_94 = arith.constant 0 : index
    %c38 = arith.constant 38 : index
    %118 = vector.load %arg16[%c0_94, %c38] : memref<8x320xf32, #tpu.memory_space<vmem>>, vector<8x256xf32>
    %c12 = arith.constant 12 : index
    %c0_95 = arith.constant 0 : index
    %c0_96 = arith.constant 0 : index
    %119 = vector.load %arg5[%c12, %c0_95, %c0_96] : memref<21x8x8xf32, #tpu.memory_space<vmem>>, vector<1x8x8xf32>
    %120 = vector.shape_cast %119 : vector<1x8x8xf32> to vector<8x8xf32>
    %cst_97 = arith.constant dense<0.000000e+00> : vector<8x256xf32>
    %121 = tpu.matmul %120, %118, %cst_97 {dimension_numbers = #tpu.dot_dimension_numbers<[1], [0], [0], [1], [0, 0, 1, 1], [], []>} : vector<8x8xf32>, vector<8x256xf32>, vector<8x256xf32> -> vector<8x256xf32>
    %122 = arith.addf %117, %121 : vector<8x256xf32>
    %c0_98 = arith.constant 0 : index
    %c41 = arith.constant 41 : index
    %123 = vector.load %arg16[%c0_98, %c41] : memref<8x320xf32, #tpu.memory_space<vmem>>, vector<8x256xf32>
    %c13 = arith.constant 13 : index
    %c0_99 = arith.constant 0 : index
    %c0_100 = arith.constant 0 : index
    %124 = vector.load %arg5[%c13, %c0_99, %c0_100] : memref<21x8x8xf32, #tpu.memory_space<vmem>>, vector<1x8x8xf32>
    %125 = vector.shape_cast %124 : vector<1x8x8xf32> to vector<8x8xf32>
    %cst_101 = arith.constant dense<0.000000e+00> : vector<8x256xf32>
    %126 = tpu.matmul %125, %123, %cst_101 {dimension_numbers = #tpu.dot_dimension_numbers<[1], [0], [0], [1], [0, 0, 1, 1], [], []>} : vector<8x8xf32>, vector<8x256xf32>, vector<8x256xf32> -> vector<8x256xf32>
    %127 = arith.addf %122, %126 : vector<8x256xf32>
    %c1_102 = arith.constant 1 : index
    %c0_103 = arith.constant 0 : index
    %c0_104 = arith.constant 0 : index
    %128 = vector.load %arg6[%c1_102, %c0_103, %c0_104] : memref<3x8x1xf32, #tpu.memory_space<vmem>>, vector<1x8x1xf32>
    %129 = vector.shape_cast %128 : vector<1x8x1xf32> to vector<8x1xf32>
    %130 = vector.broadcast %129 : vector<8x1xf32> to vector<8x256xf32>
    %131 = arith.addf %127, %130 : vector<8x256xf32>
    %c1_105 = arith.constant 1 : index
    %c0_106 = arith.constant 0 : index
    %c0_107 = arith.constant 0 : index
    %132 = vector.load %arg7[%c1_105, %c0_106, %c0_107] : memref<3x8x1xf32, #tpu.memory_space<vmem>>, vector<1x8x1xf32>
    %133 = vector.shape_cast %132 : vector<1x8x1xf32> to vector<8x1xf32>
    %c1_108 = arith.constant 1 : index
    %c0_109 = arith.constant 0 : index
    %c0_110 = arith.constant 0 : index
    %134 = vector.load %arg8[%c1_108, %c0_109, %c0_110] : memref<3x8x1xf32, #tpu.memory_space<vmem>>, vector<1x8x1xf32>
    %135 = vector.shape_cast %134 : vector<1x8x1xf32> to vector<8x1xf32>
    %136 = vector.broadcast %133 : vector<8x1xf32> to vector<8x256xf32>
    %137 = arith.mulf %136, %131 : vector<8x256xf32>
    %138 = math.sin %137 : vector<8x256xf32>
    %139 = arith.mulf %138, %138 : vector<8x256xf32>
    %140 = vector.broadcast %135 : vector<8x1xf32> to vector<8x256xf32>
    %141 = arith.mulf %140, %139 : vector<8x256xf32>
    %142 = arith.addf %131, %141 : vector<8x256xf32>
    %c1_111 = arith.constant 1 : index
    %c0_112 = arith.constant 0 : index
    %c0_113 = arith.constant 0 : index
    %143 = vector.load %arg9[%c1_111, %c0_112, %c0_113] : memref<3x8x8xf32, #tpu.memory_space<vmem>>, vector<1x8x8xf32>
    %144 = vector.shape_cast %143 : vector<1x8x8xf32> to vector<8x8xf32>
    %cst_114 = arith.constant dense<0.000000e+00> : vector<8x256xf32>
    %145 = tpu.matmul %144, %142, %cst_114 {dimension_numbers = #tpu.dot_dimension_numbers<[1], [0], [0], [1], [0, 0, 1, 1], [], []>} : vector<8x8xf32>, vector<8x256xf32>, vector<8x256xf32> -> vector<8x256xf32>
    %c1_115 = arith.constant 1 : index
    %c0_116 = arith.constant 0 : index
    %c0_117 = arith.constant 0 : index
    %146 = vector.load %arg10[%c1_115, %c0_116, %c0_117] : memref<3x8x1xf32, #tpu.memory_space<vmem>>, vector<1x8x1xf32>
    %147 = vector.shape_cast %146 : vector<1x8x1xf32> to vector<8x1xf32>
    %148 = vector.broadcast %147 : vector<8x1xf32> to vector<8x256xf32>
    %149 = arith.addf %145, %148 : vector<8x256xf32>
    %150 = vector.broadcast %6 : vector<1x256xf32> to vector<8x256xf32>
    %151 = arith.mulf %149, %150 : vector<8x256xf32>
    %152 = arith.addf %79, %151 : vector<8x256xf32>
    %c2_118 = arith.constant 2 : index
    %c0_119 = arith.constant 0 : index
    %c0_120 = arith.constant 0 : index
    %153 = vector.load %arg3[%c2_118, %c0_119, %c0_120] : memref<3x8x1xf32, #tpu.memory_space<vmem>>, vector<1x8x1xf32>
    %154 = vector.shape_cast %153 : vector<1x8x1xf32> to vector<8x1xf32>
    %c2_121 = arith.constant 2 : index
    %c0_122 = arith.constant 0 : index
    %c0_123 = arith.constant 0 : index
    %155 = vector.load %arg4[%c2_121, %c0_122, %c0_123] : memref<3x8x1xf32, #tpu.memory_space<vmem>>, vector<1x8x1xf32>
    %156 = vector.shape_cast %155 : vector<1x8x1xf32> to vector<8x1xf32>
    %157 = vector.broadcast %154 : vector<8x1xf32> to vector<8x256xf32>
    %158 = arith.mulf %157, %152 : vector<8x256xf32>
    %159 = math.sin %158 : vector<8x256xf32>
    %160 = arith.mulf %159, %159 : vector<8x256xf32>
    %161 = vector.broadcast %156 : vector<8x1xf32> to vector<8x256xf32>
    %162 = arith.mulf %161, %160 : vector<8x256xf32>
    %163 = arith.addf %152, %162 : vector<8x256xf32>
    %c0_124 = arith.constant 0 : index
    %c32_125 = arith.constant 32 : index
    %164 = vector.load %arg16[%c0_124, %c32_125] : memref<8x320xf32, #tpu.memory_space<vmem>>, vector<8x256xf32>
    tpu.vector_store %arg16[%c0_124, %c32_125], %163 {strides = array<i32>} : memref<8x320xf32, #tpu.memory_space<vmem>>, vector<8x256xf32>,
    %cst_126 = arith.constant 0.000000e+00 : f32
    %165 = vector.broadcast %cst_126 : f32 to vector<8x256xf32>
    %c0_127 = arith.constant 0 : index
    %c5_128 = arith.constant 5 : index
    %166 = vector.load %arg16[%c0_127, %c5_128] : memref<8x320xf32, #tpu.memory_space<vmem>>, vector<8x256xf32>
    %c14 = arith.constant 14 : index
    %c0_129 = arith.constant 0 : index
    %c0_130 = arith.constant 0 : index
    %167 = vector.load %arg5[%c14, %c0_129, %c0_130] : memref<21x8x8xf32, #tpu.memory_space<vmem>>, vector<1x8x8xf32>
    %168 = vector.shape_cast %167 : vector<1x8x8xf32> to vector<8x8xf32>
    %cst_131 = arith.constant dense<0.000000e+00> : vector<8x256xf32>
    %169 = tpu.matmul %168, %166, %cst_131 {dimension_numbers = #tpu.dot_dimension_numbers<[1], [0], [0], [1], [0, 0, 1, 1], [], []>} : vector<8x8xf32>, vector<8x256xf32>, vector<8x256xf32> -> vector<8x256xf32>
    %170 = arith.addf %165, %169 : vector<8x256xf32>
    %c0_132 = arith.constant 0 : index
    %c14_133 = arith.constant 14 : index
    %171 = vector.load %arg16[%c0_132, %c14_133] : memref<8x320xf32, #tpu.memory_space<vmem>>, vector<8x256xf32>
    %c15 = arith.constant 15 : index
    %c0_134 = arith.constant 0 : index
    %c0_135 = arith.constant 0 : index
    %172 = vector.load %arg5[%c15, %c0_134, %c0_135] : memref<21x8x8xf32, #tpu.memory_space<vmem>>, vector<1x8x8xf32>
    %173 = vector.shape_cast %172 : vector<1x8x8xf32> to vector<8x8xf32>
    %cst_136 = arith.constant dense<0.000000e+00> : vector<8x256xf32>
    %174 = tpu.matmul %173, %171, %cst_136 {dimension_numbers = #tpu.dot_dimension_numbers<[1], [0], [0], [1], [0, 0, 1, 1], [], []>} : vector<8x8xf32>, vector<8x256xf32>, vector<8x256xf32> -> vector<8x256xf32>
    %175 = arith.addf %170, %174 : vector<8x256xf32>
    %c0_137 = arith.constant 0 : index
    %c23_138 = arith.constant 23 : index
    %176 = vector.load %arg16[%c0_137, %c23_138] : memref<8x320xf32, #tpu.memory_space<vmem>>, vector<8x256xf32>
    %c16 = arith.constant 16 : index
    %c0_139 = arith.constant 0 : index
    %c0_140 = arith.constant 0 : index
    %177 = vector.load %arg5[%c16, %c0_139, %c0_140] : memref<21x8x8xf32, #tpu.memory_space<vmem>>, vector<1x8x8xf32>
    %178 = vector.shape_cast %177 : vector<1x8x8xf32> to vector<8x8xf32>
    %cst_141 = arith.constant dense<0.000000e+00> : vector<8x256xf32>
    %179 = tpu.matmul %178, %176, %cst_141 {dimension_numbers = #tpu.dot_dimension_numbers<[1], [0], [0], [1], [0, 0, 1, 1], [], []>} : vector<8x8xf32>, vector<8x256xf32>, vector<8x256xf32> -> vector<8x256xf32>
    %180 = arith.addf %175, %179 : vector<8x256xf32>
    %c0_142 = arith.constant 0 : index
    %c32_143 = arith.constant 32 : index
    %181 = vector.load %arg16[%c0_142, %c32_143] : memref<8x320xf32, #tpu.memory_space<vmem>>, vector<8x256xf32>
    %c17 = arith.constant 17 : index
    %c0_144 = arith.constant 0 : index
    %c0_145 = arith.constant 0 : index
    %182 = vector.load %arg5[%c17, %c0_144, %c0_145] : memref<21x8x8xf32, #tpu.memory_space<vmem>>, vector<1x8x8xf32>
    %183 = vector.shape_cast %182 : vector<1x8x8xf32> to vector<8x8xf32>
    %cst_146 = arith.constant dense<0.000000e+00> : vector<8x256xf32>
    %184 = tpu.matmul %183, %181, %cst_146 {dimension_numbers = #tpu.dot_dimension_numbers<[1], [0], [0], [1], [0, 0, 1, 1], [], []>} : vector<8x8xf32>, vector<8x256xf32>, vector<8x256xf32> -> vector<8x256xf32>
    %185 = arith.addf %180, %184 : vector<8x256xf32>
    %c0_147 = arith.constant 0 : index
    %c41_148 = arith.constant 41 : index
    %186 = vector.load %arg16[%c0_147, %c41_148] : memref<8x320xf32, #tpu.memory_space<vmem>>, vector<8x256xf32>
    %c18 = arith.constant 18 : index
    %c0_149 = arith.constant 0 : index
    %c0_150 = arith.constant 0 : index
    %187 = vector.load %arg5[%c18, %c0_149, %c0_150] : memref<21x8x8xf32, #tpu.memory_space<vmem>>, vector<1x8x8xf32>
    %188 = vector.shape_cast %187 : vector<1x8x8xf32> to vector<8x8xf32>
    %cst_151 = arith.constant dense<0.000000e+00> : vector<8x256xf32>
    %189 = tpu.matmul %188, %186, %cst_151 {dimension_numbers = #tpu.dot_dimension_numbers<[1], [0], [0], [1], [0, 0, 1, 1], [], []>} : vector<8x8xf32>, vector<8x256xf32>, vector<8x256xf32> -> vector<8x256xf32>
    %190 = arith.addf %185, %189 : vector<8x256xf32>
    %c0_152 = arith.constant 0 : index
    %c50 = arith.constant 50 : index
    %191 = vector.load %arg16[%c0_152, %c50] : memref<8x320xf32, #tpu.memory_space<vmem>>, vector<8x256xf32>
    %c19 = arith.constant 19 : index
    %c0_153 = arith.constant 0 : index
    %c0_154 = arith.constant 0 : index
    %192 = vector.load %arg5[%c19, %c0_153, %c0_154] : memref<21x8x8xf32, #tpu.memory_space<vmem>>, vector<1x8x8xf32>
    %193 = vector.shape_cast %192 : vector<1x8x8xf32> to vector<8x8xf32>
    %cst_155 = arith.constant dense<0.000000e+00> : vector<8x256xf32>
    %194 = tpu.matmul %193, %191, %cst_155 {dimension_numbers = #tpu.dot_dimension_numbers<[1], [0], [0], [1], [0, 0, 1, 1], [], []>} : vector<8x8xf32>, vector<8x256xf32>, vector<8x256xf32> -> vector<8x256xf32>
    %195 = arith.addf %190, %194 : vector<8x256xf32>
    %c0_156 = arith.constant 0 : index
    %c59 = arith.constant 59 : index
    %196 = vector.load %arg16[%c0_156, %c59] : memref<8x320xf32, #tpu.memory_space<vmem>>, vector<8x256xf32>
    %c20 = arith.constant 20 : index
    %c0_157 = arith.constant 0 : index
    %c0_158 = arith.constant 0 : index
    %197 = vector.load %arg5[%c20, %c0_157, %c0_158] : memref<21x8x8xf32, #tpu.memory_space<vmem>>, vector<1x8x8xf32>
    %198 = vector.shape_cast %197 : vector<1x8x8xf32> to vector<8x8xf32>
    %cst_159 = arith.constant dense<0.000000e+00> : vector<8x256xf32>
    %199 = tpu.matmul %198, %196, %cst_159 {dimension_numbers = #tpu.dot_dimension_numbers<[1], [0], [0], [1], [0, 0, 1, 1], [], []>} : vector<8x8xf32>, vector<8x256xf32>, vector<8x256xf32> -> vector<8x256xf32>
    %200 = arith.addf %195, %199 : vector<8x256xf32>
    %c2_160 = arith.constant 2 : index
    %c0_161 = arith.constant 0 : index
    %c0_162 = arith.constant 0 : index
    %201 = vector.load %arg6[%c2_160, %c0_161, %c0_162] : memref<3x8x1xf32, #tpu.memory_space<vmem>>, vector<1x8x1xf32>
    %202 = vector.shape_cast %201 : vector<1x8x1xf32> to vector<8x1xf32>
    %203 = vector.broadcast %202 : vector<8x1xf32> to vector<8x256xf32>
    %204 = arith.addf %200, %203 : vector<8x256xf32>
    %c2_163 = arith.constant 2 : index
    %c0_164 = arith.constant 0 : index
    %c0_165 = arith.constant 0 : index
    %205 = vector.load %arg7[%c2_163, %c0_164, %c0_165] : memref<3x8x1xf32, #tpu.memory_space<vmem>>, vector<1x8x1xf32>
    %206 = vector.shape_cast %205 : vector<1x8x1xf32> to vector<8x1xf32>
    %c2_166 = arith.constant 2 : index
    %c0_167 = arith.constant 0 : index
    %c0_168 = arith.constant 0 : index
    %207 = vector.load %arg8[%c2_166, %c0_167, %c0_168] : memref<3x8x1xf32, #tpu.memory_space<vmem>>, vector<1x8x1xf32>
    %208 = vector.shape_cast %207 : vector<1x8x1xf32> to vector<8x1xf32>
    %209 = vector.broadcast %206 : vector<8x1xf32> to vector<8x256xf32>
    %210 = arith.mulf %209, %204 : vector<8x256xf32>
    %211 = math.sin %210 : vector<8x256xf32>
    %212 = arith.mulf %211, %211 : vector<8x256xf32>
    %213 = vector.broadcast %208 : vector<8x1xf32> to vector<8x256xf32>
    %214 = arith.mulf %213, %212 : vector<8x256xf32>
    %215 = arith.addf %204, %214 : vector<8x256xf32>
    %c2_169 = arith.constant 2 : index
    %c0_170 = arith.constant 0 : index
    %c0_171 = arith.constant 0 : index
    %216 = vector.load %arg9[%c2_169, %c0_170, %c0_171] : memref<3x8x8xf32, #tpu.memory_space<vmem>>, vector<1x8x8xf32>
    %217 = vector.shape_cast %216 : vector<1x8x8xf32> to vector<8x8xf32>
    %cst_172 = arith.constant dense<0.000000e+00> : vector<8x256xf32>
    %218 = tpu.matmul %217, %215, %cst_172 {dimension_numbers = #tpu.dot_dimension_numbers<[1], [0], [0], [1], [0, 0, 1, 1], [], []>} : vector<8x8xf32>, vector<8x256xf32>, vector<8x256xf32> -> vector<8x256xf32>
    %c2_173 = arith.constant 2 : index
    %c0_174 = arith.constant 0 : index
    %c0_175 = arith.constant 0 : index
    %219 = vector.load %arg10[%c2_173, %c0_174, %c0_175] : memref<3x8x1xf32, #tpu.memory_space<vmem>>, vector<1x8x1xf32>
    %220 = vector.shape_cast %219 : vector<1x8x1xf32> to vector<8x1xf32>
    %221 = vector.broadcast %220 : vector<8x1xf32> to vector<8x256xf32>
    %222 = arith.addf %218, %221 : vector<8x256xf32>
    %223 = vector.broadcast %6 : vector<1x256xf32> to vector<8x256xf32>
    %224 = arith.mulf %222, %223 : vector<8x256xf32>
    %225 = arith.addf %152, %224 : vector<8x256xf32>
    %c0_176 = arith.constant 0 : index
    %c0_177 = arith.constant 0 : index
    %226 = vector.load %arg11[%c0_176, %c0_177] : memref<8x1xf32, #tpu.memory_space<vmem>>, vector<8x1xf32>
    %c0_178 = arith.constant 0 : index
    %c0_179 = arith.constant 0 : index
    %227 = vector.load %arg12[%c0_178, %c0_179] : memref<8x1xf32, #tpu.memory_space<vmem>>, vector<8x1xf32>
    %228 = vector.broadcast %226 : vector<8x1xf32> to vector<8x256xf32>
    %229 = arith.mulf %228, %225 : vector<8x256xf32>
    %230 = math.sin %229 : vector<8x256xf32>
    %231 = arith.mulf %230, %230 : vector<8x256xf32>
    %232 = vector.broadcast %227 : vector<8x1xf32> to vector<8x256xf32>
    %233 = arith.mulf %232, %231 : vector<8x256xf32>
    %234 = arith.addf %225, %233 : vector<8x256xf32>
    %c0_180 = arith.constant 0 : index
    %c32_181 = arith.constant 32 : index
    %235 = vector.load %arg16[%c0_180, %c32_181] : memref<8x320xf32, #tpu.memory_space<vmem>>, vector<8x256xf32>
    tpu.vector_store %arg16[%c0_180, %c32_181], %234 {strides = array<i32>} : memref<8x320xf32, #tpu.memory_space<vmem>>, vector<8x256xf32>,
    %cst_182 = arith.constant 0.000000e+00 : f32
    %236 = vector.broadcast %cst_182 : f32 to vector<16x128xf32>
    %c0_183 = arith.constant 0 : index
    %c95 = arith.constant 95 : index
    %237 = vector.load %arg16[%c0_183, %c95] : memref<8x320xf32, #tpu.memory_space<vmem>>, vector<8x128xf32>
    %c0_184 = arith.constant 0 : index
    %c0_185 = arith.constant 0 : index
    %c0_186 = arith.constant 0 : index
    %238 = vector.load %arg13[%c0_184, %c0_185, %c0_186] : memref<2x16x8xf32, #tpu.memory_space<vmem>>, vector<1x16x8xf32>
    %239 = vector.shape_cast %238 : vector<1x16x8xf32> to vector<16x8xf32>
    %cst_187 = arith.constant dense<0.000000e+00> : vector<16x128xf32>
    %240 = tpu.matmul %239, %237, %cst_187 {dimension_numbers = #tpu.dot_dimension_numbers<[1], [0], [0], [1], [0, 0, 1, 1], [], []>} : vector<16x8xf32>, vector<8x128xf32>, vector<16x128xf32> -> vector<16x128xf32>
    %241 = arith.addf %236, %240 : vector<16x128xf32>
    %c0_188 = arith.constant 0 : index
    %c96 = arith.constant 96 : index
    %242 = vector.load %arg16[%c0_188, %c96] : memref<8x320xf32, #tpu.memory_space<vmem>>, vector<8x128xf32>
    %c1_189 = arith.constant 1 : index
    %c0_190 = arith.constant 0 : index
    %c0_191 = arith.constant 0 : index
    %243 = vector.load %arg13[%c1_189, %c0_190, %c0_191] : memref<2x16x8xf32, #tpu.memory_space<vmem>>, vector<1x16x8xf32>
    %244 = vector.shape_cast %243 : vector<1x16x8xf32> to vector<16x8xf32>
    %cst_192 = arith.constant dense<0.000000e+00> : vector<16x128xf32>
    %245 = tpu.matmul %244, %242, %cst_192 {dimension_numbers = #tpu.dot_dimension_numbers<[1], [0], [0], [1], [0, 0, 1, 1], [], []>} : vector<16x8xf32>, vector<8x128xf32>, vector<16x128xf32> -> vector<16x128xf32>
    %246 = arith.addf %241, %245 : vector<16x128xf32>
    %c0_193 = arith.constant 0 : index
    %c0_194 = arith.constant 0 : index
    %247 = vector.load %arg14[%c0_193, %c0_194] : memref<16x1xf32, #tpu.memory_space<vmem>>, vector<16x1xf32>
    %248 = vector.broadcast %247 : vector<16x1xf32> to vector<16x128xf32>
    %249 = arith.addf %246, %248 : vector<16x128xf32>
    %c0_195 = arith.constant 0 : index
    %c0_196 = arith.constant 0 : index
    %250 = vector.load %arg15[%c0_195, %c0_196] : memref<16x128xf32, #tpu.memory_space<vmem>>, vector<16x128xf32>
    tpu.vector_store %arg15[%c0_195, %c0_196], %249 {strides = array<i32>} : memref<16x128xf32, #tpu.memory_space<vmem>>, vector<16x128xf32>,
    return
  }
  func.func @transform_0(%arg0: i32) -> (i32, i32, i32) {
    %c0_i32 = arith.constant 0 : i32
    %c0_i32_0 = arith.constant 0 : i32
    %c0_i32_1 = arith.constant 0 : i32
    return %arg0, %c0_i32, %c0_i32_0 : i32, i32, i32
  }
  func.func @transform_1(%arg0: i32) -> (i32, i32, i32) {
    %c0_i32 = arith.constant 0 : i32
    %c0_i32_0 = arith.constant 0 : i32
    %c0_i32_1 = arith.constant 0 : i32
    return %arg0, %c0_i32, %c0_i32_0 : i32, i32, i32
  }
  func.func @transform_2(%arg0: i32) -> (i32, i32, i32) {
    %c0_i32 = arith.constant 0 : i32
    %c0_i32_0 = arith.constant 0 : i32
    %c0_i32_1 = arith.constant 0 : i32
    %c0_i32_2 = arith.constant 0 : i32
    return %c0_i32, %c0_i32_0, %c0_i32_1 : i32, i32, i32
  }
  func.func @transform_3(%arg0: i32) -> (i32, i32, i32) {
    %c0_i32 = arith.constant 0 : i32
    %c0_i32_0 = arith.constant 0 : i32
    %c0_i32_1 = arith.constant 0 : i32
    %c0_i32_2 = arith.constant 0 : i32
    return %c0_i32, %c0_i32_0, %c0_i32_1 : i32, i32, i32
  }
  func.func @transform_4(%arg0: i32) -> (i32, i32, i32) {
    %c0_i32 = arith.constant 0 : i32
    %c0_i32_0 = arith.constant 0 : i32
    %c0_i32_1 = arith.constant 0 : i32
    %c0_i32_2 = arith.constant 0 : i32
    return %c0_i32, %c0_i32_0, %c0_i32_1 : i32, i32, i32
  }
  func.func @transform_5(%arg0: i32) -> (i32, i32, i32) {
    %c0_i32 = arith.constant 0 : i32
    %c0_i32_0 = arith.constant 0 : i32
    %c0_i32_1 = arith.constant 0 : i32
    %c0_i32_2 = arith.constant 0 : i32
    return %c0_i32, %c0_i32_0, %c0_i32_1 : i32, i32, i32
  }
  func.func @transform_6(%arg0: i32) -> (i32, i32, i32) {
    %c0_i32 = arith.constant 0 : i32
    %c0_i32_0 = arith.constant 0 : i32
    %c0_i32_1 = arith.constant 0 : i32
    %c0_i32_2 = arith.constant 0 : i32
    return %c0_i32, %c0_i32_0, %c0_i32_1 : i32, i32, i32
  }
  func.func @transform_7(%arg0: i32) -> (i32, i32, i32) {
    %c0_i32 = arith.constant 0 : i32
    %c0_i32_0 = arith.constant 0 : i32
    %c0_i32_1 = arith.constant 0 : i32
    %c0_i32_2 = arith.constant 0 : i32
    return %c0_i32, %c0_i32_0, %c0_i32_1 : i32, i32, i32
  }
  func.func @transform_8(%arg0: i32) -> (i32, i32, i32) {
    %c0_i32 = arith.constant 0 : i32
    %c0_i32_0 = arith.constant 0 : i32
    %c0_i32_1 = arith.constant 0 : i32
    %c0_i32_2 = arith.constant 0 : i32
    return %c0_i32, %c0_i32_0, %c0_i32_1 : i32, i32, i32
  }
  func.func @transform_9(%arg0: i32) -> (i32, i32, i32) {
    %c0_i32 = arith.constant 0 : i32
    %c0_i32_0 = arith.constant 0 : i32
    %c0_i32_1 = arith.constant 0 : i32
    %c0_i32_2 = arith.constant 0 : i32
    return %c0_i32, %c0_i32_0, %c0_i32_1 : i32, i32, i32
  }
  func.func @transform_10(%arg0: i32) -> (i32, i32) {
    %c0_i32 = arith.constant 0 : i32
    %c0_i32_0 = arith.constant 0 : i32
    %c0_i32_1 = arith.constant 0 : i32
    return %c0_i32, %c0_i32_0 : i32, i32
  }
  func.func @transform_11(%arg0: i32) -> (i32, i32) {
    %c0_i32 = arith.constant 0 : i32
    %c0_i32_0 = arith.constant 0 : i32
    %c0_i32_1 = arith.constant 0 : i32
    return %c0_i32, %c0_i32_0 : i32, i32
  }
  func.func @transform_12(%arg0: i32) -> (i32, i32, i32) {
    %c0_i32 = arith.constant 0 : i32
    %c0_i32_0 = arith.constant 0 : i32
    %c0_i32_1 = arith.constant 0 : i32
    %c0_i32_2 = arith.constant 0 : i32
    return %c0_i32, %c0_i32_0, %c0_i32_1 : i32, i32, i32
  }
  func.func @transform_13(%arg0: i32) -> (i32, i32) {
    %c0_i32 = arith.constant 0 : i32
    %c0_i32_0 = arith.constant 0 : i32
    %c0_i32_1 = arith.constant 0 : i32
    return %c0_i32, %c0_i32_0 : i32, i32
  }
  func.func @transform_14(%arg0: i32) -> (i32, i32) {
    %c0_i32 = arith.constant 0 : i32
    %c0_i32_0 = arith.constant 0 : i32
    return %c0_i32, %arg0 : i32, i32
  }
}

</mosaic_0001>

<bundles_post_ra>
// kernel: encoder_block_forward.1
= control target key start
LH: loop header
LB: loop body
LE: loop exit
PB: predicated region body
PF: predicated region fallthrough
CT: control target
= control target key end

     0   :  { %s6123_s0 = inlined_call_operand.vmem [shape: f32[2,8,256], index: 0, kind: input, shape index: {}]   ;;  %s6124_s1 = inlined_call_operand.vmem [shape: f32[2,1,256], index: 1, kind: input, shape index: {}]   ;;  %s6125_s2 = inlined_call_operand.vmem [shape: f32[3,8,1], index: 2, kind: input, shape index: {}]   ;;  %s6126_s3 = inlined_call_operand.vmem [shape: f32[3,8,1], index: 3, kind: input, shape index: {}]   ;;  %s6127_s4 = inlined_call_operand.vmem [shape: f32[21,8,8], index: 4, kind: input, shape index: {}]   ;;  %s6128_s5 = inlined_call_operand.vmem [shape: f32[3,8,1], index: 5, kind: input, shape index: {}]   ;;  %s6129_s6 = inlined_call_operand.vmem [shape: f32[3,8,1], index: 6, kind: input, shape index: {}]   ;;  %s6130_s7 = inlined_call_operand.vmem [shape: f32[3,8,1], index: 7, kind: input, shape index: {}]   ;;  %s6131_s8 = inlined_call_operand.vmem [shape: f32[3,8,8], index: 8, kind: input, shape index: {}]   ;;  %s6132_s9 = inlined_call_operand.vmem [shape: f32[3,8,1], index: 9, kind: input, shape index: {}]   ;;  %s6133_s10 = inlined_call_operand.vmem [shape: f32[8,1], index: 10, kind: input, shape index: {}]   ;;  %s6134_s11 = inlined_call_operand.vmem [shape: f32[8,1], index: 11, kind: input, shape index: {}]   ;;  %s6135_s12 = inlined_call_operand.vmem [shape: f32[2,16,8], index: 12, kind: input, shape index: {}]   ;;  %s6136_s13 = inlined_call_operand.vmem [shape: f32[16,1], index: 13, kind: input, shape index: {}]   ;;  %s6137_s14 = inlined_call_operand.vmem [shape: f32[16,256], index: 14, kind: output, shape index: {}]  }
   0x1   :  { %6150 = sst [smem:[#allocation5_spill]] %s6123_s0 }
   0x2   :  { %s5092_s29 = smov 0   ;;  %s5094_s30 = smov 0  }
   0x3   :  { %s5096_s15 = smov 0  }
   0x4 LB: > { %s5105_s16 = sadd.s32 4294967295, %s4990_s15   ;;  %s5107_s17 = sadd.s32 1, %s4990_s15   ;;  %s4990_s15 = sphi %s5096_s15, %s6165_s15   ;;  %s4986_s30 = sphi %s5094_s30, %s6164_s30   ;;  %s4982_s29 = sphi %s5092_s29, %s6163_s29  }
   0x5   : > { %s332_s18 = ssub.s32 %s4990_s15, %s5107_s17  ;;  %s335_s19 = sadd.s32 1, %s4986_s30 }
   0x6   : > { %p333_p0 = scmp.eq.s32.totalorder %s332_s18, 0  ;;  %p345_p1 = scmp.ne.s32.totalorder %s4986_s30, %s4982_s29 }
   0x7   : > { %p346_p2 = scmp.eq.s32.totalorder %s5105_s16, 1  ;;  %p4619_p3 = scmp.ge.s32.totalorder %s4990_s15, 1 }
   0x8   : > { %s5115_s20 = scalar_select %p333_p0, %s4986_s30, %s335_s19  }
   0x9   : > { %p5117_p4 = por %p346_p2, %p345_p1  ;;  %p421_p5 = scmp.lt.s32.totalorder %s4990_s15, 3 }
   0xa   : > { %6151 = sst [smem:[#allocation4_spill]] %s5115_s20 }
   0xb   : > { %p422_p6 = pnand %p4619_p3, %p421_p5 }
   0xc   : > { %v486_v0 = vld [vmem:[%s6125_s2] sm:$0xff] (!%p422_p6)  ;;  %v4992_v1 = vmov (!%p422_p6), 0   ;;  %vm479_vm0 = vcmask (!%p422_p6), 261120   ;;  %v4993_v3 = vmov (!%p422_p6), 0.0   ;;  %p470_p7 = scmp.lt.s32.totalorder (!%p422_p6), %s5105_s16, 1  ;;  %s6153_s0 = sld [smem:[#allocation5_spill]] (!%p422_p6) }
   0xd   : > { %425 = sbr.rel (%p422_p6) target bundleno = 3445 (0xd75), region = 76  ;;  %4908 = vset.pattern.permute.xlu0 (!%p422_p6), %v4992_v1  ;;  %4909 = vset.pattern.permute.xlu1 (!%p422_p6), %v4992_v1  ;;  %v487_v2 = vld [vmem:[%s6126_s3] sm:$0xff] (!%p422_p6)  ;;  %480 = vst.msk [vmem:[#allocation2] sm:$0xff] (!%p422_p6), %vm479_vm0, %v4993_v3  ;;  %v4994_v29 = vmov (!%p422_p6), 683565275   ;;  %s6140_s19 = smov (!%p422_p6), 32  }
   0xe   : > { %490 = vperm.xlu0 (!%p422_p6), %4908, %v486_v0   ;;  %988 = vmatprep.mubr.f32.mxu0 (!%p422_p6), %v4993_v3  ;;  %v4995_v33 = vmov (!%p422_p6), 2475754826   ;;  %v4996_v35 = vmov (!%p422_p6), 2131351028   ;;  %v4997_v37 = vmov (!%p422_p6), 2102212464  }
   0xf   : > { %816 = vmatprep.mubr.f32.mxu1 (!%p422_p6), %v4993_v3  ;;  %v4998_v39 = vmov (!%p422_p6), 920167782   ;;  %v4999_v46 = vmov (!%p422_p6), 1326507024   ;;  %s5001_s22 = smov (!%p422_p6), 97   ;;  %s6138_s23 = smov (!%p422_p6), 96  }
  0x10   : > { %s5003_s24 = smov (!%p422_p6), 95   ;;  %s5004_s25 = smov (!%p422_p6), 98  }
  0x11   : > { %s6144_s28 = smov (!%p422_p6), 99   ;;  %s6142_s15 = smov (!%p422_p6), 93  }
  0x12   : > { %707 = vperm.xlu0 (!%p422_p6), %4908, %v487_v2   ;;  %s6157_s20 = smov (!%p422_p6), 99  }
  0x14   : > { %s5133_s26 = scalar_select %p470_p7, %s5105_s16, 1 }
  0x16   : > { %s4748_s27 = sshll.u32 %s5133_s26, 4 }
  0x17   : > { %s5139_s18 = scalar_lea.vmem %s6153_s0, %s4748_s27  ;;  %s5005_s27 = smov 94  }
  0x18   : > { %v5142_v4 = vld [vmem:[%s5139_s18] sm:$0xff]  ;;  %v5145_v5 = vld [vmem:[%s5139_s18 + $0x8] sm:$0xff]  ;;  %s6146_s0 = smov 105  }
  0x8d   : > { %v491_v6 = vpop.permute.xlu0 %490 }
  0x8e   : > { %v5148_v7 = vmul.f32 %v491_v6, %v5142_v4  ;;  %v5151_v8 = vmul.f32 %v491_v6, %v5145_v5 }
  0x90   : > { %v495_v9 = vand.u32 2147483647, %v5148_v7  ;;  %v498_v10 = vand.u32 2139095040, %v5148_v7  ;;  %v602_v11 = vand.u32 2139095040, %v5151_v8  ;;  %v599_v14 = vand.u32 2147483647, %v5151_v8 }
  0x91   : > { %vm497_vm15 = vcmp.lt.s32.totalorder %v5148_v7, 0 }
  0x92   : > { %v499_v12 = vshrl.u32 %v498_v10, 23  ;;  %v502_v13 = vand.u32 8388607, %v495_v9  ;;  %v603_v15 = vshrl.u32 %v602_v11, 23  ;;  %v5161_v20 = vand.u32 8388607, %v599_v14 }
  0x94   : > { %v4624_v16 = vadd.s32 4294967169, %v499_v12  ;;  %v4628_v17 = vadd.s32 4294967169, %v603_v15  ;;  %v503_v19 = vor.u32 8388608, %v502_v13  ;;  %v607_v27 = vor.u32 8388608, %v5161_v20 }
  0x96   : > { %v505_v18 = vadd.s32 1, %v4624_v16  ;;  %v609_v21 = vadd.s32 1, %v4628_v17  ;;  %v5163_v26 = vshll.u32 %v503_v19, 8 }
  0x98   : > { %vm506_vm1 = vcmp.gt.s32.totalorder %v505_v18, 0  ;;  %vm610_vm2 = vcmp.gt.s32.totalorder %v609_v21, 0 }
  0x99   : > { %v507_v22 = vsel %vm506_vm1, %v505_v18, 0  ;;  %v611_v25 = vsel %vm610_vm2, %v609_v21, 0  ;;  %vm496_vm1 = vcmp.le.f32.partialorder %v495_v9, 0.7853982  ;;  %vm601_vm2 = vcmp.lt.s32.totalorder %v5151_v8, 0 }
  0x9a   : > { %v508_v23 = vshrl.u32 %v507_v22, 5  ;;  %v509_v24 = vand.u32 31, %v507_v22  ;;  %v5167_v31 = vshrl.u32 %v611_v25, 5  ;;  %v613_v32 = vand.u32 31, %v611_v25 }
  0x9c   : > { %v510_v28 = vsub.s32 32, %v509_v24  ;;  %v512_v30 = vshll.u32 %v4994_v29, %v509_v24  ;;  %v515_v34 = vshll.u32 %v4995_v33, %v509_v24  ;;  %v518_v36 = vshll.u32 %v4996_v35, %v509_v24 }
  0x9d   : > { %v521_v38 = vshll.u32 %v4997_v37, %v509_v24  ;;  %v524_v40 = vshll.u32 %v4998_v39, %v509_v24  ;;  %vm527_vm3 = vcmp.lt.s32.totalorder %v508_v23, 1  ;;  %vm528_vm4 = vcmp.lt.s32.totalorder %v508_v23, 2 }
  0x9e   : > { %v513_v41 = vshrl.u32 %v4995_v33, %v510_v28  ;;  %v516_v42 = vshrl.u32 %v4996_v35, %v510_v28  ;;  %v519_v43 = vshrl.u32 %v4997_v37, %v510_v28  ;;  %v511_v44 = vshrl.u32 %v4994_v29, %v510_v28 }
  0x9f   : > { %v522_v45 = vshrl.u32 %v4998_v39, %v510_v28  ;;  %v525_v47 = vshrl.u32 %v4999_v46, %v510_v28  ;;  %v614_v51 = vsub.s32 32, %v613_v32  ;;  %vm529_vm5 = vcmp.lt.s32.totalorder %v508_v23, 3 }
  0xa0   : > { %v514_v48 = vor.u32 %v513_v41, %v512_v30  ;;  %v517_v49 = vor.u32 %v516_v42, %v515_v34  ;;  %v520_v50 = vor.u32 %v519_v43, %v518_v36  ;;  %vm530_vm6 = vcmp.lt.s32.totalorder %v508_v23, 4 }
  0xa1   : > { %v523_v52 = vor.u32 %v522_v45, %v521_v38  ;;  %v526_v53 = vor.u32 %v525_v47, %v524_v40  ;;  %v616_v61 = vshll.u32 %v4994_v29, %v613_v32  ;;  %v617_v0 = vshrl.u32 %v4995_v33, %v614_v51 }
  0xa2   : > { %v531_v54 = vsel %vm527_vm3, %v511_v44, %v514_v48  ;;  %v532_v55 = vsel %vm530_vm6, %v520_v50, 2102212464  ;;  %v535_v56 = vsel %vm527_vm3, %v514_v48, %v517_v49  ;;  %v539_v57 = vsel %vm527_vm3, %v517_v49, %v520_v50 }
  0xa3   : > { %v533_v58 = vsel %vm529_vm5, %v517_v49, %v532_v55  ;;  %v536_v59 = vsel %vm530_vm6, %v523_v52, 920167782  ;;  %v540_v60 = vsel %vm530_vm6, %v526_v53, 1326507024  ;;  %v619_v1 = vshll.u32 %v4995_v33, %v613_v32 }
  0xa4   : > { %v537_v62 = vsel %vm529_vm5, %v520_v50, %v536_v59  ;;  %v541_v63 = vsel %vm529_vm5, %v523_v52, %v540_v60  ;;  %v534_v2 = vsel %vm528_vm4, %v531_v54, %v533_v58  ;;  %v620_v11 = vshrl.u32 %v4996_v35, %v614_v51 }
  0xa5   : > { %v538_v6 = vsel %vm528_vm4, %v535_v56, %v537_v62  ;;  %v542_v10 = vsel %vm528_vm4, %v539_v57, %v541_v63  ;;  %v618_v17 = vor.u32 %v617_v0, %v616_v61  ;;  %v622_v19 = vshll.u32 %v4996_v35, %v613_v32 }
  0xa6   : > { %v5190_v12 = vmul.u32.u64.low %v5163_v26, %v542_v10  ;;  %v5191_v13 = vmul.u32.u64.high %v5163_v26, %v542_v10, %v5190_v12  ;;  %v5194_v15 = vmul.u32.u64.low %v5163_v26, %v538_v6  ;;  %v5195_v16 = vmul.u32.u64.high %v5163_v26, %v538_v6, %v5194_v15 }
  0xa7   : > { %v621_v18 = vor.u32 %v620_v11, %v619_v1  ;;  %v623_v20 = vshrl.u32 %v4997_v37, %v614_v51  ;;  %v625_v21 = vshll.u32 %v4997_v37, %v613_v32  ;;  %v626_v22 = vshrl.u32 %v4998_v39, %v614_v51 }
  0xa8   : > { %v629_v23 = vshrl.u32 %v4999_v46, %v614_v51  ;;  %v647_v24 = vshll.u32 %v607_v27, 8  ;;  %v550_v25 = vmul.u32 %v5163_v26, %v534_v2  ;;  %v615_v28 = vshrl.u32 %v4994_v29, %v614_v51 }
  0xa9   : > { %v624_v30 = vor.u32 %v623_v20, %v622_v19  ;;  %v628_v34 = vshll.u32 %v4998_v39, %v613_v32  ;;  %vm552_vm7 = vc.u32 %v5191_v13, %v5194_v15  ;;  %v553_v36 = vadd.s32 1, %v5195_v16 }
  0xaa   : > { %v627_v38 = vor.u32 %v626_v22, %v625_v21  ;;  %vm631_vm8 = vcmp.lt.s32.totalorder %v5167_v31, 1  ;;  %vm633_vm9 = vcmp.lt.s32.totalorder %v5167_v31, 3  ;;  %vm634_vm10 = vcmp.lt.s32.totalorder %v5167_v31, 4 }
  0xab   : > { %v630_v40 = vor.u32 %v629_v23, %v628_v34  ;;  %v639_v27 = vsel %vm631_vm8, %v618_v17, %v621_v18  ;;  %v554_v26 = vsel %vm552_vm7, %v553_v36, %v5195_v16  ;;  %v636_v41 = vsel %vm634_vm10, %v624_v30, 2102212464 }
  0xac   : > { %v640_v42 = vsel %vm634_vm10, %v627_v38, 920167782  ;;  %v643_v43 = vsel %vm631_vm8, %v621_v18, %v624_v30  ;;  %v555_v44 = vadd.s32 %v554_v26, %v550_v25  ;;  %vm632_vm11 = vcmp.lt.s32.totalorder %v5167_v31, 2 }
  0xad   : > { %v641_v32 = vsel %vm633_vm9, %v624_v30, %v640_v42  ;;  %v644_v45 = vsel %vm634_vm10, %v630_v40, 1326507024  ;;  %v635_v47 = vsel %vm631_vm8, %v615_v28, %v618_v17  ;;  %v637_v48 = vsel %vm633_vm9, %v621_v18, %v636_v41 }
  0xae   : > { %v642_v49 = vsel %vm632_vm11, %v639_v27, %v641_v32  ;;  %v645_v50 = vsel %vm633_vm9, %v627_v38, %v644_v45  ;;  %v556_v51 = vadd.s32 536870912, %v555_v44  ;;  %v638_v58 = vsel %vm632_vm11, %v635_v47, %v637_v48 }
  0xaf   : > { %v646_v52 = vsel %vm632_vm11, %v643_v43, %v645_v50  ;;  %v5212_v53 = vmul.u32.u64.low %v647_v24, %v642_v49  ;;  %v5213_v54 = vmul.u32.u64.high %v647_v24, %v642_v49, %v5212_v53  ;;  %v654_v31 = vmul.u32 %v647_v24, %v638_v58 }
  0xb0   : > { %v5215_v55 = vmul.u32.u64.low %v647_v24, %v646_v52  ;;  %v5216_v56 = vmul.u32.u64.high %v647_v24, %v646_v52, %v5215_v55  ;;  %v557_v57 = vshrl.u32 %v556_v51, 30  ;;  %v551_v19 = vadd.s32 %v5194_v15, %v5191_v13 }
  0xb1   : > { %v657_v60 = vadd.s32 1, %v5213_v54  ;;  %vm5230_vm3 = vcmp.le.f32.partialorder %v599_v14, 0.7853982  ;;  %vm481_vm4 = vcmask 523520   ;;  %vm587_vm8 = vweird.f32 %v5148_v7 }
  0xb2   : > { %v558_v59 = vshll.u32 %v557_v57, 30  ;;  %vm656_vm12 = vc.u32 %v5216_v56, %v5212_v53  ;;  %v655_v41 = vadd.s32 %v5212_v53, %v5216_v56  ;;  %v581_v15 = vsub.s32 4, %v557_v57  ;;  %482 = vst.msk [vmem:[#allocation2 + $0x10] sm:$0xff] %vm481_vm4, %v4993_v3 }
  0xb3   : > { %v658_v62 = vsel %vm656_vm12, %v657_v60, %v5213_v54  ;;  %vm691_vm12 = vweird.f32 %v5151_v8  ;;  %vm1183_vm4 = vcmask 769024  }
  0xb4   : > { %v559_v61 = vsub.s32 %v555_v44, %v558_v59  ;;  %v659_v63 = vadd.s32 %v658_v62, %v654_v31  ;;  %v582_v51 = vsel %vm497_vm15, %v581_v15, %v557_v57  ;;  %v1353_v15 = vld [vmem:[%s6128_s5] sm:$0xff] }
  0xb5   : > { %v584_v56 = vsel %vm496_vm1, 0, %v582_v51 }
  0xb6   : > { %v561_v0 = vsub.s32 0, %v559_v61  ;;  %v660_v1 = vadd.s32 536870912, %v659_v63  ;;  %v588_v60 = vadd.s32 3, %v584_v56 }
  0xb8   : > { %v4625_v2 = vmin.u32 %v561_v0, %v559_v61  ;;  %v661_v6 = vshrl.u32 %v660_v1, 30  ;;  %v589_v62 = vand.u32 3, %v588_v60  ;;  %v4637_v60 = vld [vmem:[%s6127_s4 + $0x18] sm:$0xff] }
  0xba   : > { %v563_v10 = vclz %v4625_v2  ;;  %v662_v11 = vshll.u32 %v661_v6, 30  ;;  %v685_v59 = vsub.s32 4, %v661_v6  ;;  %vm594_vm5 = vcmp.eq.s32.totalorder %v589_v62, 2 }
  0xbb   : > { %vm591_vm6 = vcmp.eq.s32.totalorder %v589_v62, 0  ;;  %vm590_vm7 = vcmp.lt.s32.totalorder %v589_v62, 2 }
  0xbc   : > { %v4626_v12 = vadd.s32 4294967294, %v563_v10  ;;  %v663_v16 = vsub.s32 %v659_v63, %v662_v11  ;;  %v686_v57 = vsel %vm601_vm2, %v685_v59, %v661_v6 }
  0xbd   : > { %v688_v1 = vsel %vm5230_vm3, 0, %v686_v57 }
  0xbe   : > { %vm4627_vm13 = vcmp.lt.s32.totalorder %v4626_v12, 0  ;;  %v665_v18 = vsub.s32 0, %v663_v16  ;;  %v692_v11 = vadd.s32 3, %v688_v1 }
  0xbf   : > { %v566_v17 = vsel %vm4627_vm13, 0, %v4626_v12  ;;  %vm724_vm13 = vcmask 1047808  }
  0xc0   : > { %v567_v20 = vsub.s32 32, %v566_v17  ;;  %v571_v21 = vsub.s32 4294967266, %v566_v17  ;;  %v4629_v22 = vmin.u32 %v665_v18, %v663_v16  ;;  %v568_v23 = vshll.u32 %v559_v61, %v566_v17 }
  0xc1   : > { %v693_v18 = vand.u32 3, %v692_v11 }
  0xc2   : > { %v569_v24 = vshrl.u32 %v551_v19, %v567_v20  ;;  %v572_v25 = vadd.s32 127, %v571_v21  ;;  %v667_v28 = vclz %v4629_v22  ;;  %v708_v20 = vpop.permute.xlu0 %707 }
  0xc3   : > { %vm698_vm9 = vcmp.eq.s32.totalorder %v693_v18, 2  ;;  %vm695_vm10 = vcmp.eq.s32.totalorder %v693_v18, 0  ;;  %vm694_vm11 = vcmp.lt.s32.totalorder %v693_v18, 2  ;;  %v4641_v18 = vld [vmem:[%s6127_s4 + $0x28] sm:$0xff] }
  0xc4   : > { %v570_v30 = vor.u32 %v569_v24, %v568_v23  ;;  %v573_v34 = vshll.u32 %v572_v25, 23  ;;  %v4630_v36 = vadd.s32 4294967294, %v667_v28 }
  0xc6   : > { %v574_v38 = vor.u32 4788187, %v573_v34  ;;  %vm4631_vm14 = vcmp.lt.s32.totalorder %v4630_v36, 0  ;;  %v577_v27 = vcvt.s32.f32 %v570_v30 }
  0xc7   : > { %v670_v26 = vsel %vm4631_vm14, 0, %v4630_v36  ;;  %vm916_vm14 = vcmask 793600  }
  0xc8   : > { %v575_v40 = vand.u32 2147483647, %v574_v38  ;;  %v671_v42 = vsub.s32 32, %v670_v26  ;;  %v675_v43 = vsub.s32 4294967266, %v670_v26  ;;  %v672_v44 = vshll.u32 %v663_v16, %v670_v26 }
  0xca   : > { %v578_v13 = vmul.f32 %v577_v27, %v575_v40  ;;  %v673_v32 = vshrl.u32 %v655_v41, %v671_v42  ;;  %v676_v45 = vadd.s32 127, %v675_v43  ;;  %v1590_v43 = vld [vmem:[%s6132_s9] sm:$0xff] }
  0xcc   : > { %v579_v47 = vxor.u32 2147483648, %v578_v13  ;;  %v674_v48 = vor.u32 %v673_v32, %v672_v44  ;;  %v677_v49 = vshll.u32 %v676_v45, 23  ;;  %v1362_v44 = vld [vmem:[%s6130_s7] sm:$0xff]  ;;  %v4654_v32 = vld [vmem:[%s6125_s2 + $0x8] sm:$0xff] }
  0xce   : > { %v580_v50 = vsel %vm497_vm15, %v579_v47, %v578_v13  ;;  %v678_v52 = vor.u32 4788187, %v677_v49  ;;  %v681_v55 = vcvt.s32.f32 %v674_v48  ;;  %v4655_v13 = vld [vmem:[%s6126_s3 + $0x8] sm:$0xff]  ;;  %vm748_vm15 = vcmask 64512  }
  0xcf   : > { %v583_v53 = vsel %vm496_vm1, %v5148_v7, %v580_v50  ;;  %vm1005_vm1 = vcmask 785408  }
  0xd0   : > { %4910 = vcosq.f32 %v583_v53  ;;  %v679_v54 = vand.u32 2147483647, %v678_v52  ;;  %v4635_v52 = vld [vmem:[%s6127_s4 + $0x10] sm:$0xff] }
  0xd1   : > { %4912 = vsinq.f32 %v583_v53 }
  0xd2   : > { %v682_v58 = vmul.f32 %v681_v55, %v679_v54 }
  0xd4   : > { %v683_v31 = vxor.u32 2147483648, %v682_v58 }
  0xd6   : > { %v684_v61 = vsel %vm601_vm2, %v683_v31, %v682_v58  ;;  %vm1094_vm2 = vcmask 777216  }
  0xd7   : > { %v687_v63 = vsel %vm5230_vm3, %v5151_v8, %v684_v61  ;;  %vm743_vm3 = vcmask 801792  }
  0xd8   : > { %4914 = vcosq.f32 %v687_v63 }
  0xd9   : > { %4916 = vsinq.f32 %v687_v63 }
  0xda   : > { %v4911_v0 = vpop.eup %4910 }
  0xdb   : > { %v4913_v2 = vpop.eup %4912  ;;  %v595_v10 = vxor.u32 2147483648, %v4911_v0 }
  0xdc   : > { %v592_v14 = vxor.u32 2147483648, %v4913_v2 }
  0xdd   : > { %v596_v6 = vsel %vm594_vm5, %v595_v10, %v4913_v2  ;;  %vm829_vm5 = vcmask 809984  }
  0xde   : > { %v593_v12 = vsel %vm591_vm6, %v4911_v0, %v592_v14  ;;  %v4639_v0 = vld [vmem:[%s6127_s4 + $0x20] sm:$0xff]  ;;  %vm1272_vm6 = vcmask 760832  }
  0xdf   : > { %v597_v16 = vsel %vm590_vm7, %v593_v12, %v596_v6  ;;  %v4632_v6 = vld [vmem:[%s6127_s4 + $0x8] sm:$0xff] }
  0xe0   : > { %v598_v17 = vsel %vm587_vm8, nan, %v597_v16 }
  0xe1   : > { %v703_v19 = vmul.f32 %v598_v17, %v598_v17 }
  0xe2   : > { %v4915_v21 = vpop.eup %4914 }
  0xe3   : > { %v710_v22 = vmul.f32 %v708_v20, %v703_v19  ;;  %v4917_v23 = vpop.eup %4916  ;;  %v699_v24 = vxor.u32 2147483648, %v4915_v21 }
  0xe4   : > { %v696_v25 = vxor.u32 2147483648, %v4917_v23 }
  0xe5   : > { %v712_v28 = vadd.f32 %v710_v22, %v5142_v4  ;;  %v700_v30 = vsel %vm698_vm9, %v699_v24, %v4917_v23 }
  0xe6   : > { %v697_v34 = vsel %vm695_vm10, %v4915_v21, %v696_v25 }
  0xe7   : > { %716 = vrot.lane.b32.xlu1 %v712_v28, %s6140_s19  ;;  %v701_v7 = vsel %vm694_vm11, %v697_v34, %v700_v30  ;;  %v4643_v28 = vld [vmem:[%s6127_s4 + $0x30] sm:$0xff]  ;;  %v731_v34 = vld [vmem:[%s6127_s4] sm:$0xff] }
  0xe8   : > { %v702_v36 = vsel %vm691_vm12, nan, %v701_v7 }
  0xe9   : > { %v704_v38 = vmul.f32 %v702_v36, %v702_v36 }
  0xeb   : > { %v711_v40 = vmul.f32 %v708_v20, %v704_v38 }
  0xed   : > { %v713_v27 = vadd.f32 %v711_v40, %v5145_v5  ;;  %v1361_v5 = vld [vmem:[%s6129_s6] sm:$0xff] }
  0xef   : > { %718 = vrot.lane.b32.xlu1 %v713_v27, %s6140_s19  ;;  %s6158_s19 = smov 96  }
 0x159   : > { %v717_v26 = vpop.permute.xlu1 %716 }
 0x15a   : > { %725 = vst.msk [vmem:[#allocation2] sm:$0xff] %vm724_vm13, %v717_v26 }
 0x161   : > { %v728_v4 = vld [vmem:[#allocation2] sm:$0xff]  ;;  %v719_v41 = vpop.permute.xlu1 %718 }
 0x162   : > { %910 = vrot.lane.b32.xlu0 %v728_v4, %s5001_s22  ;;  %727 = vst.msk [vmem:[#allocation2 + $0x10] sm:$0xff] %vm479_vm0, %v719_v41  ;;  %v720_v8 = vsel %vm479_vm0, %v717_v26, %v719_v41 }
 0x166   : > { %912 = vrot.lane.b32.xlu0 %v720_v8, %s5001_s22 }
 0x169   : > { %v730_v42 = vld [vmem:[#allocation2 + $0x10] sm:$0xff] }
 0x16a   : > { %914 = vrot.lane.b32.xlu1 %v730_v42, %s5001_s22  ;;  %1003 = vrot.lane.b32.xlu0 %v730_v42, %s6138_s23  ;;  %s5014_s22 = smov 78  }
 0x16e   : > { %999 = vrot.lane.b32.xlu1 %v728_v4, %s6138_s23  ;;  %1088 = vrot.lane.b32.xlu0 %v728_v4, %s5003_s24 }
 0x172   : > { %1001 = vrot.lane.b32.xlu1 %v720_v8, %s6138_s23  ;;  %741 = vrot.lane.b32.xlu0 %v730_v42, %s5004_s25  ;;  %s6159_s23 = smov 93  }
 0x176   : > { %1092 = vrot.lane.b32.xlu1 %v730_v42, %s5003_s24  ;;  %1090 = vrot.lane.b32.xlu0 %v720_v8, %s5003_s24 }
 0x17a   : > { %737 = vrot.lane.b32.xlu1 %v728_v4, %s5004_s25  ;;  %1181 = vrot.lane.b32.xlu0 %v730_v42, %s5005_s27 }
 0x17e   : > { %739 = vrot.lane.b32.xlu1 %v720_v8, %s5004_s25  ;;  %1177 = vrot.lane.b32.xlu0 %v728_v4, %s5005_s27  ;;  %s4623_s25 = sshll.u32 %s5133_s26, 1  ;;  %s6156_s26 = smov 32  }
 0x17f   : > { %s478_s24 = scalar_lea.vmem %s6124_s1, %s4623_s25  ;;  %s6160_s25 = smov 105  }
 0x182   : > { %1179 = vrot.lane.b32.xlu1 %v720_v8, %s5005_s27  ;;  %827 = vrot.lane.b32.xlu0 %v730_v42, %s6144_s28  ;;  %s6161_s27 = smov 87  }
 0x186   : > { %825 = vrot.lane.b32.xlu1 %v720_v8, %s6144_s28  ;;  %1270 = vrot.lane.b32.xlu0 %v730_v42, %s6142_s15 }
 0x18a   : > { %1268 = vrot.lane.b32.xlu1 %v720_v8, %s6142_s15  ;;  %1266 = vrot.lane.b32.xlu0 %v728_v4, %s6142_s15  ;;  %s6148_s15 = smov 87  }
 0x18e   : > { %823 = vrot.lane.b32.xlu1 %v728_v4, %s6144_s28  ;;  %1365 = vperm.xlu0 %4908, %v1361_v5   ;;  %s5010_s28 = smov 90  }
 0x192   : > { %1593 = vperm.xlu0 %4908, %v1590_v43   ;;  %1356 = vperm.xlu1 %4909, %v1353_v15  }
 0x196   : > { %1908 = vperm.xlu0 %4908, %v4655_v13   ;;  %1582 = vperm.xlu1 %4909, %v1362_v44  }
 0x19a   : > { %1691 = vperm.xlu1 %4909, %v4654_v32  }
 0x1d4   : > { %v911_v45 = vpop.permute.xlu0 %910 }
 0x1d8   : > { %v913_v47 = vpop.permute.xlu0 %912 }
 0x1d9   : > { %v917_v49 = vsel %vm916_vm14, %v911_v45, %v913_v47 }
 0x1dc   : > { %v915_v48 = vpop.permute.xlu1 %914  ;;  %v1004_v50 = vpop.permute.xlu0 %1003 }
 0x1dd   : > { %v918_v51 = vsel %vm916_vm14, %v913_v47, %v915_v48 }
 0x1de   : > { %924 = vmatprep.subr.mxu0 %v918_v51 }
 0x1df   : > { %925 = vmatpush1.msra.mxu0 %v917_v49 }
 0x1e0   : > { %v1000_v53 = vpop.permute.xlu1 %999  ;;  %4636 = vmatmul.mubr.msk.f32.vlgmr.msra.gmra.mrb[0].mxu0 %vm748_vm15, %v4635_v52  ;;  %v1089_v54 = vpop.permute.xlu0 %1088 }
 0x1e1   : > { %1077 = vmatprep.mubr.f32.mxu0 %v4993_v3 }
 0x1e4   : > { %v1002_v55 = vpop.permute.xlu1 %1001  ;;  %v742_v56 = vpop.permute.xlu0 %741 }
 0x1e5   : > { %v1006_v58 = vsel %vm1005_vm1, %v1000_v53, %v1002_v55  ;;  %v1007_v59 = vsel %vm1005_vm1, %v1002_v55, %v1004_v50 }
 0x1e6   : > { %1013 = vmatprep.subr.mxu0 %v1007_v59 }
 0x1e7   : > { %1014 = vmatpush1.msra.mxu0 %v1006_v58 }
 0x1e8   : > { %v1093_v31 = vpop.permute.xlu1 %1092  ;;  %4638 = vmatmul.mubr.msk.f32.vlgmr.msra.gmra.mrb[0].mxu0 %vm748_vm15, %v4637_v60  ;;  %v1091_v61 = vpop.permute.xlu0 %1090 }
 0x1e9   : > { %v1095_v9 = vsel %vm1094_vm2, %v1089_v54, %v1091_v61  ;;  %v1096_v57 = vsel %vm1094_vm2, %v1091_v61, %v1093_v31  ;;  %1166 = vmatprep.mubr.f32.mxu0 %v4993_v3 }
 0x1ea   : > { %1102 = vmatprep.subr.mxu0 %v1096_v57 }
 0x1eb   : > { %1103 = vmatpush1.msra.mxu0 %v1095_v9 }
 0x1ec   : > { %v738_v62 = vpop.permute.xlu1 %737  ;;  %v1182_v63 = vpop.permute.xlu0 %1181 }
 0x1f0   : > { %v740_v1 = vpop.permute.xlu1 %739  ;;  %4640 = vmatmul.mubr.msk.f32.vlgmr.msra.gmra.mrb[0].mxu0 %vm748_vm15, %v4639_v0  ;;  %v1178_v2 = vpop.permute.xlu0 %1177 }
 0x1f1   : > { %v745_v10 = vsel %vm743_vm3, %v740_v1, %v742_v56  ;;  %v744_v14 = vsel %vm743_vm3, %v738_v62, %v740_v1  ;;  %1255 = vmatprep.mubr.f32.mxu0 %v4993_v3 }
 0x1f2   : > { %752 = vmatprep.subr.mxu1 %v745_v10 }
 0x1f3   : > { %753 = vmatpush1.msra.mxu1 %v744_v14 }
 0x1f4   : > { %v1180_v11 = vpop.permute.xlu1 %1179  ;;  %v828_v12 = vpop.permute.xlu0 %827  ;;  %4633 = vmatmul.mubr.msk.f32.vlgmr.msra.gmra.mrb[0].mxu1 %vm748_vm15, %v4632_v6 }
 0x1f5   : > { %v1184_v16 = vsel %vm1183_vm4, %v1178_v2, %v1180_v11  ;;  %v1185_v17 = vsel %vm1183_vm4, %v1180_v11, %v1182_v63  ;;  %901 = vmatprep.mubr.f32.mxu1 %v4993_v3 }
 0x1f6   : > { %1191 = vmatprep.subr.mxu0 %v1185_v17 }
 0x1f7   : > { %1192 = vmatpush1.msra.mxu0 %v1184_v16 }
 0x1f8   : > { %v826_v19 = vpop.permute.xlu1 %825  ;;  %4642 = vmatmul.mubr.msk.f32.vlgmr.msra.gmra.mrb[0].mxu0 %vm748_vm15, %v4641_v18  ;;  %v1271_v20 = vpop.permute.xlu0 %1270 }
 0x1f9   : > { %v831_v21 = vsel %vm829_vm5, %v826_v19, %v828_v12  ;;  %1344 = vmatprep.mubr.f32.mxu0 %v4993_v3 }
 0x1fa   : > { %837 = vmatprep.subr.mxu1 %v831_v21 }
 0x1fc   : > { %v1269_v22 = vpop.permute.xlu1 %1268  ;;  %v1267_v23 = vpop.permute.xlu0 %1266 }
 0x1fd   : > { %v1274_v24 = vsel %vm1272_vm6, %v1269_v22, %v1271_v20  ;;  %v1273_v25 = vsel %vm1272_vm6, %v1267_v23, %v1269_v22 }
 0x1fe   : > { %1280 = vmatprep.subr.mxu0 %v1274_v24 }
 0x1ff   : > { %1281 = vmatpush1.msra.mxu0 %v1273_v25 }
 0x200   : > { %v824_v30 = vpop.permute.xlu1 %823  ;;  %4644 = vmatmul.mubr.msk.f32.vlgmr.msra.gmra.mrb[0].mxu0 %vm748_vm15, %v4643_v28 }
 0x201   : > { %v830_v7 = vsel %vm829_vm5, %v824_v30, %v826_v19  ;;  %2865 = vmatprep.mubr.f32.mxu0 %v4993_v3 }
 0x202   : > { %838 = vmatpush1.msra.mxu1 %v830_v7 }
 0x203   : > { %4634 = vmatmul.mubr.msk.f32.vlgmr.msra.gmra.mrb[0].mxu1 %vm748_vm15, %v731_v34 }
 0x204   : > { %1663 = vmatprep.mubr.f32.mxu1 %v4993_v3 }
 0x20d   : > { %v1366_v42 = vpop.permute.xlu0 %1365 }
 0x211   : > { %v1357_v4 = vpop.permute.xlu1 %1356 }
 0x2d3   : > { %v1346_v36 = vpop.f32.mrb[0].mxu0 }
 0x2d4   : > { %v1348_v38 = vpop.f32.mrb[1].mxu0 }
 0x2d6   : > { %v903_v40 = vpop.f32.mrb[0].mxu1 }
 0x2d7   : > { %v905_v27 = vpop.f32.mrb[1].mxu1  ;;  %v4765_v26 = vadd.f32 %v1346_v36, %v903_v40 }
 0x2d8   : > { %v4766_v41 = vadd.f32 %v1348_v38, %v905_v27 }
 0x2d9   : > { %v5317_v8 = vadd.f32 %v4765_v26, %v1357_v4 }
 0x2da   : > { %v5319_v5 = vadd.f32 %v4766_v41, %v1357_v4 }
 0x2db   : > { %v5322_v43 = vmul.f32 %v1366_v42, %v5317_v8 }
 0x2dc   : > { %v5325_v13 = vmul.f32 %v1366_v42, %v5319_v5 }
 0x2dd   : > { %v1373_v15 = vand.u32 2139095040, %v5322_v43  ;;  %v1370_v44 = vand.u32 2147483647, %v5322_v43 }
 0x2de   : > { %v1477_v32 = vand.u32 2139095040, %v5325_v13  ;;  %v1474_v50 = vand.u32 2147483647, %v5325_v13 }
 0x2df   : > { %v1374_v45 = vshrl.u32 %v1373_v15, 23  ;;  %v1377_v49 = vand.u32 8388607, %v1370_v44 }
 0x2e0   : > { %v1478_v47 = vshrl.u32 %v1477_v32, 23  ;;  %v5335_v55 = vand.u32 8388607, %v1474_v50 }
 0x2e1   : > { %v4645_v48 = vadd.s32 4294967169, %v1374_v45  ;;  %v1378_v54 = vor.u32 8388608, %v1377_v49 }
 0x2e2   : > { %v4649_v51 = vadd.s32 4294967169, %v1478_v47  ;;  %v1482_v62 = vor.u32 8388608, %v5335_v55 }
 0x2e3   : > { %v1380_v52 = vadd.s32 1, %v4645_v48  ;;  %v5339_v57 = vshll.u32 %v1378_v54, 8 }
 0x2e4   : > { %v1484_v53 = vadd.s32 1, %v4649_v51 }
 0x2e5   : > { %vm1381_vm7 = vcmp.gt.s32.totalorder %v1380_v52, 0 }
 0x2e6   : > { %v1382_v56 = vsel %vm1381_vm7, %v1380_v52, 0  ;;  %vm1485_vm8 = vcmp.gt.s32.totalorder %v1484_v53, 0 }
 0x2e7   : > { %v1383_v58 = vshrl.u32 %v1382_v56, 5  ;;  %v1384_v59 = vand.u32 31, %v1382_v56  ;;  %v1486_v60 = vsel %vm1485_vm8, %v1484_v53, 0 }
 0x2e8   : > { %v1488_v31 = vand.u32 31, %v1486_v60  ;;  %v5337_v9 = vshrl.u32 %v1486_v60, 5 }
 0x2e9   : > { %v1385_v61 = vsub.s32 32, %v1384_v59  ;;  %v1396_v63 = vshll.u32 %v4997_v37, %v1384_v59  ;;  %v1399_v0 = vshll.u32 %v4998_v39, %v1384_v59  ;;  %vm1405_vm9 = vcmp.lt.s32.totalorder %v1383_v58, 4 }
 0x2ea   : > { %v1489_v1 = vsub.s32 32, %v1488_v31  ;;  %v1500_v14 = vshll.u32 %v4997_v37, %v1488_v31  ;;  %v1503_v6 = vshll.u32 %v4998_v39, %v1488_v31  ;;  %v1387_v16 = vshll.u32 %v4994_v29, %v1384_v59 }
 0x2eb   : > { %v1397_v2 = vshrl.u32 %v4998_v39, %v1385_v61  ;;  %v1400_v10 = vshrl.u32 %v4999_v46, %v1385_v61  ;;  %v1388_v17 = vshrl.u32 %v4995_v33, %v1385_v61  ;;  %v1390_v20 = vshll.u32 %v4995_v33, %v1384_v59 }
 0x2ec   : > { %v1501_v11 = vshrl.u32 %v4998_v39, %v1489_v1  ;;  %v1504_v12 = vshrl.u32 %v4999_v46, %v1489_v1  ;;  %v1391_v21 = vshrl.u32 %v4996_v35, %v1385_v61  ;;  %vm1509_vm10 = vcmp.lt.s32.totalorder %v5337_v9, 4 }
 0x2ed   : > { %v1398_v18 = vor.u32 %v1397_v2, %v1396_v63  ;;  %v1401_v19 = vor.u32 %v1400_v10, %v1399_v0  ;;  %v1389_v22 = vor.u32 %v1388_v17, %v1387_v16  ;;  %v1393_v23 = vshll.u32 %v4996_v35, %v1384_v59 }
 0x2ee   : > { %v1394_v24 = vshrl.u32 %v4997_v37, %v1385_v61  ;;  %v1386_v30 = vshrl.u32 %v4994_v29, %v1385_v61  ;;  %v1392_v34 = vor.u32 %v1391_v21, %v1390_v20  ;;  %v1502_v7 = vor.u32 %v1501_v11, %v1500_v14 }
 0x2ef   : > { %v1411_v25 = vsel %vm1405_vm9, %v1398_v18, 920167782  ;;  %v1415_v28 = vsel %vm1405_vm9, %v1401_v19, 1326507024  ;;  %v1505_v36 = vor.u32 %v1504_v12, %v1503_v6  ;;  %vm1402_vm11 = vcmp.lt.s32.totalorder %v1383_v58, 1 }
 0x2f0   : > { %v1395_v38 = vor.u32 %v1394_v24, %v1393_v23  ;;  %vm1403_vm12 = vcmp.lt.s32.totalorder %v1383_v58, 2  ;;  %vm1404_vm14 = vcmp.lt.s32.totalorder %v1383_v58, 3  ;;  %v1406_v40 = vsel %vm1402_vm11, %v1386_v30, %v1389_v22 }
 0x2f1   : > { %v1410_v27 = vsel %vm1402_vm11, %v1389_v22, %v1392_v34  ;;  %v1416_v42 = vsel %vm1404_vm14, %v1398_v18, %v1415_v28  ;;  %v1491_v47 = vshll.u32 %v4994_v29, %v1488_v31  ;;  %v1492_v52 = vshrl.u32 %v4995_v33, %v1489_v1 }
 0x2f2   : > { %v1407_v26 = vsel %vm1405_vm9, %v1395_v38, 2102212464  ;;  %v1412_v4 = vsel %vm1404_vm14, %v1395_v38, %v1411_v25  ;;  %v1414_v41 = vsel %vm1402_vm11, %v1392_v34, %v1395_v38  ;;  %v1519_v53 = vsel %vm1509_vm10, %v1505_v36, 1326507024 }
 0x2f3   : > { %v1408_v15 = vsel %vm1404_vm14, %v1392_v34, %v1407_v26  ;;  %v1413_v32 = vsel %vm1403_vm12, %v1410_v27, %v1412_v4  ;;  %v1417_v45 = vsel %vm1403_vm12, %v1414_v41, %v1416_v42  ;;  %v1494_v56 = vshll.u32 %v4995_v33, %v1488_v31 }
 0x2f4   : > { %v1409_v48 = vsel %vm1403_vm12, %v1406_v40, %v1408_v15  ;;  %v5363_v49 = vmul.u32.u64.low %v5339_v57, %v1417_v45  ;;  %v5364_v51 = vmul.u32.u64.high %v5339_v57, %v1417_v45, %v5363_v49  ;;  %v1493_v58 = vor.u32 %v1492_v52, %v1491_v47 }
 0x2f5   : > { %v5370_v54 = vmul.u32.u64.low %v5339_v57, %v1413_v32  ;;  %v5371_v55 = vmul.u32.u64.high %v5339_v57, %v1413_v32, %v5370_v54  ;;  %v1495_v59 = vshrl.u32 %v4996_v35, %v1489_v1  ;;  %v1497_v60 = vshll.u32 %v4996_v35, %v1488_v31 }
 0x2f6   : > { %v1498_v61 = vshrl.u32 %v4997_v37, %v1489_v1  ;;  %v1515_v63 = vsel %vm1509_vm10, %v1502_v7, 920167782  ;;  %v1425_v0 = vmul.u32 %v5339_v57, %v1409_v48  ;;  %v1490_v2 = vshrl.u32 %v4994_v29, %v1489_v1 }
 0x2f7   : > { %v1522_v10 = vshll.u32 %v1482_v62, 8  ;;  %vm1427_vm2 = vc.u32 %v5364_v51, %v5370_v54  ;;  %v1496_v14 = vor.u32 %v1495_v59, %v1494_v56  ;;  %vm1508_vm3 = vcmp.lt.s32.totalorder %v5337_v9, 3 }
 0x2f8   : > { %v1499_v6 = vor.u32 %v1498_v61, %v1497_v60  ;;  %v1428_v11 = vadd.s32 1, %v5371_v55  ;;  %vm1506_vm4 = vcmp.lt.s32.totalorder %v5337_v9, 1  ;;  %vm1507_vm7 = vcmp.lt.s32.totalorder %v5337_v9, 2 }
 0x2f9   : > { %v1520_v31 = vsel %vm1508_vm3, %v1502_v7, %v1519_v53  ;;  %v1514_v57 = vsel %vm1506_vm4, %v1493_v58, %v1496_v14  ;;  %v1510_v17 = vsel %vm1506_vm4, %v1490_v2, %v1493_v58  ;;  %v1426_v52 = vadd.s32 %v5370_v54, %v5364_v51 }
 0x2fa   : > { %v1511_v12 = vsel %vm1509_vm10, %v1499_v6, 2102212464  ;;  %v1516_v16 = vsel %vm1508_vm3, %v1499_v6, %v1515_v63  ;;  %v1518_v1 = vsel %vm1506_vm4, %v1496_v14, %v1499_v6  ;;  %v1429_v62 = vsel %vm1427_vm2, %v1428_v11, %v5371_v55 }
 0x2fb   : > { %v1517_v18 = vsel %vm1507_vm7, %v1514_v57, %v1516_v16  ;;  %v1521_v19 = vsel %vm1507_vm7, %v1518_v1, %v1520_v31  ;;  %v1430_v20 = vadd.s32 %v1429_v62, %v1425_v0  ;;  %v1512_v21 = vsel %vm1508_vm3, %v1496_v14, %v1511_v12 }
 0x2fc   : > { %v5393_v22 = vmul.u32.u64.low %v1522_v10, %v1521_v19  ;;  %v5394_v23 = vmul.u32.u64.high %v1522_v10, %v1521_v19, %v5393_v22  ;;  %v5396_v24 = vmul.u32.u64.low %v1522_v10, %v1517_v18  ;;  %v5397_v25 = vmul.u32.u64.high %v1522_v10, %v1517_v18, %v5396_v24 }
 0x2fd   : > { %v1431_v28 = vadd.s32 536870912, %v1430_v20  ;;  %v1513_v30 = vsel %vm1507_vm7, %v1510_v17, %v1512_v21  ;;  %vm1372_vm11 = vcmp.lt.s32.totalorder %v5322_v43, 0  ;;  %vm1371_vm12 = vcmp.le.f32.partialorder %v1370_v44, 0.7853982 }
 0x2fe   : > { %vm1531_vm8 = vc.u32 %v5394_v23, %v5396_v24  ;;  %v1532_v7 = vadd.s32 1, %v5397_v25  ;;  %v1529_v38 = vmul.u32 %v1522_v10, %v1513_v30  ;;  %v1530_v31 = vadd.s32 %v5396_v24, %v5394_v23 }
 0x2ff   : > { %v1432_v34 = vshrl.u32 %v1431_v28, 30  ;;  %vm1476_vm14 = vcmp.lt.s32.totalorder %v5325_v13, 0  ;;  %vm1475_vm2 = vcmp.le.f32.partialorder %v1474_v50, 0.7853982 }
 0x300   : > { %v1533_v40 = vsel %vm1531_vm8, %v1532_v7, %v5397_v25  ;;  %vm1462_vm8 = vweird.f32 %v5322_v43 }
 0x301   : > { %v1433_v36 = vshll.u32 %v1432_v34, 30  ;;  %v1534_v26 = vadd.s32 %v1533_v40, %v1529_v38  ;;  %v1456_v54 = vsub.s32 4, %v1432_v34 }
 0x303   : > { %v1434_v27 = vsub.s32 %v1430_v20, %v1433_v36  ;;  %v1535_v41 = vadd.s32 536870912, %v1534_v26  ;;  %v1457_v21 = vsel %vm1372_vm11, %v1456_v54, %v1432_v34 }
 0x304   : > { %v1459_v28 = vsel %vm1371_vm12, 0, %v1457_v21 }
 0x305   : > { %v1436_v4 = vsub.s32 0, %v1434_v27  ;;  %v1536_v15 = vshrl.u32 %v1535_v41, 30  ;;  %v1463_v36 = vadd.s32 3, %v1459_v28 }
 0x307   : > { %v4646_v42 = vmin.u32 %v1436_v4, %v1434_v27  ;;  %v1537_v45 = vshll.u32 %v1536_v15, 30  ;;  %v1560_v7 = vsub.s32 4, %v1536_v15 }
 0x309   : > { %v1438_v32 = vclz %v4646_v42  ;;  %v1538_v9 = vsub.s32 %v1534_v26, %v1537_v45  ;;  %v1561_v40 = vsel %vm1476_vm14, %v1560_v7, %v1536_v15 }
 0x30a   : > { %v1563_v4 = vsel %vm1475_vm2, 0, %v1561_v40 }
 0x30b   : > { %v4647_v47 = vadd.s32 4294967294, %v1438_v32  ;;  %v1540_v49 = vsub.s32 0, %v1538_v9  ;;  %v1567_v45 = vadd.s32 3, %v1563_v4 }
 0x30d   : > { %vm4648_vm9 = vcmp.lt.s32.totalorder %v4647_v47, 0  ;;  %v4650_v56 = vmin.u32 %v1540_v49, %v1538_v9  ;;  %v1568_v50 = vand.u32 3, %v1567_v45 }
 0x30e   : > { %v1441_v48 = vsel %vm4648_vm9, 0, %v4647_v47 }
 0x30f   : > { %v1442_v53 = vsub.s32 32, %v1441_v48  ;;  %v1446_v55 = vsub.s32 4294967266, %v1441_v48  ;;  %v1443_v58 = vshll.u32 %v1434_v27, %v1441_v48  ;;  %v1542_v61 = vclz %v4650_v56 }
 0x310   : > { %v1464_v27 = vand.u32 3, %v1463_v36  ;;  %vm1573_vm9 = vcmp.eq.s32.totalorder %v1568_v50, 2 }
 0x311   : > { %v1444_v59 = vshrl.u32 %v1426_v52, %v1442_v53  ;;  %v1447_v60 = vadd.s32 127, %v1446_v55  ;;  %v4651_v2 = vadd.s32 4294967294, %v1542_v61 }
 0x312   : > { %vm1466_vm3 = vcmp.eq.s32.totalorder %v1464_v27, 0  ;;  %vm1469_vm4 = vcmp.eq.s32.totalorder %v1464_v27, 2  ;;  %vm1465_vm7 = vcmp.lt.s32.totalorder %v1464_v27, 2 }
 0x313   : > { %v1445_v63 = vor.u32 %v1444_v59, %v1443_v58  ;;  %v1448_v0 = vshll.u32 %v1447_v60, 23  ;;  %vm4652_vm10 = vcmp.lt.s32.totalorder %v4651_v2, 0 }
 0x314   : > { %v1545_v11 = vsel %vm4652_vm10, 0, %v4651_v2  ;;  %vm1570_vm10 = vcmp.eq.s32.totalorder %v1568_v50, 0 }
 0x315   : > { %v1449_v10 = vor.u32 4788187, %v1448_v0  ;;  %v1452_v6 = vcvt.s32.f32 %v1445_v63  ;;  %v1546_v12 = vsub.s32 32, %v1545_v11  ;;  %v1550_v57 = vsub.s32 4294967266, %v1545_v11  ;;  %v1583_v63 = vpop.permute.xlu1 %1582 }
 0x316   : > { %v1547_v16 = vshll.u32 %v1538_v9, %v1545_v11 }
 0x317   : > { %v1450_v14 = vand.u32 2147483647, %v1449_v10  ;;  %v1548_v1 = vshrl.u32 %v1530_v31, %v1546_v12  ;;  %v1551_v62 = vadd.s32 127, %v1550_v57  ;;  %v1594_v57 = vpop.permute.xlu0 %1593 }
 0x319   : > { %v1453_v51 = vmul.f32 %v1452_v6, %v1450_v14  ;;  %v1549_v18 = vor.u32 %v1548_v1, %v1547_v16  ;;  %v1552_v19 = vshll.u32 %v1551_v62, 23  ;;  %v1589_v6 = vld [vmem:[%s6131_s8] sm:$0xff]  ;;  %v1692_v21 = vpop.permute.xlu1 %1691 }
 0x31b   : > { %v1454_v17 = vxor.u32 2147483648, %v1453_v51  ;;  %v1553_v23 = vor.u32 4788187, %v1552_v19  ;;  %v1556_v25 = vcvt.s32.f32 %v1549_v18  ;;  %v4966_v19 = vld [vmem:[%s5139_s18] sm:$0xff] }
 0x31d   : > { %v1455_v20 = vsel %vm1372_vm11, %v1454_v17, %v1453_v51  ;;  %v1554_v24 = vand.u32 2147483647, %v1553_v23  ;;  %vm1569_vm11 = vcmp.lt.s32.totalorder %v1568_v50, 2 }
 0x31e   : > { %v1458_v22 = vsel %vm1371_vm12, %v5322_v43, %v1455_v20  ;;  %vm1566_vm12 = vweird.f32 %v5325_v13 }
 0x31f   : > { %4918 = vcosq.f32 %v1458_v22  ;;  %v1557_v30 = vmul.f32 %v1556_v25, %v1554_v24 }
 0x320   : > { %4920 = vsinq.f32 %v1458_v22  ;;  %v4967_v22 = vld [vmem:[%s5139_s18 + $0x8] sm:$0xff]  ;;  %s5008_s18 = smov 102  }
 0x321   : > { %v1558_v38 = vxor.u32 2147483648, %v1557_v30 }
 0x323   : > { %v1559_v44 = vsel %vm1476_vm14, %v1558_v38, %v1557_v30 }
 0x324   : > { %v1562_v34 = vsel %vm1475_vm2, %v5325_v13, %v1559_v44  ;;  %v1671_v13 = vlaneseq }
 0x325   : > { %4922 = vcosq.f32 %v1562_v34 }
 0x326   : > { %4924 = vsinq.f32 %v1562_v34  ;;  %v1672_v11 = vshrl.u32 %v1671_v13, 7 }
 0x328   : > { %v1677_v31 = vsub.s32 1, %v1672_v11 }
 0x329   : > { %v4919_v26 = vpop.eup %4918 }
 0x32a   : > { %v4921_v41 = vpop.eup %4920  ;;  %v1470_v42 = vxor.u32 2147483648, %v4919_v26 }
 0x32b   : > { %v1467_v32 = vxor.u32 2147483648, %v4921_v41 }
 0x32c   : > { %v1471_v9 = vsel %vm1469_vm4, %v1470_v42, %v4921_v41 }
 0x32d   : > { %v1468_v47 = vsel %vm1466_vm3, %v4919_v26, %v1467_v32 }
 0x32e   : > { %v1472_v48 = vsel %vm1465_vm7, %v1468_v47, %v1471_v9 }
 0x32f   : > { %v4923_v49 = vpop.eup %4922  ;;  %v1473_v52 = vsel %vm1462_vm8, nan, %v1472_v48 }
 0x330   : > { %v4925_v15 = vpop.eup %4924  ;;  %v1574_v53 = vxor.u32 2147483648, %v4923_v49  ;;  %v1578_v59 = vmul.f32 %v1473_v52, %v1473_v52 }
 0x331   : > { %v1571_v55 = vxor.u32 2147483648, %v4925_v15 }
 0x332   : > { %v1575_v56 = vsel %vm1573_vm9, %v1574_v53, %v4925_v15  ;;  %v1585_v2 = vmul.f32 %v1583_v63, %v1578_v59 }
 0x333   : > { %v1572_v58 = vsel %vm1570_vm10, %v4923_v49, %v1571_v55 }
 0x334   : > { %v1576_v60 = vsel %vm1569_vm11, %v1572_v58, %v1575_v56  ;;  %v1587_v14 = vadd.f32 %v1585_v2, %v5317_v8  ;;  %v1673_v8 = vsub.s32 0, %v1672_v11 }
 0x335   : > { %v1577_v61 = vsel %vm1566_vm12, nan, %v1576_v60 }
 0x336   : > { %v1579_v0 = vmul.f32 %v1577_v61, %v1577_v61 }
 0x338   : > { %v1586_v10 = vmul.f32 %v1583_v63, %v1579_v0 }
 0x33a   : > { %v1588_v43 = vadd.f32 %v1586_v10, %v5319_v5  ;;  %v485_v5 = vld [vmem:[%s478_s24] sm:$0x3]  ;;  %s5015_s24 = smov 69  }
 0x33b   : > { %v5427_v12 = vrot.slane %v485_v5, %v1673_v8  ;;  %v5429_v54 = vrot.slane %v485_v5, %v1677_v31 }
 0x33c   : > { %1599 = vmatprep.subr.mxu1 %v1588_v43 }
 0x33d   : > { %1600 = vmatpush1.msra.mxu1 %v1587_v14 }
 0x33e   : > { %4653 = vmatmul.mubr.msk.f32.vlgmr.msra.gmra.mrb[2].mxu1 %vm748_vm15, %v1589_v6 }
 0x33f   : > { %2016 = vmatprep.mubr.f32.mxu1 %v4993_v3 }
 0x411   : > { %v1665_v51 = vpop.f32.mrb[2].mxu1 }
 0x412   : > { %v1666_v16 = vadd.f32 %v1665_v51, %v1594_v57  ;;  %v1667_v1 = vpop.f32.mrb[3].mxu1 }
 0x413   : > { %v1668_v62 = vadd.f32 %v1667_v1, %v1594_v57 }
 0x414   : > { %v1681_v17 = vmul.f32 %v5427_v12, %v1666_v16 }
 0x415   : > { %v1682_v18 = vmul.f32 %v5429_v54, %v1668_v62 }
 0x416   : > { %v5434_v20 = vadd.f32 %v4966_v19, %v1681_v17 }
 0x417   : > { %v5437_v23 = vadd.f32 %v4967_v22, %v1682_v18 }
 0x418   : > { %v5440_v24 = vmul.f32 %v1692_v21, %v5434_v20 }
 0x419   : > { %v5443_v25 = vmul.f32 %v1692_v21, %v5437_v23 }
 0x41a   : > { %v1699_v28 = vand.u32 2139095040, %v5440_v24  ;;  %v1696_v30 = vand.u32 2147483647, %v5440_v24 }
 0x41b   : > { %v1803_v7 = vand.u32 2139095040, %v5443_v25  ;;  %v1800_v34 = vand.u32 2147483647, %v5443_v25 }
 0x41c   : > { %v1700_v36 = vshrl.u32 %v1699_v28, 23  ;;  %v1703_v40 = vand.u32 8388607, %v1696_v30 }
 0x41d   : > { %v1804_v38 = vshrl.u32 %v1803_v7, 23  ;;  %v5453_v42 = vand.u32 8388607, %v1800_v34 }
 0x41e   : > { %v4656_v44 = vadd.s32 4294967169, %v1700_v36  ;;  %v1704_v41 = vor.u32 8388608, %v1703_v40 }
 0x41f   : > { %v4660_v27 = vadd.s32 4294967169, %v1804_v38  ;;  %v1808_v52 = vor.u32 8388608, %v5453_v42 }
 0x420   : > { %v1706_v26 = vadd.s32 1, %v4656_v44  ;;  %v5457_v15 = vshll.u32 %v1704_v41, 8 }
 0x421   : > { %v1810_v4 = vadd.s32 1, %v4660_v27 }
 0x422   : > { %vm1707_vm14 = vcmp.gt.s32.totalorder %v1706_v26, 0 }
 0x423   : > { %v1708_v32 = vsel %vm1707_vm14, %v1706_v26, 0  ;;  %vm1811_vm2 = vcmp.gt.s32.totalorder %v1810_v4, 0 }
 0x424   : > { %v1709_v45 = vshrl.u32 %v1708_v32, 5  ;;  %v1710_v47 = vand.u32 31, %v1708_v32  ;;  %v1812_v9 = vsel %vm1811_vm2, %v1810_v4, 0 }
 0x425   : > { %v1814_v48 = vand.u32 31, %v1812_v9  ;;  %v5455_v49 = vshrl.u32 %v1812_v9, 5 }
 0x426   : > { %v1711_v50 = vsub.s32 32, %v1710_v47  ;;  %v1722_v53 = vshll.u32 %v4997_v37, %v1710_v47  ;;  %v1725_v55 = vshll.u32 %v4998_v39, %v1710_v47  ;;  %vm1731_vm3 = vcmp.lt.s32.totalorder %v1709_v45, 4 }
 0x427   : > { %v1815_v56 = vsub.s32 32, %v1814_v48  ;;  %v1826_v60 = vshll.u32 %v4997_v37, %v1814_v48  ;;  %v1829_v61 = vshll.u32 %v4998_v39, %v1814_v48  ;;  %v1713_v2 = vshll.u32 %v4994_v29, %v1710_v47 }
 0x428   : > { %v1723_v58 = vshrl.u32 %v4998_v39, %v1711_v50  ;;  %v1726_v59 = vshrl.u32 %v4999_v46, %v1711_v50  ;;  %v1714_v10 = vshrl.u32 %v4995_v33, %v1711_v50  ;;  %v1716_v6 = vshll.u32 %v4995_v33, %v1710_v47 }
 0x429   : > { %v1827_v63 = vshrl.u32 %v4998_v39, %v1815_v56  ;;  %v1830_v0 = vshrl.u32 %v4999_v46, %v1815_v56  ;;  %v1717_v13 = vshrl.u32 %v4996_v35, %v1711_v50  ;;  %vm1835_vm4 = vcmp.lt.s32.totalorder %v5455_v49, 4 }
 0x42a   : > { %v1724_v43 = vor.u32 %v1723_v58, %v1722_v53  ;;  %v1727_v14 = vor.u32 %v1726_v59, %v1725_v55  ;;  %v1715_v11 = vor.u32 %v1714_v10, %v1713_v2  ;;  %v1719_v8 = vshll.u32 %v4996_v35, %v1710_v47 }
 0x42b   : > { %v1720_v5 = vshrl.u32 %v4997_v37, %v1711_v50  ;;  %v1712_v51 = vshrl.u32 %v4994_v29, %v1711_v50  ;;  %v1718_v16 = vor.u32 %v1717_v13, %v1716_v6  ;;  %v1828_v1 = vor.u32 %v1827_v63, %v1826_v60 }
 0x42c   : > { %v1737_v31 = vsel %vm1731_vm3, %v1724_v43, 920167782  ;;  %v1741_v57 = vsel %vm1731_vm3, %v1727_v14, 1326507024  ;;  %v1831_v62 = vor.u32 %v1830_v0, %v1829_v61  ;;  %vm1728_vm7 = vcmp.lt.s32.totalorder %v1709_v45, 1 }
 0x42d   : > { %v1721_v17 = vor.u32 %v1720_v5, %v1719_v8  ;;  %vm1729_vm8 = vcmp.lt.s32.totalorder %v1709_v45, 2  ;;  %vm1730_vm9 = vcmp.lt.s32.totalorder %v1709_v45, 3  ;;  %v1732_v18 = vsel %vm1728_vm7, %v1712_v51, %v1715_v11 }
 0x42e   : > { %v1736_v19 = vsel %vm1728_vm7, %v1715_v11, %v1718_v16  ;;  %v1742_v7 = vsel %vm1730_vm9, %v1724_v43, %v1741_v57  ;;  %v1817_v40 = vshll.u32 %v4994_v29, %v1814_v48  ;;  %v1818_v41 = vshrl.u32 %v4995_v33, %v1815_v56 }
 0x42f   : > { %v1733_v21 = vsel %vm1731_vm3, %v1721_v17, 2102212464  ;;  %v1738_v22 = vsel %vm1730_vm9, %v1721_v17, %v1737_v31  ;;  %v1740_v28 = vsel %vm1728_vm7, %v1718_v16, %v1721_v17  ;;  %v1845_v42 = vsel %vm1835_vm4, %v1831_v62, 1326507024 }
 0x430   : > { %v1734_v36 = vsel %vm1730_vm9, %v1718_v16, %v1733_v21  ;;  %v1739_v38 = vsel %vm1729_vm8, %v1736_v19, %v1738_v22  ;;  %v1743_v44 = vsel %vm1729_vm8, %v1740_v28, %v1742_v7  ;;  %v1820_v47 = vshll.u32 %v4995_v33, %v1814_v48 }
 0x431   : > { %v1735_v27 = vsel %vm1729_vm8, %v1732_v18, %v1734_v36  ;;  %v5481_v26 = vmul.u32.u64.low %v5457_v15, %v1743_v44  ;;  %v5482_v4 = vmul.u32.u64.high %v5457_v15, %v1743_v44, %v5481_v26  ;;  %v1819_v9 = vor.u32 %v1818_v41, %v1817_v40 }
 0x432   : > { %v5488_v32 = vmul.u32.u64.low %v5457_v15, %v1739_v38  ;;  %v5489_v45 = vmul.u32.u64.high %v5457_v15, %v1739_v38, %v5488_v32  ;;  %v1821_v50 = vshrl.u32 %v4996_v35, %v1815_v56  ;;  %v1823_v53 = vshll.u32 %v4996_v35, %v1814_v48 }
 0x433   : > { %v1824_v55 = vshrl.u32 %v4997_v37, %v1815_v56  ;;  %v1841_v58 = vsel %vm1835_vm4, %v1828_v1, 920167782  ;;  %v1751_v59 = vmul.u32 %v5457_v15, %v1735_v27  ;;  %v1816_v60 = vshrl.u32 %v4994_v29, %v1815_v56 }
 0x434   : > { %v1848_v61 = vshll.u32 %v1808_v52, 8  ;;  %vm1753_vm10 = vc.u32 %v5482_v4, %v5488_v32  ;;  %v1822_v63 = vor.u32 %v1821_v50, %v1820_v47  ;;  %vm1834_vm11 = vcmp.lt.s32.totalorder %v5455_v49, 3 }
 0x435   : > { %v1825_v0 = vor.u32 %v1824_v55, %v1823_v53  ;;  %v1754_v2 = vadd.s32 1, %v5489_v45  ;;  %vm1832_vm12 = vcmp.lt.s32.totalorder %v5455_v49, 1  ;;  %vm1833_vm14 = vcmp.lt.s32.totalorder %v5455_v49, 2 }
 0x436   : > { %v1846_v48 = vsel %vm1834_vm11, %v1828_v1, %v1845_v42  ;;  %v1840_v15 = vsel %vm1832_vm12, %v1819_v9, %v1822_v63  ;;  %v1836_v14 = vsel %vm1832_vm12, %v1816_v60, %v1819_v9  ;;  %vm1698_vm7 = vcmp.lt.s32.totalorder %v5440_v24, 0 }
 0x437   : > { %v1837_v10 = vsel %vm1835_vm4, %v1825_v0, 2102212464  ;;  %v1842_v43 = vsel %vm1834_vm11, %v1825_v0, %v1841_v58  ;;  %v1844_v56 = vsel %vm1832_vm12, %v1822_v63, %v1825_v0  ;;  %v1755_v52 = vsel %vm1753_vm10, %v1754_v2, %v5489_v45 }
 0x438   : > { %v1843_v6 = vsel %vm1833_vm14, %v1840_v15, %v1842_v43  ;;  %v1847_v13 = vsel %vm1833_vm14, %v1844_v56, %v1846_v48  ;;  %v1756_v11 = vadd.s32 %v1755_v52, %v1751_v59  ;;  %v1838_v8 = vsel %vm1834_vm11, %v1822_v63, %v1837_v10 }
 0x439   : > { %v5511_v5 = vmul.u32.u64.low %v1848_v61, %v1847_v13  ;;  %v5512_v31 = vmul.u32.u64.high %v1848_v61, %v1847_v13, %v5511_v5  ;;  %v5514_v57 = vmul.u32.u64.low %v1848_v61, %v1843_v6  ;;  %v5515_v51 = vmul.u32.u64.high %v1848_v61, %v1843_v6, %v5514_v57 }
 0x43a   : > { %v1757_v16 = vadd.s32 536870912, %v1756_v11  ;;  %v1839_v1 = vsel %vm1833_vm14, %v1836_v14, %v1838_v8  ;;  %v1752_v45 = vadd.s32 %v5488_v32, %v5482_v4  ;;  %vm1697_vm8 = vcmp.le.f32.partialorder %v1696_v30, 0.7853982 }
 0x43b   : > { %vm1857_vm2 = vc.u32 %v5512_v31, %v5514_v57  ;;  %v1858_v17 = vadd.s32 1, %v5515_v51  ;;  %v1855_v19 = vmul.u32 %v1848_v61, %v1839_v1  ;;  %v1856_v15 = vadd.s32 %v5514_v57, %v5512_v31 }
 0x43c   : > { %v1758_v62 = vshrl.u32 %v1757_v16, 30  ;;  %vm1802_vm9 = vcmp.lt.s32.totalorder %v5443_v25, 0  ;;  %vm1801_vm10 = vcmp.le.f32.partialorder %v1800_v34, 0.7853982 }
 0x43d   : > { %v1859_v21 = vsel %vm1857_vm2, %v1858_v17, %v5515_v51  ;;  %vm1788_vm2 = vweird.f32 %v5440_v24 }
 0x43e   : > { %v1759_v18 = vshll.u32 %v1758_v62, 30  ;;  %v1860_v28 = vadd.s32 %v1859_v21, %v1855_v19  ;;  %v1782_v32 = vsub.s32 4, %v1758_v62 }
 0x440   : > { %v1760_v22 = vsub.s32 %v1756_v11, %v1759_v18  ;;  %v1861_v36 = vadd.s32 536870912, %v1860_v28  ;;  %v1783_v51 = vsel %vm1698_vm7, %v1782_v32, %v1758_v62  ;;  %v4679_v32 = vld [vmem:[%s6129_s6 + $0x8] sm:$0xff] }
 0x441   : > { %v1785_v57 = vsel %vm1697_vm8, 0, %v1783_v51 }
 0x442   : > { %v1762_v7 = vsub.s32 0, %v1760_v22  ;;  %v1862_v44 = vshrl.u32 %v1861_v36, 30  ;;  %v1789_v21 = vadd.s32 3, %v1785_v57 }
 0x444   : > { %v4657_v38 = vmin.u32 %v1762_v7, %v1760_v22  ;;  %v1863_v27 = vshll.u32 %v1862_v44, 30  ;;  %v1886_v19 = vsub.s32 4, %v1862_v44  ;;  %v1790_v62 = vand.u32 3, %v1789_v21 }
 0x446   : > { %v1764_v40 = vclz %v4657_v38  ;;  %v1864_v49 = vsub.s32 %v1860_v28, %v1863_v27  ;;  %v1887_v28 = vsel %vm1802_vm9, %v1886_v19, %v1862_v44  ;;  %vm1795_vm11 = vcmp.eq.s32.totalorder %v1790_v62, 2 }
 0x447   : > { %v1889_v38 = vsel %vm1801_vm10, 0, %v1887_v28  ;;  %vm1792_vm12 = vcmp.eq.s32.totalorder %v1790_v62, 0  ;;  %vm1791_vm14 = vcmp.lt.s32.totalorder %v1790_v62, 2 }
 0x448   : > { %v4658_v26 = vadd.s32 4294967294, %v1764_v40  ;;  %v1866_v42 = vsub.s32 0, %v1864_v49 }
 0x44a   : > { %vm4659_vm3 = vcmp.lt.s32.totalorder %v4658_v26, 0  ;;  %v4661_v50 = vmin.u32 %v1866_v42, %v1864_v49 }
 0x44b   : > { %v1767_v41 = vsel %vm4659_vm3, 0, %v4658_v26 }
 0x44c   : > { %v1768_v47 = vsub.s32 32, %v1767_v41  ;;  %v1772_v9 = vsub.s32 4294967266, %v1767_v41  ;;  %v1769_v53 = vshll.u32 %v1760_v22, %v1767_v41  ;;  %v1868_v59 = vclz %v4661_v50 }
 0x44d   : > { %v1893_v41 = vadd.s32 3, %v1889_v38 }
 0x44e   : > { %v1770_v55 = vshrl.u32 %v1752_v45, %v1768_v47  ;;  %v1773_v58 = vadd.s32 127, %v1772_v9  ;;  %v4662_v63 = vadd.s32 4294967294, %v1868_v59  ;;  %v1909_v9 = vpop.permute.xlu0 %1908 }
 0x44f   : > { %v1894_v47 = vand.u32 3, %v1893_v41 }
 0x450   : > { %v1771_v60 = vor.u32 %v1770_v55, %v1769_v53  ;;  %v1774_v61 = vshll.u32 %v1773_v58, 23  ;;  %vm4663_vm4 = vcmp.lt.s32.totalorder %v4662_v63, 0 }
 0x451   : > { %v1871_v10 = vsel %vm4663_vm4, 0, %v4662_v63  ;;  %vm1899_vm3 = vcmp.eq.s32.totalorder %v1894_v47, 2  ;;  %vm1896_vm4 = vcmp.eq.s32.totalorder %v1894_v47, 0 }
 0x452   : > { %v1775_v0 = vor.u32 4788187, %v1774_v61  ;;  %v1778_v48 = vcvt.s32.f32 %v1771_v60  ;;  %v1872_v43 = vsub.s32 32, %v1871_v10  ;;  %v1876_v56 = vsub.s32 4294967266, %v1871_v10 }
 0x453   : > { %v1873_v52 = vshll.u32 %v1864_v49, %v1871_v10 }
 0x454   : > { %v1776_v2 = vand.u32 2147483647, %v1775_v0  ;;  %v1874_v14 = vshrl.u32 %v1856_v15, %v1872_v43  ;;  %v1877_v6 = vadd.s32 127, %v1876_v56 }
 0x456   : > { %v1779_v4 = vmul.f32 %v1778_v48, %v1776_v2  ;;  %v1875_v11 = vor.u32 %v1874_v14, %v1873_v52  ;;  %v1878_v8 = vshll.u32 %v1877_v6, 23  ;;  %v4678_v52 = vld [vmem:[%s6128_s5 + $0x8] sm:$0xff] }
 0x457   : > { %v4690_v14 = vld [vmem:[%s6132_s9 + $0x8] sm:$0xff] }
 0x458   : > { %v1780_v13 = vxor.u32 2147483648, %v1779_v4  ;;  %v1879_v31 = vor.u32 4788187, %v1878_v8  ;;  %v1882_v17 = vcvt.s32.f32 %v1875_v11  ;;  %v4680_v6 = vld [vmem:[%s6130_s7 + $0x8] sm:$0xff]  ;;  %v4692_v11 = vld [vmem:[%s6125_s2 + $0x10] sm:$0xff] }
 0x45a   : > { %v1781_v5 = vsel %vm1698_vm7, %v1780_v13, %v1779_v4  ;;  %v1880_v1 = vand.u32 2147483647, %v1879_v31  ;;  %vm1895_vm7 = vcmp.lt.s32.totalorder %v1894_v47, 2  ;;  %v4693_v13 = vld [vmem:[%s6126_s3 + $0x10] sm:$0xff]  ;;  %v4665_v31 = vld [vmem:[%s6127_s4 + $0x40] sm:$0xff] }
 0x45b   : > { %v1784_v16 = vsel %vm1697_vm8, %v5440_v24, %v1781_v5  ;;  %vm1892_vm8 = vweird.f32 %v5443_v25  ;;  %v4670_v47 = vld [vmem:[%s6127_s4 + $0x50] sm:$0xff] }
 0x45c   : > { %4926 = vcosq.f32 %v1784_v16  ;;  %v1883_v18 = vmul.f32 %v1882_v17, %v1880_v1 }
 0x45d   : > { %4928 = vsinq.f32 %v1784_v16 }
 0x45e   : > { %v1884_v22 = vxor.u32 2147483648, %v1883_v18 }
 0x460   : > { %v1885_v30 = vsel %vm1802_vm9, %v1884_v22, %v1883_v18  ;;  %vm1944_vm9 = vcmask 834560  }
 0x461   : > { %v1888_v7 = vsel %vm1801_vm10, %v5443_v25, %v1885_v30  ;;  %vm2029_vm10 = vcmask 859136   ;;  %v4664_v30 = vld [vmem:[%s6127_s4 + $0x38] sm:$0xff] }
 0x462   : > { %4930 = vcosq.f32 %v1888_v7 }
 0x463   : > { %4932 = vsinq.f32 %v1888_v7 }
 0x466   : > { %v4927_v36 = vpop.eup %4926 }
 0x467   : > { %v4929_v40 = vpop.eup %4928  ;;  %v1796_v27 = vxor.u32 2147483648, %v4927_v36 }
 0x468   : > { %v1793_v26 = vxor.u32 2147483648, %v4929_v40 }
 0x469   : > { %v1797_v49 = vsel %vm1795_vm11, %v1796_v27, %v4929_v40  ;;  %vm2469_vm11 = vcmask 711680  }
 0x46a   : > { %v1794_v42 = vsel %vm1792_vm12, %v4927_v36, %v1793_v26  ;;  %v4668_v26 = vld [vmem:[%s6127_s4 + $0x48] sm:$0xff] }
 0x46b   : > { %v1798_v34 = vsel %vm1791_vm14, %v1794_v42, %v1797_v49 }
 0x46c   : > { %v1799_v44 = vsel %vm1788_vm2, nan, %v1798_v34  ;;  %v4931_v50 = vpop.eup %4930 }
 0x46d   : > { %v1904_v45 = vmul.f32 %v1799_v44, %v1799_v44  ;;  %v4933_v55 = vpop.eup %4932  ;;  %v1900_v58 = vxor.u32 2147483648, %v4931_v50 }
 0x46e   : > { %v1897_v60 = vxor.u32 2147483648, %v4933_v55 }
 0x46f   : > { %v1911_v53 = vmul.f32 %v1909_v9, %v1904_v45  ;;  %v1901_v61 = vsel %vm1899_vm3, %v1900_v58, %v4933_v55 }
 0x470   : > { %v1898_v63 = vsel %vm1896_vm4, %v4931_v50, %v1897_v60 }
 0x471   : > { %v1913_v59 = vadd.f32 %v1911_v53, %v5434_v20  ;;  %v1902_v24 = vsel %vm1895_vm7, %v1898_v63, %v1901_v61 }
 0x472   : > { %v1903_v0 = vsel %vm1892_vm8, nan, %v1902_v24 }
 0x473   : > { %1917 = vrot.lane.b32.xlu1 %v1913_v59, %s6156_s26  ;;  %v1905_v2 = vmul.f32 %v1903_v0, %v1903_v0  ;;  %v4672_v59 = vld [vmem:[%s6127_s4 + $0x58] sm:$0xff] }
 0x475   : > { %v1912_v48 = vmul.f32 %v1909_v9, %v1905_v2  ;;  %v4674_v2 = vld [vmem:[%s6127_s4 + $0x60] sm:$0xff] }
 0x477   : > { %v1914_v10 = vadd.f32 %v1912_v48, %v5437_v23 }
 0x479   : > { %1919 = vrot.lane.b32.xlu0 %v1914_v10, %s6156_s26  ;;  %v4676_v10 = vld [vmem:[%s6127_s4 + $0x68] sm:$0xff] }
 0x4e5   : > { %v1918_v15 = vpop.permute.xlu1 %1917 }
 0x4e6   : > { %1925 = vst.msk [vmem:[#allocation2] sm:$0xff] %vm724_vm13, %v1918_v15 }
 0x4eb   : > { %v1920_v43 = vpop.permute.xlu0 %1919 }
 0x4ec   : > { %v1921_v56 = vsel %vm479_vm0, %v1918_v15, %v1920_v43  ;;  %1927 = vst.msk [vmem:[#allocation2 + $0x10] sm:$0xff] %vm479_vm0, %v1920_v43 }
 0x4ed   : > { %1940 = vrot.lane.b32.xlu1 %v1921_v56, %s5008_s18  ;;  %v1928_v4 = vld [vmem:[#allocation2] sm:$0xff] }
 0x4f1   : > { %1938 = vrot.lane.b32.xlu1 %v1928_v4, %s5008_s18 }
 0x4f3   : > { %v1930_v25 = vld [vmem:[#allocation2 + $0x10] sm:$0xff] }
 0x4f4   : > { %1942 = vrot.lane.b32.xlu0 %v1930_v25, %s5008_s18 }
 0x4f5   : > { %2027 = vrot.lane.b32.xlu1 %v1930_v25, %s6146_s0 }
 0x4f8   : > { %2025 = vrot.lane.b32.xlu0 %v1921_v56, %s6146_s0 }
 0x4f9   : > { %2112 = vrot.lane.b32.xlu1 %v1921_v56, %s6157_s20 }
 0x4fc   : > { %2023 = vrot.lane.b32.xlu0 %v1928_v4, %s6146_s0 }
 0x4fd   : > { %2110 = vrot.lane.b32.xlu1 %v1928_v4, %s6157_s20 }
 0x500   : > { %2114 = vrot.lane.b32.xlu0 %v1930_v25, %s6157_s20 }
 0x501   : > { %2202 = vrot.lane.b32.xlu1 %v1930_v25, %s6158_s19 }
 0x504   : > { %2200 = vrot.lane.b32.xlu0 %v1921_v56, %s6158_s19 }
 0x505   : > { %2288 = vrot.lane.b32.xlu1 %v1921_v56, %s6159_s23 }
 0x508   : > { %2198 = vrot.lane.b32.xlu0 %v1928_v4, %s6158_s19 }
 0x509   : > { %2286 = vrot.lane.b32.xlu1 %v1928_v4, %s6159_s23 }
 0x50c   : > { %2290 = vrot.lane.b32.xlu0 %v1930_v25, %s6159_s23  ;;  %s5012_s23 = smov 114  }
 0x50d   : > { %2378 = vrot.lane.b32.xlu1 %v1930_v25, %s5010_s28 }
 0x510   : > { %2376 = vrot.lane.b32.xlu0 %v1921_v56, %s5010_s28 }
 0x511   : > { %2465 = vrot.lane.b32.xlu1 %v1921_v56, %s6148_s15 }
 0x514   : > { %2374 = vrot.lane.b32.xlu0 %v1928_v4, %s5010_s28  ;;  %s5013_s28 = smov 123  }
 0x515   : > { %2463 = vrot.lane.b32.xlu1 %v1928_v4, %s6148_s15 }
 0x518   : > { %2467 = vrot.lane.b32.xlu0 %v1930_v25, %s6148_s15 }
 0x519   : > { %2565 = vperm.xlu1 %4909, %v4679_v32  }
 0x51c   : > { %2554 = vperm.xlu0 %4908, %v4678_v52  }
 0x51d   : > { %2795 = vperm.xlu1 %4909, %v4690_v14  }
 0x520   : > { %2782 = vperm.xlu0 %4908, %v4680_v6  }
 0x521   : > { %3099 = vperm.xlu1 %4909, %v4693_v13  }
 0x524   : > { %2882 = vperm.xlu0 %4908, %v4692_v11  }
 0x55f   : > { %v1941_v8 = vpop.permute.xlu1 %1940 }
 0x563   : > { %v1939_v5 = vpop.permute.xlu1 %1938 }
 0x564   : > { %v1945_v1 = vsel %vm1944_vm9, %v1939_v5, %v1941_v8 }
 0x566   : > { %v1943_v51 = vpop.permute.xlu0 %1942 }
 0x567   : > { %v1946_v16 = vsel %vm1944_vm9, %v1941_v8, %v1943_v51  ;;  %v2028_v57 = vpop.permute.xlu1 %2027 }
 0x568   : > { %1952 = vmatprep.subr.mxu1 %v1946_v16 }
 0x569   : > { %1953 = vmatpush1.msra.mxu1 %v1945_v1 }
 0x56a   : > { %v2026_v17 = vpop.permute.xlu0 %2025  ;;  %4666 = vmatmul.mubr.msk.f32.vlgmr.msra.gmra.mrb[4].mxu1 %vm748_vm15, %v4665_v31 }
 0x56b   : > { %v2031_v18 = vsel %vm2029_vm10, %v2026_v17, %v2028_v57  ;;  %v2113_v19 = vpop.permute.xlu1 %2112  ;;  %2101 = vmatprep.mubr.f32.mxu1 %v4993_v3 }
 0x56c   : > { %2037 = vmatprep.subr.mxu1 %v2031_v18 }
 0x56e   : > { %v2024_v21 = vpop.permute.xlu0 %2023 }
 0x56f   : > { %v2030_v22 = vsel %vm2029_vm10, %v2024_v21, %v2026_v17  ;;  %v2111_v28 = vpop.permute.xlu1 %2110 }
 0x570   : > { %2038 = vmatpush1.msra.mxu1 %v2030_v22  ;;  %v2116_v38 = vsel %vm829_vm5, %v2111_v28, %v2113_v19 }
 0x572   : > { %v2115_v62 = vpop.permute.xlu0 %2114  ;;  %4667 = vmatmul.mubr.msk.f32.vlgmr.msra.gmra.mrb[4].mxu1 %vm748_vm15, %v4664_v30 }
 0x573   : > { %v2117_v7 = vsel %vm829_vm5, %v2113_v19, %v2115_v62  ;;  %v2203_v36 = vpop.permute.xlu1 %2202  ;;  %2187 = vmatprep.mubr.f32.mxu1 %v4993_v3  ;;  %vm2380_vm5 = vcmask 736256  }
 0x574   : > { %2123 = vmatprep.subr.mxu1 %v2117_v7 }
 0x575   : > { %2124 = vmatpush1.msra.mxu1 %v2116_v38 }
 0x576   : > { %v2201_v40 = vpop.permute.xlu0 %2200 }
 0x577   : > { %v2205_v27 = vsel %vm1005_vm1, %v2201_v40, %v2203_v36  ;;  %v2289_v49 = vpop.permute.xlu1 %2288 }
 0x578   : > { %2211 = vmatprep.subr.mxu1 %v2205_v27 }
 0x57a   : > { %v2199_v41 = vpop.permute.xlu0 %2198  ;;  %4669 = vmatmul.mubr.msk.f32.vlgmr.msra.gmra.mrb[4].mxu1 %vm748_vm15, %v4668_v26 }
 0x57b   : > { %v2204_v42 = vsel %vm1005_vm1, %v2199_v41, %v2201_v40  ;;  %v2287_v34 = vpop.permute.xlu1 %2286  ;;  %2275 = vmatprep.mubr.f32.mxu1 %v4993_v3 }
 0x57c   : > { %2212 = vmatpush1.msra.mxu1 %v2204_v42  ;;  %v2292_v53 = vsel %vm1272_vm6, %v2287_v34, %v2289_v49 }
 0x57e   : > { %v2291_v44 = vpop.permute.xlu0 %2290 }
 0x57f   : > { %v2293_v45 = vsel %vm1272_vm6, %v2289_v49, %v2291_v44  ;;  %v2379_v9 = vpop.permute.xlu1 %2378 }
 0x580   : > { %2299 = vmatprep.subr.mxu1 %v2293_v45 }
 0x582   : > { %v2377_v50 = vpop.permute.xlu0 %2376  ;;  %4671 = vmatmul.mubr.msk.f32.vlgmr.msra.gmra.mrb[4].mxu1 %vm748_vm15, %v4670_v47 }
 0x583   : > { %2300 = vmatpush1.msra.mxu1 %v2292_v53  ;;  %v2382_v55 = vsel %vm2380_vm5, %v2377_v50, %v2379_v9  ;;  %2363 = vmatprep.mubr.f32.mxu1 %v4993_v3  ;;  %v2466_v60 = vpop.permute.xlu1 %2465 }
 0x584   : > { %2388 = vmatprep.subr.mxu1 %v2382_v55 }
 0x586   : > { %v2375_v58 = vpop.permute.xlu0 %2374 }
 0x587   : > { %v2381_v61 = vsel %vm2380_vm5, %v2375_v58, %v2377_v50  ;;  %v2464_v0 = vpop.permute.xlu1 %2463 }
 0x588   : > { %v2470_v48 = vsel %vm2469_vm11, %v2464_v0, %v2466_v60 }
 0x58a   : > { %v2468_v63 = vpop.permute.xlu0 %2467  ;;  %4673 = vmatmul.mubr.msk.f32.vlgmr.msra.gmra.mrb[4].mxu1 %vm748_vm15, %v4672_v59 }
 0x58b   : > { %2389 = vmatpush1.msra.mxu1 %v2381_v61  ;;  %v2471_v24 = vsel %vm2469_vm11, %v2466_v60, %v2468_v63  ;;  %2452 = vmatprep.mubr.f32.mxu1 %v4993_v3 }
 0x58c   : > { %2477 = vmatprep.subr.mxu1 %v2471_v24 }
 0x592   : > { %4675 = vmatmul.mubr.msk.f32.vlgmr.msra.gmra.mrb[4].mxu1 %vm748_vm15, %v4674_v2 }
 0x593   : > { %2478 = vmatpush1.msra.mxu1 %v2470_v48  ;;  %2541 = vmatprep.mubr.f32.mxu1 %v4993_v3 }
 0x598   : > { %v2566_v25 = vpop.permute.xlu1 %2565 }
 0x59a   : > { %4677 = vmatmul.mubr.msk.f32.vlgmr.msra.gmra.mrb[4].mxu1 %vm748_vm15, %v4676_v10 }
 0x59b   : > { %4056 = vmatprep.mubr.f32.mxu1 %v4993_v3  ;;  %v2555_v15 = vpop.permute.xlu0 %2554 }
 0x66d   : > { %v2543_v43 = vpop.f32.mrb[4].mxu1 }
 0x66e   : > { %v5619_v56 = vadd.f32 %v2555_v15, %v2543_v43  ;;  %v2545_v4 = vpop.f32.mrb[5].mxu1 }
 0x66f   : > { %v5621_v32 = vadd.f32 %v2555_v15, %v2545_v4 }
 0x670   : > { %v5624_v52 = vmul.f32 %v2566_v25, %v5619_v56 }
 0x671   : > { %v5627_v14 = vmul.f32 %v2566_v25, %v5621_v32 }
 0x672   : > { %v2570_v6 = vand.u32 2147483647, %v5624_v52  ;;  %v2573_v13 = vand.u32 2139095040, %v5624_v52 }
 0x673   : > { %v2677_v11 = vand.u32 2139095040, %v5627_v14  ;;  %v2674_v51 = vand.u32 2147483647, %v5627_v14 }
 0x674   : > { %v2574_v8 = vshrl.u32 %v2573_v13, 23  ;;  %v2577_v5 = vand.u32 8388607, %v2570_v6 }
 0x675   : > { %v2678_v16 = vshrl.u32 %v2677_v11, 23  ;;  %v2681_v18 = vand.u32 8388607, %v2674_v51 }
 0x676   : > { %v4681_v31 = vadd.s32 4294967169, %v2574_v8  ;;  %v2578_v17 = vor.u32 8388608, %v2577_v5 }
 0x677   : > { %v4685_v57 = vadd.s32 4294967169, %v2678_v16  ;;  %v2682_v7 = vor.u32 8388608, %v2681_v18 }
 0x678   : > { %v2580_v1 = vadd.s32 1, %v4681_v31  ;;  %v5637_v62 = vshll.u32 %v2578_v17, 8 }
 0x679   : > { %v2684_v19 = vadd.s32 1, %v4685_v57 }
 0x67a   : > { %vm2581_vm6 = vcmp.gt.s32.totalorder %v2580_v1, 0 }
 0x67b   : > { %v2582_v21 = vsel %vm2581_vm6, %v2580_v1, 0  ;;  %vm2685_vm12 = vcmp.gt.s32.totalorder %v2684_v19, 0 }
 0x67c   : > { %v2583_v22 = vshrl.u32 %v2582_v21, 5  ;;  %v2584_v30 = vand.u32 31, %v2582_v21  ;;  %v2686_v28 = vsel %vm2685_vm12, %v2684_v19, 0 }
 0x67d   : > { %v5640_v40 = vshrl.u32 %v2686_v28, 5  ;;  %v2688_v27 = vand.u32 31, %v2686_v28 }
 0x67e   : > { %v2585_v36 = vsub.s32 32, %v2584_v30  ;;  %v2587_v38 = vshll.u32 %v4994_v29, %v2584_v30  ;;  %v2590_v26 = vshll.u32 %v4995_v33, %v2584_v30  ;;  %v2593_v49 = vshll.u32 %v4996_v35, %v2584_v30 }
 0x67f   : > { %v2596_v41 = vshll.u32 %v4997_v37, %v2584_v30  ;;  %v2599_v42 = vshll.u32 %v4998_v39, %v2584_v30  ;;  %vm2602_vm14 = vcmp.lt.s32.totalorder %v2583_v22, 1  ;;  %vm2603_vm2 = vcmp.lt.s32.totalorder %v2583_v22, 2 }
 0x680   : > { %v2588_v34 = vshrl.u32 %v4995_v33, %v2585_v36  ;;  %v2591_v44 = vshrl.u32 %v4996_v35, %v2585_v36  ;;  %v2594_v45 = vshrl.u32 %v4997_v37, %v2585_v36  ;;  %v2586_v47 = vshrl.u32 %v4994_v29, %v2585_v36 }
 0x681   : > { %v2597_v9 = vshrl.u32 %v4998_v39, %v2585_v36  ;;  %v2600_v50 = vshrl.u32 %v4999_v46, %v2585_v36  ;;  %v2689_v59 = vsub.s32 32, %v2688_v27  ;;  %vm2604_vm3 = vcmp.lt.s32.totalorder %v2583_v22, 3 }
 0x682   : > { %v2589_v53 = vor.u32 %v2588_v34, %v2587_v38  ;;  %v2592_v55 = vor.u32 %v2591_v44, %v2590_v26  ;;  %v2595_v58 = vor.u32 %v2594_v45, %v2593_v49  ;;  %vm2605_vm4 = vcmp.lt.s32.totalorder %v2583_v22, 4 }
 0x683   : > { %v2598_v60 = vor.u32 %v2597_v9, %v2596_v41  ;;  %v2601_v61 = vor.u32 %v2600_v50, %v2599_v42  ;;  %v2691_v43 = vshll.u32 %v4994_v29, %v2688_v27  ;;  %v2692_v13 = vshrl.u32 %v4995_v33, %v2689_v59 }
 0x684   : > { %v2606_v63 = vsel %vm2602_vm14, %v2586_v47, %v2589_v53  ;;  %v2607_v24 = vsel %vm2605_vm4, %v2595_v58, 2102212464  ;;  %v2610_v0 = vsel %vm2602_vm14, %v2589_v53, %v2592_v55  ;;  %v2614_v2 = vsel %vm2602_vm14, %v2592_v55, %v2595_v58 }
 0x685   : > { %v2608_v48 = vsel %vm2604_vm3, %v2592_v55, %v2607_v24  ;;  %v2611_v10 = vsel %vm2605_vm4, %v2598_v60, 920167782  ;;  %v2615_v15 = vsel %vm2605_vm4, %v2601_v61, 1326507024  ;;  %v2694_v11 = vshll.u32 %v4995_v33, %v2688_v27 }
 0x686   : > { %v2612_v4 = vsel %vm2604_vm3, %v2595_v58, %v2611_v10  ;;  %v2616_v25 = vsel %vm2604_vm3, %v2598_v60, %v2615_v15  ;;  %v2609_v8 = vsel %vm2603_vm2, %v2606_v63, %v2608_v48  ;;  %v2695_v31 = vshrl.u32 %v4996_v35, %v2689_v59 }
 0x687   : > { %v2613_v5 = vsel %vm2603_vm2, %v2610_v0, %v2612_v4  ;;  %v2617_v16 = vsel %vm2603_vm2, %v2614_v2, %v2616_v25  ;;  %v2693_v19 = vor.u32 %v2692_v13, %v2691_v43  ;;  %v2697_v30 = vshll.u32 %v4996_v35, %v2688_v27 }
 0x688   : > { %v5663_v57 = vmul.u32.u64.low %v5637_v62, %v2617_v16  ;;  %v5664_v1 = vmul.u32.u64.high %v5637_v62, %v2617_v16, %v5663_v57  ;;  %v5667_v17 = vmul.u32.u64.low %v5637_v62, %v2613_v5  ;;  %v5668_v18 = vmul.u32.u64.high %v5637_v62, %v2613_v5, %v5667_v17 }
 0x689   : > { %v2696_v21 = vor.u32 %v2695_v31, %v2694_v11  ;;  %v2698_v28 = vshrl.u32 %v4997_v37, %v2689_v59  ;;  %v2700_v36 = vshll.u32 %v4997_v37, %v2688_v27  ;;  %v2701_v22 = vshrl.u32 %v4998_v39, %v2689_v59 }
 0x68a   : > { %v2704_v38 = vshrl.u32 %v4999_v46, %v2689_v59  ;;  %v2722_v26 = vshll.u32 %v2682_v7, 8  ;;  %v2625_v49 = vmul.u32 %v5637_v62, %v2609_v8  ;;  %v2690_v41 = vshrl.u32 %v4994_v29, %v2689_v59 }
 0x68b   : > { %v2699_v42 = vor.u32 %v2698_v28, %v2697_v30  ;;  %v2703_v34 = vshll.u32 %v4998_v39, %v2688_v27  ;;  %vm2627_vm7 = vc.u32 %v5664_v1, %v5667_v17  ;;  %v2628_v44 = vadd.s32 1, %v5668_v18 }
 0x68c   : > { %v2702_v45 = vor.u32 %v2701_v22, %v2700_v36  ;;  %vm2706_vm8 = vcmp.lt.s32.totalorder %v5640_v40, 1  ;;  %vm2708_vm9 = vcmp.lt.s32.totalorder %v5640_v40, 3  ;;  %vm2709_vm5 = vcmp.lt.s32.totalorder %v5640_v40, 4 }
 0x68d   : > { %v2705_v47 = vor.u32 %v2704_v38, %v2703_v34  ;;  %v2714_v7 = vsel %vm2706_vm8, %v2693_v19, %v2696_v21  ;;  %v2629_v62 = vsel %vm2627_vm7, %v2628_v44, %v5668_v18  ;;  %v2711_v9 = vsel %vm2709_vm5, %v2699_v42, 2102212464 }
 0x68e   : > { %v2715_v50 = vsel %vm2709_vm5, %v2702_v45, 920167782  ;;  %v2718_v53 = vsel %vm2706_vm8, %v2696_v21, %v2699_v42  ;;  %v2630_v55 = vadd.s32 %v2629_v62, %v2625_v49  ;;  %vm2707_vm6 = vcmp.lt.s32.totalorder %v5640_v40, 2 }
 0x68f   : > { %v2716_v27 = vsel %vm2708_vm9, %v2699_v42, %v2715_v50  ;;  %v2719_v58 = vsel %vm2709_vm5, %v2705_v47, 1326507024  ;;  %v2710_v59 = vsel %vm2706_vm8, %v2690_v41, %v2693_v19  ;;  %v2712_v60 = vsel %vm2708_vm9, %v2696_v21, %v2711_v9 }
 0x690   : > { %v2717_v61 = vsel %vm2707_vm6, %v2714_v7, %v2716_v27  ;;  %v2720_v63 = vsel %vm2708_vm9, %v2702_v45, %v2719_v58  ;;  %v2631_v24 = vadd.s32 536870912, %v2630_v55  ;;  %v2713_v4 = vsel %vm2707_vm6, %v2710_v59, %v2712_v60 }
 0x691   : > { %v2721_v0 = vsel %vm2707_vm6, %v2718_v53, %v2720_v63  ;;  %v5685_v2 = vmul.u32.u64.low %v2722_v26, %v2717_v61  ;;  %v5686_v48 = vmul.u32.u64.high %v2722_v26, %v2717_v61, %v5685_v2  ;;  %v2729_v40 = vmul.u32 %v2722_v26, %v2713_v4 }
 0x692   : > { %v5688_v10 = vmul.u32.u64.low %v2722_v26, %v2721_v0  ;;  %v5689_v15 = vmul.u32.u64.high %v2722_v26, %v2721_v0, %v5688_v10  ;;  %v2632_v43 = vshrl.u32 %v2631_v24, 30  ;;  %v2626_v38 = vadd.s32 %v5667_v17, %v5664_v1 }
 0x693   : > { %v2732_v13 = vadd.s32 1, %v5686_v48  ;;  %vm2572_vm3 = vcmp.lt.s32.totalorder %v5624_v52, 0  ;;  %vm2571_vm4 = vcmp.le.f32.partialorder %v2570_v6, 0.7853982  ;;  %vm2676_vm7 = vcmp.lt.s32.totalorder %v5627_v14, 0 }
 0x694   : > { %v2633_v25 = vshll.u32 %v2632_v43, 30  ;;  %vm2731_vm12 = vc.u32 %v5689_v15, %v5685_v2  ;;  %v2730_v27 = vadd.s32 %v5685_v2, %v5689_v15  ;;  %v2656_v17 = vsub.s32 4, %v2632_v43 }
 0x695   : > { %v2733_v8 = vsel %vm2731_vm12, %v2732_v13, %v5686_v48  ;;  %vm2675_vm8 = vcmp.le.f32.partialorder %v2674_v51, 0.7853982  ;;  %vm2662_vm12 = vweird.f32 %v5624_v52 }
 0x696   : > { %v2634_v11 = vsub.s32 %v2630_v55, %v2633_v25  ;;  %v2734_v5 = vadd.s32 %v2733_v8, %v2729_v40  ;;  %v2657_v4 = vsel %vm2572_vm3, %v2656_v17, %v2632_v43 }
 0x697   : > { %v2659_v40 = vsel %vm2571_vm4, 0, %v2657_v4 }
 0x698   : > { %v2636_v16 = vsub.s32 0, %v2634_v11  ;;  %v2735_v31 = vadd.s32 536870912, %v2734_v5 }
 0x69a   : > { %v4682_v57 = vmin.u32 %v2636_v16, %v2634_v11  ;;  %v2736_v18 = vshrl.u32 %v2735_v31, 30 }
 0x69c   : > { %v2638_v19 = vclz %v4682_v57  ;;  %v2737_v21 = vshll.u32 %v2736_v18, 30  ;;  %v2760_v8 = vsub.s32 4, %v2736_v18 }
 0x69e   : > { %v4683_v30 = vadd.s32 4294967294, %v2638_v19  ;;  %v2738_v28 = vsub.s32 %v2734_v5, %v2737_v21  ;;  %v2663_v5 = vadd.s32 3, %v2659_v40  ;;  %v2761_v31 = vsel %vm2676_vm7, %v2760_v8, %v2736_v18 }
 0x69f   : > { %v2763_v21 = vsel %vm2675_vm8, 0, %v2761_v31 }
 0x6a0   : > { %vm4684_vm14 = vcmp.lt.s32.totalorder %v4683_v30, 0  ;;  %v2740_v22 = vsub.s32 0, %v2738_v28  ;;  %v2664_v57 = vand.u32 3, %v2663_v5 }
 0x6a1   : > { %v2641_v36 = vsel %vm4684_vm14, 0, %v4683_v30 }
 0x6a2   : > { %v2642_v26 = vsub.s32 32, %v2641_v36  ;;  %v2646_v49 = vsub.s32 4294967266, %v2641_v36  ;;  %v4686_v41 = vmin.u32 %v2740_v22, %v2738_v28  ;;  %v2643_v42 = vshll.u32 %v2634_v11, %v2641_v36 }
 0x6a3   : > { %vm2666_vm9 = vcmp.eq.s32.totalorder %v2664_v57, 0  ;;  %vm2669_vm5 = vcmp.eq.s32.totalorder %v2664_v57, 2  ;;  %v2767_v22 = vadd.s32 3, %v2763_v21  ;;  %vm2665_vm6 = vcmp.lt.s32.totalorder %v2664_v57, 2 }
 0x6a4   : > { %v2644_v34 = vshrl.u32 %v2626_v38, %v2642_v26  ;;  %v2647_v44 = vadd.s32 127, %v2646_v49  ;;  %v2742_v45 = vclz %v4686_v41 }
 0x6a5   : > { %v2768_v51 = vand.u32 3, %v2767_v22 }
 0x6a6   : > { %v2645_v47 = vor.u32 %v2644_v34, %v2643_v42  ;;  %v2648_v7 = vshll.u32 %v2647_v44, 23  ;;  %v4687_v62 = vadd.s32 4294967294, %v2742_v45 }
 0x6a7   : > { %vm2773_vm14 = vcmp.eq.s32.totalorder %v2768_v51, 2 }
 0x6a8   : > { %v2649_v9 = vor.u32 4788187, %v2648_v7  ;;  %vm4688_vm2 = vcmp.lt.s32.totalorder %v4687_v62, 0  ;;  %v2652_v53 = vcvt.s32.f32 %v2645_v47 }
 0x6a9   : > { %v2745_v55 = vsel %vm4688_vm2, 0, %v4687_v62  ;;  %vm2770_vm2 = vcmp.eq.s32.totalorder %v2768_v51, 0 }
 0x6aa   : > { %v2650_v50 = vand.u32 2147483647, %v2649_v9  ;;  %v2746_v58 = vsub.s32 32, %v2745_v55  ;;  %v2750_v59 = vsub.s32 4294967266, %v2745_v55  ;;  %v2747_v60 = vshll.u32 %v2738_v28, %v2745_v55 }
 0x6ac   : > { %v2653_v1 = vmul.f32 %v2652_v53, %v2650_v50  ;;  %v2748_v61 = vshrl.u32 %v2730_v27, %v2746_v58  ;;  %v2751_v63 = vadd.s32 127, %v2750_v59  ;;  %v2783_v50 = vpop.permute.xlu0 %2782  ;;  %v4689_v59 = vld [vmem:[%s6131_s8 + $0x8] sm:$0xff] }
 0x6ae   : > { %v2654_v24 = vxor.u32 2147483648, %v2653_v1  ;;  %v2749_v0 = vor.u32 %v2748_v61, %v2747_v60  ;;  %v2752_v48 = vshll.u32 %v2751_v63, 23 }
 0x6b0   : > { %v2655_v10 = vsel %vm2572_vm3, %v2654_v24, %v2653_v1  ;;  %v2753_v2 = vor.u32 4788187, %v2752_v48  ;;  %v2756_v13 = vcvt.s32.f32 %v2749_v0  ;;  %vm2769_vm3 = vcmp.lt.s32.totalorder %v2768_v51, 2  ;;  %v2883_v24 = vpop.permute.xlu0 %2882 }
 0x6b1   : > { %v2658_v25 = vsel %vm2571_vm4, %v5624_v52, %v2655_v10  ;;  %vm2766_vm4 = vweird.f32 %v5627_v14 }
 0x6b2   : > { %4934 = vcosq.f32 %v2658_v25  ;;  %v2754_v15 = vand.u32 2147483647, %v2753_v2 }
 0x6b3   : > { %4936 = vsinq.f32 %v2658_v25 }
 0x6b4   : > { %v2757_v11 = vmul.f32 %v2756_v13, %v2754_v15 }
 0x6b6   : > { %v2758_v16 = vxor.u32 2147483648, %v2757_v11 }
 0x6b8   : > { %v2759_v6 = vsel %vm2676_vm7, %v2758_v16, %v2757_v11 }
 0x6b9   : > { %v2762_v43 = vsel %vm2675_vm8, %v5627_v14, %v2759_v6  ;;  %v2796_v14 = vpop.permute.xlu1 %2795 }
 0x6ba   : > { %4938 = vcosq.f32 %v2762_v43 }
 0x6bb   : > { %4940 = vsinq.f32 %v2762_v43 }
 0x6bc   : > { %v4935_v19 = vpop.eup %4934 }
 0x6bd   : > { %v4937_v30 = vpop.eup %4936  ;;  %v2670_v28 = vxor.u32 2147483648, %v4935_v19 }
 0x6be   : > { %v2667_v36 = vxor.u32 2147483648, %v4937_v30 }
 0x6bf   : > { %v2671_v26 = vsel %vm2669_vm5, %v2670_v28, %v4937_v30 }
 0x6c0   : > { %v2668_v38 = vsel %vm2666_vm9, %v4935_v19, %v2667_v36 }
 0x6c1   : > { %v2672_v49 = vsel %vm2665_vm6, %v2668_v38, %v2671_v26 }
 0x6c2   : > { %v2673_v42 = vsel %vm2662_vm12, nan, %v2672_v49 }
 0x6c3   : > { %v2778_v47 = vmul.f32 %v2673_v42, %v2673_v42 }
 0x6c4   : > { %v4939_v41 = vpop.eup %4938 }
 0x6c5   : > { %v4941_v18 = vpop.eup %4940  ;;  %v2774_v34 = vxor.u32 2147483648, %v4939_v41  ;;  %v2785_v55 = vmul.f32 %v2783_v50, %v2778_v47 }
 0x6c6   : > { %v2771_v44 = vxor.u32 2147483648, %v4941_v18 }
 0x6c7   : > { %v2775_v45 = vsel %vm2773_vm14, %v2774_v34, %v4941_v18  ;;  %v2787_v58 = vadd.f32 %v2785_v55, %v5619_v56 }
 0x6c8   : > { %v2772_v7 = vsel %vm2770_vm2, %v4939_v41, %v2771_v44 }
 0x6c9   : > { %v2776_v62 = vsel %vm2769_vm3, %v2772_v7, %v2775_v45 }
 0x6ca   : > { %v2777_v9 = vsel %vm2766_vm4, nan, %v2776_v62 }
 0x6cb   : > { %v2779_v53 = vmul.f32 %v2777_v9, %v2777_v9 }
 0x6cd   : > { %v2786_v27 = vmul.f32 %v2783_v50, %v2779_v53 }
 0x6cf   : > { %v2788_v52 = vadd.f32 %v2786_v27, %v5621_v32 }
 0x6d1   : > { %2801 = vmatprep.subr.mxu0 %v2788_v52 }
 0x6d2   : > { %2802 = vmatpush1.msra.mxu0 %v2787_v58 }
 0x6d3   : > { %4691 = vmatmul.mubr.msk.f32.vlgmr.msra.gmra.mrb[2].mxu0 %vm748_vm15, %v4689_v59 }
 0x6d4   : > { %3207 = vmatprep.mubr.f32.mxu0 %v4993_v3 }
 0x7a6   : > { %v2867_v1 = vpop.f32.mrb[2].mxu0 }
 0x7a7   : > { %v2868_v17 = vadd.f32 %v2867_v1, %v2796_v14  ;;  %v2869_v60 = vpop.f32.mrb[3].mxu0 }
 0x7a8   : > { %v2870_v61 = vadd.f32 %v2869_v60, %v2796_v14 }
 0x7a9   : > { %v2872_v63 = vmul.f32 %v2868_v17, %v5427_v12 }
 0x7aa   : > { %v2873_v32 = vmul.f32 %v2870_v61, %v5429_v54 }
 0x7ab   : > { %v5716_v56 = vadd.f32 %v2872_v63, %v5434_v20 }
 0x7ac   : > { %v5719_v0 = vadd.f32 %v2873_v32, %v5437_v23 }
 0x7ad   : > { %v5722_v48 = vmul.f32 %v2883_v24, %v5716_v56 }
 0x7ae   : > { %v5725_v10 = vmul.f32 %v2883_v24, %v5719_v0 }
 0x7af   : > { %v2890_v4 = vand.u32 2139095040, %v5722_v48  ;;  %v2887_v25 = vand.u32 2147483647, %v5722_v48 }
 0x7b0   : > { %v2994_v2 = vand.u32 2139095040, %v5725_v10  ;;  %v2991_v23 = vand.u32 2147483647, %v5725_v10 }
 0x7b1   : > { %v2891_v15 = vshrl.u32 %v2890_v4, 23  ;;  %v2894_v40 = vand.u32 8388607, %v2887_v25 }
 0x7b2   : > { %v2995_v13 = vshrl.u32 %v2994_v2, 23  ;;  %v5735_v6 = vand.u32 8388607, %v2991_v23 }
 0x7b3   : > { %v4694_v20 = vadd.s32 4294967169, %v2891_v15  ;;  %v2895_v16 = vor.u32 8388608, %v2894_v40 }
 0x7b4   : > { %v4698_v11 = vadd.s32 4294967169, %v2995_v13  ;;  %v2999_v22 = vor.u32 8388608, %v5735_v6 }
 0x7b5   : > { %v2897_v8 = vadd.s32 1, %v4694_v20  ;;  %v5739_v36 = vshll.u32 %v2895_v16, 8 }
 0x7b6   : > { %v3001_v5 = vadd.s32 1, %v4698_v11 }
 0x7b7   : > { %vm2898_vm7 = vcmp.gt.s32.totalorder %v2897_v8, 0 }
 0x7b8   : > { %v2899_v31 = vsel %vm2898_vm7, %v2897_v8, 0  ;;  %vm3002_vm8 = vcmp.gt.s32.totalorder %v3001_v5, 0 }
 0x7b9   : > { %v2900_v43 = vshrl.u32 %v2899_v31, 5  ;;  %v2901_v57 = vand.u32 31, %v2899_v31  ;;  %v3003_v19 = vsel %vm3002_vm8, %v3001_v5, 0 }
 0x7ba   : > { %v3005_v21 = vand.u32 31, %v3003_v19  ;;  %v5737_v28 = vshrl.u32 %v3003_v19, 5 }
 0x7bb   : > { %v2902_v30 = vsub.s32 32, %v2901_v57  ;;  %v2913_v38 = vshll.u32 %v4997_v37, %v2901_v57  ;;  %v2916_v26 = vshll.u32 %v4998_v39, %v2901_v57  ;;  %vm2922_vm9 = vcmp.lt.s32.totalorder %v2900_v43, 4 }
 0x7bc   : > { %v3006_v49 = vsub.s32 32, %v3005_v21  ;;  %v3017_v18 = vshll.u32 %v4997_v37, %v3005_v21  ;;  %v3020_v42 = vshll.u32 %v4998_v39, %v3005_v21  ;;  %v2904_v45 = vshll.u32 %v4994_v29, %v2901_v57 }
 0x7bd   : > { %v2914_v51 = vshrl.u32 %v4998_v39, %v2902_v30  ;;  %v2917_v41 = vshrl.u32 %v4999_v46, %v2902_v30  ;;  %v2905_v47 = vshrl.u32 %v4995_v33, %v2902_v30  ;;  %v2907_v9 = vshll.u32 %v4995_v33, %v2901_v57 }
 0x7be   : > { %v3018_v34 = vshrl.u32 %v4998_v39, %v3006_v49  ;;  %v3021_v44 = vshrl.u32 %v4999_v46, %v3006_v49  ;;  %v2908_v50 = vshrl.u32 %v4996_v35, %v2902_v30  ;;  %vm3026_vm5 = vcmp.lt.s32.totalorder %v5737_v28, 4 }
 0x7bf   : > { %v2915_v7 = vor.u32 %v2914_v51, %v2913_v38  ;;  %v2918_v62 = vor.u32 %v2917_v41, %v2916_v26  ;;  %v2906_v53 = vor.u32 %v2905_v47, %v2904_v45  ;;  %v2910_v55 = vshll.u32 %v4996_v35, %v2901_v57 }
 0x7c0   : > { %v2911_v27 = vshrl.u32 %v4997_v37, %v2902_v30  ;;  %v2903_v59 = vshrl.u32 %v4994_v29, %v2902_v30  ;;  %v2909_v14 = vor.u32 %v2908_v50, %v2907_v9  ;;  %v3019_v1 = vor.u32 %v3018_v34, %v3017_v18 }
 0x7c1   : > { %v2928_v52 = vsel %vm2922_vm9, %v2915_v7, 920167782  ;;  %v2932_v58 = vsel %vm2922_vm9, %v2918_v62, 1326507024  ;;  %v3022_v17 = vor.u32 %v3021_v44, %v3020_v42  ;;  %vm2919_vm6 = vcmp.lt.s32.totalorder %v2900_v43, 1 }
 0x7c2   : > { %v2912_v60 = vor.u32 %v2911_v27, %v2910_v55  ;;  %vm2920_vm12 = vcmp.lt.s32.totalorder %v2900_v43, 2  ;;  %vm2921_vm14 = vcmp.lt.s32.totalorder %v2900_v43, 3  ;;  %v2923_v61 = vsel %vm2919_vm6, %v2903_v59, %v2906_v53 }
 0x7c3   : > { %v2927_v63 = vsel %vm2919_vm6, %v2906_v53, %v2909_v14  ;;  %v2933_v2 = vsel %vm2921_vm14, %v2915_v7, %v2932_v58  ;;  %v3008_v40 = vshll.u32 %v4994_v29, %v3005_v21  ;;  %v3009_v16 = vshrl.u32 %v4995_v33, %v3006_v49 }
 0x7c4   : > { %v2924_v32 = vsel %vm2922_vm9, %v2912_v60, 2102212464  ;;  %v2929_v24 = vsel %vm2921_vm14, %v2912_v60, %v2928_v52  ;;  %v2931_v4 = vsel %vm2919_vm6, %v2909_v14, %v2912_v60  ;;  %v3036_v6 = vsel %vm3026_vm5, %v3022_v17, 1326507024 }
 0x7c5   : > { %v2925_v15 = vsel %vm2921_vm14, %v2909_v14, %v2924_v32  ;;  %v2930_v13 = vsel %vm2920_vm12, %v2927_v63, %v2929_v24  ;;  %v2934_v20 = vsel %vm2920_vm12, %v2931_v4, %v2933_v2  ;;  %v3011_v57 = vshll.u32 %v4995_v33, %v3005_v21 }
 0x7c6   : > { %v2926_v11 = vsel %vm2920_vm12, %v2923_v61, %v2925_v15  ;;  %v5763_v8 = vmul.u32.u64.low %v5739_v36, %v2934_v20  ;;  %v5764_v5 = vmul.u32.u64.high %v5739_v36, %v2934_v20, %v5763_v8  ;;  %v3010_v19 = vor.u32 %v3009_v16, %v3008_v40 }
 0x7c7   : > { %v5770_v31 = vmul.u32.u64.low %v5739_v36, %v2930_v13  ;;  %v5771_v43 = vmul.u32.u64.high %v5739_v36, %v2930_v13, %v5770_v31  ;;  %v3012_v30 = vshrl.u32 %v4996_v35, %v3006_v49  ;;  %v3014_v38 = vshll.u32 %v4996_v35, %v3005_v21 }
 0x7c8   : > { %v3015_v26 = vshrl.u32 %v4997_v37, %v3006_v49  ;;  %v3032_v51 = vsel %vm3026_vm5, %v3019_v1, 920167782  ;;  %v2942_v41 = vmul.u32 %v5739_v36, %v2926_v11  ;;  %v3007_v18 = vshrl.u32 %v4994_v29, %v3006_v49 }
 0x7c9   : > { %v3039_v42 = vshll.u32 %v2999_v22, 8  ;;  %vm2944_vm2 = vc.u32 %v5764_v5, %v5770_v31  ;;  %v3013_v34 = vor.u32 %v3012_v30, %v3011_v57  ;;  %vm3025_vm3 = vcmp.lt.s32.totalorder %v5737_v28, 3 }
 0x7ca   : > { %v3016_v44 = vor.u32 %v3015_v26, %v3014_v38  ;;  %v2945_v45 = vadd.s32 1, %v5771_v43  ;;  %vm3023_vm4 = vcmp.lt.s32.totalorder %v5737_v28, 1  ;;  %vm3024_vm7 = vcmp.lt.s32.totalorder %v5737_v28, 2 }
 0x7cb   : > { %v3037_v21 = vsel %vm3025_vm3, %v3019_v1, %v3036_v6  ;;  %v3031_v36 = vsel %vm3023_vm4, %v3010_v19, %v3013_v34  ;;  %v3027_v62 = vsel %vm3023_vm4, %v3007_v18, %v3010_v19  ;;  %vm2889_vm6 = vcmp.lt.s32.totalorder %v5722_v48, 0 }
 0x7cc   : > { %v3028_v47 = vsel %vm3026_vm5, %v3016_v44, 2102212464  ;;  %v3033_v7 = vsel %vm3025_vm3, %v3016_v44, %v3032_v51  ;;  %v3035_v49 = vsel %vm3023_vm4, %v3013_v34, %v3016_v44  ;;  %v2946_v22 = vsel %vm2944_vm2, %v2945_v45, %v5771_v43 }
 0x7cd   : > { %v3034_v9 = vsel %vm3024_vm7, %v3031_v36, %v3033_v7  ;;  %v3038_v50 = vsel %vm3024_vm7, %v3035_v49, %v3037_v21  ;;  %v2947_v53 = vadd.s32 %v2946_v22, %v2942_v41  ;;  %v3029_v55 = vsel %vm3025_vm3, %v3013_v34, %v3028_v47 }
 0x7ce   : > { %v5793_v27 = vmul.u32.u64.low %v3039_v42, %v3038_v50  ;;  %v5794_v52 = vmul.u32.u64.high %v3039_v42, %v3038_v50, %v5793_v27  ;;  %v5796_v58 = vmul.u32.u64.low %v3039_v42, %v3034_v9  ;;  %v5797_v59 = vmul.u32.u64.high %v3039_v42, %v3034_v9, %v5796_v58 }
 0x7cf   : > { %v2948_v14 = vadd.s32 536870912, %v2947_v53  ;;  %v3030_v1 = vsel %vm3024_vm7, %v3027_v62, %v3029_v55  ;;  %v2943_v43 = vadd.s32 %v5770_v31, %v5764_v5  ;;  %vm2888_vm12 = vcmp.le.f32.partialorder %v2887_v25, 0.7853982 }
 0x7d0   : > { %vm3048_vm8 = vc.u32 %v5794_v52, %v5796_v58  ;;  %v3049_v60 = vadd.s32 1, %v5797_v59  ;;  %v3046_v63 = vmul.u32 %v3039_v42, %v3030_v1  ;;  %v3047_v36 = vadd.s32 %v5796_v58, %v5794_v52 }
 0x7d1   : > { %v2949_v17 = vshrl.u32 %v2948_v14, 30  ;;  %vm2993_vm14 = vcmp.lt.s32.totalorder %v5725_v10, 0  ;;  %vm2992_vm2 = vcmp.le.f32.partialorder %v2991_v23, 0.7853982 }
 0x7d2   : > { %v3050_v32 = vsel %vm3048_vm8, %v3049_v60, %v5797_v59  ;;  %vm2979_vm8 = vweird.f32 %v5722_v48 }
 0x7d3   : > { %v2950_v61 = vshll.u32 %v2949_v17, 30  ;;  %v3051_v4 = vadd.s32 %v3050_v32, %v3046_v63  ;;  %v2973_v31 = vsub.s32 4, %v2949_v17 }
 0x7d5   : > { %v2951_v24 = vsub.s32 %v2947_v53, %v2950_v61  ;;  %v3052_v15 = vadd.s32 536870912, %v3051_v4  ;;  %v2974_v59 = vsel %vm2889_vm6, %v2973_v31, %v2949_v17  ;;  %v4717_v31 = vld [vmem:[%s6129_s6 + $0x10] sm:$0xff] }
 0x7d6   : > { %v2976_v58 = vsel %vm2888_vm12, 0, %v2974_v59 }
 0x7d7   : > { %v2953_v2 = vsub.s32 0, %v2951_v24  ;;  %v3053_v20 = vshrl.u32 %v3052_v15, 30  ;;  %v2980_v32 = vadd.s32 3, %v2976_v58 }
 0x7d9   : > { %v4695_v13 = vmin.u32 %v2953_v2, %v2951_v24  ;;  %v3054_v11 = vshll.u32 %v3053_v20, 30  ;;  %v3077_v63 = vsub.s32 4, %v3053_v20  ;;  %v2981_v17 = vand.u32 3, %v2980_v32 }
 0x7db   : > { %v2955_v40 = vclz %v4695_v13  ;;  %v3055_v28 = vsub.s32 %v3051_v4, %v3054_v11  ;;  %v3078_v4 = vsel %vm2993_vm14, %v3077_v63, %v3053_v20  ;;  %vm2986_vm3 = vcmp.eq.s32.totalorder %v2981_v17, 2 }
 0x7dc   : > { %v3080_v13 = vsel %vm2992_vm2, 0, %v3078_v4  ;;  %vm2983_vm4 = vcmp.eq.s32.totalorder %v2981_v17, 0  ;;  %vm2982_vm7 = vcmp.lt.s32.totalorder %v2981_v17, 2 }
 0x7dd   : > { %v4696_v8 = vadd.s32 4294967294, %v2955_v40  ;;  %v3057_v6 = vsub.s32 0, %v3055_v28 }
 0x7df   : > { %vm4697_vm9 = vcmp.lt.s32.totalorder %v4696_v8, 0  ;;  %v4699_v30 = vmin.u32 %v3057_v6, %v3055_v28 }
 0x7e0   : > { %v2958_v16 = vsel %vm4697_vm9, 0, %v4696_v8 }
 0x7e1   : > { %v2959_v57 = vsub.s32 32, %v2958_v16  ;;  %v2963_v19 = vsub.s32 4294967266, %v2958_v16  ;;  %v2960_v38 = vshll.u32 %v2951_v24, %v2958_v16  ;;  %v3059_v41 = vclz %v4699_v30 }
 0x7e2   : > { %v3084_v16 = vadd.s32 3, %v3080_v13 }
 0x7e3   : > { %v2961_v26 = vshrl.u32 %v2943_v43, %v2959_v57  ;;  %v2964_v51 = vadd.s32 127, %v2963_v19  ;;  %v4700_v34 = vadd.s32 4294967294, %v3059_v41  ;;  %v3100_v19 = vpop.permute.xlu1 %3099 }
 0x7e4   : > { %v3085_v57 = vand.u32 3, %v3084_v16 }
 0x7e5   : > { %v2962_v18 = vor.u32 %v2961_v26, %v2960_v38  ;;  %v2965_v42 = vshll.u32 %v2964_v51, 23  ;;  %vm4701_vm5 = vcmp.lt.s32.totalorder %v4700_v34, 0 }
 0x7e6   : > { %v3062_v47 = vsel %vm4701_vm5, 0, %v4700_v34  ;;  %vm3090_vm9 = vcmp.eq.s32.totalorder %v3085_v57, 2  ;;  %vm3087_vm5 = vcmp.eq.s32.totalorder %v3085_v57, 0 }
 0x7e7   : > { %v2966_v44 = vor.u32 4788187, %v2965_v42  ;;  %v2969_v21 = vcvt.s32.f32 %v2962_v18  ;;  %v3063_v7 = vsub.s32 32, %v3062_v47  ;;  %v3067_v49 = vsub.s32 4294967266, %v3062_v47 }
 0x7e8   : > { %v3064_v22 = vshll.u32 %v3055_v28, %v3062_v47 }
 0x7e9   : > { %v2967_v45 = vand.u32 2147483647, %v2966_v44  ;;  %v3065_v62 = vshrl.u32 %v3047_v36, %v3063_v7  ;;  %v3068_v9 = vadd.s32 127, %v3067_v49 }
 0x7eb   : > { %v2970_v5 = vmul.f32 %v2969_v21, %v2967_v45  ;;  %v3066_v53 = vor.u32 %v3065_v62, %v3064_v22  ;;  %v3069_v55 = vshll.u32 %v3068_v9, 23  ;;  %v4716_v22 = vld [vmem:[%s6128_s5 + $0x10] sm:$0xff] }
 0x7ec   : > { %v4728_v62 = vld [vmem:[%s6132_s9 + $0x10] sm:$0xff] }
 0x7ed   : > { %v2971_v50 = vxor.u32 2147483648, %v2970_v5  ;;  %v3070_v52 = vor.u32 4788187, %v3069_v55  ;;  %v3073_v60 = vcvt.s32.f32 %v3066_v53  ;;  %v4718_v9 = vld [vmem:[%s6130_s7 + $0x10] sm:$0xff]  ;;  %v4067_v53 = vld [vmem:[%s6133_s10] sm:$0xff] }
 0x7ef   : > { %v2972_v27 = vsel %vm2889_vm6, %v2971_v50, %v2970_v5  ;;  %v3071_v1 = vand.u32 2147483647, %v3070_v52  ;;  %vm3086_vm6 = vcmp.lt.s32.totalorder %v3085_v57, 2  ;;  %v4068_v50 = vld [vmem:[%s6134_s11] sm:$0xff]  ;;  %v4703_v52 = vld [vmem:[%s6127_s4 + $0x78] sm:$0xff]  ;;  %v4708_v57 = vld [vmem:[%s6127_s4 + $0x88] sm:$0xff] }
 0x7f0   : > { %v2975_v14 = vsel %vm2888_vm12, %v5722_v48, %v2972_v27  ;;  %vm3083_vm12 = vweird.f32 %v5725_v10 }
 0x7f1   : > { %4942 = vcosq.f32 %v2975_v14  ;;  %v3074_v61 = vmul.f32 %v3073_v60, %v3071_v1 }
 0x7f2   : > { %4944 = vsinq.f32 %v2975_v14 }
 0x7f3   : > { %v3075_v24 = vxor.u32 2147483648, %v3074_v61 }
 0x7f5   : > { %v3076_v25 = vsel %vm2993_vm14, %v3075_v24, %v3074_v61  ;;  %vm3135_vm14 = vcmask 932864  }
 0x7f6   : > { %v3079_v2 = vsel %vm2992_vm2, %v5725_v10, %v3076_v25  ;;  %vm3220_vm2 = vcmask 1006592   ;;  %v4702_v25 = vld [vmem:[%s6127_s4 + $0x70] sm:$0xff] }
 0x7f7   : > { %4946 = vcosq.f32 %v3079_v2 }
 0x7f8   : > { %4948 = vsinq.f32 %v3079_v2 }
 0x7fb   : > { %v4943_v15 = vpop.eup %4942 }
 0x7fc   : > { %v4945_v40 = vpop.eup %4944  ;;  %v2987_v11 = vxor.u32 2147483648, %v4943_v15 }
 0x7fd   : > { %v2984_v8 = vxor.u32 2147483648, %v4945_v40 }
 0x7fe   : > { %v2988_v28 = vsel %vm2986_vm3, %v2987_v11, %v4945_v40 }
 0x7ff   : > { %v2985_v6 = vsel %vm2983_vm4, %v4943_v15, %v2984_v8  ;;  %v4706_v8 = vld [vmem:[%s6127_s4 + $0x80] sm:$0xff] }
 0x800   : > { %v2989_v23 = vsel %vm2982_vm7, %v2985_v6, %v2988_v28 }
 0x801   : > { %v2990_v20 = vsel %vm2979_vm8, nan, %v2989_v23  ;;  %v4947_v30 = vpop.eup %4946 }
 0x802   : > { %v3095_v43 = vmul.f32 %v2990_v20, %v2990_v20  ;;  %v4949_v26 = vpop.eup %4948  ;;  %v3091_v51 = vxor.u32 2147483648, %v4947_v30 }
 0x803   : > { %v3088_v18 = vxor.u32 2147483648, %v4949_v26 }
 0x804   : > { %v3102_v38 = vmul.f32 %v3100_v19, %v3095_v43  ;;  %v3092_v42 = vsel %vm3090_vm9, %v3091_v51, %v4949_v26 }
 0x805   : > { %v3089_v34 = vsel %vm3087_vm5, %v4947_v30, %v3088_v18 }
 0x806   : > { %v3104_v41 = vadd.f32 %v3102_v38, %v5716_v56  ;;  %v3093_v48 = vsel %vm3086_vm6, %v3089_v34, %v3092_v42 }
 0x807   : > { %v3094_v44 = vsel %vm3083_vm12, nan, %v3093_v48 }
 0x808   : > { %3108 = vrot.lane.b32.xlu0 %v3104_v41, %s6156_s26  ;;  %v3096_v45 = vmul.f32 %v3094_v44, %v3094_v44  ;;  %v4710_v41 = vld [vmem:[%s6127_s4 + $0x90] sm:$0xff] }
 0x80a   : > { %v3103_v21 = vmul.f32 %v3100_v19, %v3096_v45  ;;  %v4712_v45 = vld [vmem:[%s6127_s4 + $0x98] sm:$0xff] }
 0x80c   : > { %v3105_v47 = vadd.f32 %v3103_v21, %v5719_v0 }
 0x80e   : > { %3110 = vrot.lane.b32.xlu1 %v3105_v47, %s6156_s26  ;;  %v4714_v47 = vld [vmem:[%s6127_s4 + $0xa0] sm:$0xff] }
 0x87a   : > { %v3109_v36 = vpop.permute.xlu0 %3108 }
 0x87b   : > { %3116 = vst.msk [vmem:[#allocation2] sm:$0xff] %vm724_vm13, %v3109_v36 }
 0x880   : > { %v3111_v7 = vpop.permute.xlu1 %3110 }
 0x881   : > { %v3112_v49 = vsel %vm479_vm0, %v3109_v36, %v3111_v7  ;;  %3118 = vst.msk [vmem:[#allocation2 + $0x10] sm:$0xff] %vm479_vm0, %v3111_v7 }
 0x882   : > { %3131 = vrot.lane.b32.xlu0 %v3112_v49, %s5012_s23  ;;  %v3119_v5 = vld [vmem:[#allocation2] sm:$0xff] }
 0x886   : > { %3129 = vrot.lane.b32.xlu0 %v3119_v5, %s5012_s23 }
 0x888   : > { %v3121_v10 = vld [vmem:[#allocation2 + $0x10] sm:$0xff] }
 0x889   : > { %3133 = vrot.lane.b32.xlu1 %v3121_v10, %s5012_s23 }
 0x88a   : > { %3218 = vrot.lane.b32.xlu0 %v3121_v10, %s5013_s28 }
 0x88d   : > { %3216 = vrot.lane.b32.xlu1 %v3112_v49, %s5013_s28 }
 0x88e   : > { %3303 = vrot.lane.b32.xlu0 %v3112_v49, %s6160_s25 }
 0x891   : > { %3214 = vrot.lane.b32.xlu1 %v3119_v5, %s5013_s28 }
 0x892   : > { %3301 = vrot.lane.b32.xlu0 %v3119_v5, %s6160_s25 }
 0x895   : > { %3305 = vrot.lane.b32.xlu1 %v3121_v10, %s6160_s25  ;;  %s467_s25 = sand.u32 1, %s4982_s29  }
 0x896   : > { %3393 = vrot.lane.b32.xlu0 %v3121_v10, %s6158_s19 }
 0x899   : > { %3391 = vrot.lane.b32.xlu1 %v3112_v49, %s6158_s19 }
 0x89a   : > { %3479 = vrot.lane.b32.xlu0 %v3112_v49, %s6161_s27 }
 0x89d   : > { %3389 = vrot.lane.b32.xlu1 %v3119_v5, %s6158_s19 }
 0x89e   : > { %3477 = vrot.lane.b32.xlu0 %v3119_v5, %s6161_s27 }
 0x8a1   : > { %3481 = vrot.lane.b32.xlu1 %v3121_v10, %s6161_s27  ;;  %s5016_s27 = smov 33  }
 0x8a2   : > { %3569 = vrot.lane.b32.xlu0 %v3121_v10, %s5014_s22 }
 0x8a5   : > { %3567 = vrot.lane.b32.xlu1 %v3112_v49, %s5014_s22 }
 0x8a6   : > { %3656 = vrot.lane.b32.xlu0 %v3112_v49, %s5015_s24 }
 0x8a9   : > { %3565 = vrot.lane.b32.xlu1 %v3119_v5, %s5014_s22 }
 0x8aa   : > { %3654 = vrot.lane.b32.xlu0 %v3119_v5, %s5015_s24 }
 0x8ad   : > { %3658 = vrot.lane.b32.xlu1 %v3121_v10, %s5015_s24  ;;  %s4745_s24 = sshll.u32 (%p5117_p4), %s5105_s16, 3 }
 0x8ae   : > { %3756 = vperm.xlu0 %4908, %v4717_v31   ;;  %s4516_s29 = scalar_lea.vmem (%p5117_p4), %s6137_s14, %s4745_s24 }
 0x8b1   : > { %3745 = vperm.xlu1 %4909, %v4716_v22  }
 0x8b2   : > { %3986 = vperm.xlu0 %4908, %v4728_v62  }
 0x8b5   : > { %3973 = vperm.xlu1 %4909, %v4718_v9  }
 0x8b6   : > { %4288 = vperm.xlu0 %4908, %v4068_v50  }
 0x8b9   : > { %4071 = vperm.xlu1 %4909, %v4067_v53  }
 0x8f4   : > { %v3132_v55 = vpop.permute.xlu0 %3131 }
 0x8f8   : > { %v3130_v27 = vpop.permute.xlu0 %3129 }
 0x8f9   : > { %v3136_v1 = vsel %vm3135_vm14, %v3130_v27, %v3132_v55 }
 0x8fb   : > { %v3134_v59 = vpop.permute.xlu1 %3133 }
 0x8fc   : > { %v3137_v14 = vsel %vm3135_vm14, %v3132_v55, %v3134_v59  ;;  %v3219_v58 = vpop.permute.xlu0 %3218 }
 0x8fd   : > { %3143 = vmatprep.subr.mxu0 %v3137_v14 }
 0x8fe   : > { %3144 = vmatpush1.msra.mxu0 %v3136_v1 }
 0x8ff   : > { %v3217_v60 = vpop.permute.xlu1 %3216  ;;  %4704 = vmatmul.mubr.msk.f32.vlgmr.msra.gmra.mrb[4].mxu0 %vm748_vm15, %v4703_v52 }
 0x900   : > { %v3222_v61 = vsel %vm3220_vm2, %v3217_v60, %v3219_v58  ;;  %v3304_v63 = vpop.permute.xlu0 %3303  ;;  %3292 = vmatprep.mubr.f32.mxu0 %v4993_v3 }
 0x901   : > { %3228 = vmatprep.subr.mxu0 %v3222_v61 }
 0x903   : > { %v3215_v32 = vpop.permute.xlu1 %3214 }
 0x904   : > { %v3221_v24 = vsel %vm3220_vm2, %v3215_v32, %v3217_v60  ;;  %v3302_v4 = vpop.permute.xlu0 %3301 }
 0x905   : > { %3229 = vmatpush1.msra.mxu0 %v3221_v24  ;;  %v3307_v13 = vsel %vm2029_vm10, %v3302_v4, %v3304_v63 }
 0x907   : > { %v3306_v17 = vpop.permute.xlu1 %3305  ;;  %4705 = vmatmul.mubr.msk.f32.vlgmr.msra.gmra.mrb[4].mxu0 %vm748_vm15, %v4702_v25 }
 0x908   : > { %v3308_v2 = vsel %vm2029_vm10, %v3304_v63, %v3306_v17  ;;  %v3394_v15 = vpop.permute.xlu0 %3393  ;;  %3378 = vmatprep.mubr.f32.mxu0 %v4993_v3  ;;  %vm3571_vm10 = vcmask 637952  }
 0x909   : > { %3314 = vmatprep.subr.mxu0 %v3308_v2 }
 0x90a   : > { %3315 = vmatpush1.msra.mxu0 %v3307_v13 }
 0x90b   : > { %v3392_v40 = vpop.permute.xlu1 %3391 }
 0x90c   : > { %v3396_v11 = vsel %vm1005_vm1, %v3392_v40, %v3394_v15  ;;  %v3480_v28 = vpop.permute.xlu0 %3479 }
 0x90d   : > { %3402 = vmatprep.subr.mxu0 %v3396_v11 }
 0x90f   : > { %v3390_v16 = vpop.permute.xlu1 %3389  ;;  %4707 = vmatmul.mubr.msk.f32.vlgmr.msra.gmra.mrb[4].mxu0 %vm748_vm15, %v4706_v8 }
 0x910   : > { %v3395_v6 = vsel %vm1005_vm1, %v3390_v16, %v3392_v40  ;;  %v3478_v23 = vpop.permute.xlu0 %3477  ;;  %3466 = vmatprep.mubr.f32.mxu0 %v4993_v3  ;;  %vm3660_vm1 = vcmask 564224  }
 0x911   : > { %3403 = vmatpush1.msra.mxu0 %v3395_v6  ;;  %v3483_v38 = vsel %vm2469_vm11, %v3478_v23, %v3480_v28 }
 0x913   : > { %v3482_v20 = vpop.permute.xlu1 %3481 }
 0x914   : > { %v3484_v43 = vsel %vm2469_vm11, %v3480_v28, %v3482_v20  ;;  %v3570_v19 = vpop.permute.xlu0 %3569 }
 0x915   : > { %3490 = vmatprep.subr.mxu0 %v3484_v43 }
 0x917   : > { %v3568_v30 = vpop.permute.xlu1 %3567  ;;  %4709 = vmatmul.mubr.msk.f32.vlgmr.msra.gmra.mrb[4].mxu0 %vm748_vm15, %v4708_v57 }
 0x918   : > { %3491 = vmatpush1.msra.mxu0 %v3483_v38  ;;  %v3573_v26 = vsel %vm3571_vm10, %v3568_v30, %v3570_v19  ;;  %3554 = vmatprep.mubr.f32.mxu0 %v4993_v3  ;;  %v3657_v18 = vpop.permute.xlu0 %3656 }
 0x919   : > { %3579 = vmatprep.subr.mxu0 %v3573_v26 }
 0x91b   : > { %v3566_v51 = vpop.permute.xlu1 %3565 }
 0x91c   : > { %v3572_v42 = vsel %vm3571_vm10, %v3566_v51, %v3568_v30  ;;  %v3655_v44 = vpop.permute.xlu0 %3654 }
 0x91d   : > { %v3661_v21 = vsel %vm3660_vm1, %v3655_v44, %v3657_v18 }
 0x91f   : > { %v3659_v34 = vpop.permute.xlu1 %3658  ;;  %4711 = vmatmul.mubr.msk.f32.vlgmr.msra.gmra.mrb[4].mxu0 %vm748_vm15, %v4710_v41 }
 0x920   : > { %3580 = vmatpush1.msra.mxu0 %v3572_v42  ;;  %v3662_v48 = vsel %vm3660_vm1, %v3657_v18, %v3659_v34  ;;  %3643 = vmatprep.mubr.f32.mxu0 %v4993_v3 }
 0x921   : > { %3668 = vmatprep.subr.mxu0 %v3662_v48 }
 0x927   : > { %4713 = vmatmul.mubr.msk.f32.vlgmr.msra.gmra.mrb[4].mxu0 %vm748_vm15, %v4712_v45 }
 0x928   : > { %3669 = vmatpush1.msra.mxu0 %v3661_v21  ;;  %3732 = vmatprep.mubr.f32.mxu0 %v4993_v3 }
 0x92d   : > { %v3757_v10 = vpop.permute.xlu0 %3756 }
 0x92f   : > { %4715 = vmatmul.mubr.msk.f32.vlgmr.msra.gmra.mrb[4].mxu0 %vm748_vm15, %v4714_v47 }
 0x930   : > { %v3746_v36 = vpop.permute.xlu1 %3745 }
 0xa02   : > { %v3734_v7 = vpop.f32.mrb[4].mxu0 }
 0xa03   : > { %v5890_v49 = vadd.f32 %v3746_v36, %v3734_v7  ;;  %v3736_v5 = vpop.f32.mrb[5].mxu0 }
 0xa04   : > { %v5892_v31 = vadd.f32 %v3746_v36, %v3736_v5 }
 0xa05   : > { %v5895_v22 = vmul.f32 %v3757_v10, %v5890_v49 }
 0xa06   : > { %v5898_v62 = vmul.f32 %v3757_v10, %v5892_v31 }
 0xa07   : > { %v3761_v3 = vand.u32 2147483647, %v5895_v22  ;;  %v3764_v9 = vand.u32 2139095040, %v5895_v22 }
 0xa08   : > { %v3868_v50 = vand.u32 2139095040, %v5898_v62  ;;  %v3865_v27 = vand.u32 2147483647, %v5898_v62 }
 0xa09   : > { %v3765_v53 = vshrl.u32 %v3764_v9, 23  ;;  %v3768_v55 = vand.u32 8388607, %v3761_v3 }
 0xa0a   : > { %v3869_v59 = vshrl.u32 %v3868_v50, 23  ;;  %v3872_v60 = vand.u32 8388607, %v3865_v27 }
 0xa0b   : > { %v4719_v14 = vadd.s32 4294967169, %v3765_v53  ;;  %v3769_v1 = vor.u32 8388608, %v3768_v55 }
 0xa0c   : > { %v4723_v52 = vadd.s32 4294967169, %v3869_v59  ;;  %v3873_v17 = vor.u32 8388608, %v3872_v60 }
 0xa0d   : > { %v3771_v58 = vadd.s32 1, %v4719_v14  ;;  %v5908_v4 = vshll.u32 %v3769_v1, 8 }
 0xa0e   : > { %v3875_v61 = vadd.s32 1, %v4723_v52 }
 0xa0f   : > { %vm3772_vm11 = vcmp.gt.s32.totalorder %v3771_v58, 0 }
 0xa10   : > { %v3773_v63 = vsel %vm3772_vm11, %v3771_v58, 0  ;;  %vm3876_vm3 = vcmp.gt.s32.totalorder %v3875_v61, 0 }
 0xa11   : > { %v3774_v32 = vshrl.u32 %v3773_v63, 5  ;;  %v3775_v24 = vand.u32 31, %v3773_v63  ;;  %v3877_v25 = vsel %vm3876_vm3, %v3875_v61, 0  ;;  %vm3763_vm3 = vcmp.lt.s32.totalorder %v5895_v22, 0 }
 0xa12   : > { %v5911_v13 = vshrl.u32 %v3877_v25, 5  ;;  %v3879_v40 = vand.u32 31, %v3877_v25 }
 0xa13   : > { %v3776_v2 = vsub.s32 32, %v3775_v24  ;;  %v3778_v15 = vshll.u32 %v4994_v29, %v3775_v24  ;;  %v3781_v11 = vshll.u32 %v4995_v33, %v3775_v24  ;;  %v3784_v8 = vshll.u32 %v4996_v35, %v3775_v24 }
 0xa14   : > { %v3787_v28 = vshll.u32 %v4997_v37, %v3775_v24  ;;  %v3790_v16 = vshll.u32 %v4998_v39, %v3775_v24  ;;  %vm3793_vm4 = vcmp.lt.s32.totalorder %v3774_v32, 1  ;;  %vm3794_vm7 = vcmp.lt.s32.totalorder %v3774_v32, 2 }
 0xa15   : > { %v3779_v6 = vshrl.u32 %v4995_v33, %v3776_v2  ;;  %v3782_v23 = vshrl.u32 %v4996_v35, %v3776_v2  ;;  %v3785_v20 = vshrl.u32 %v4997_v37, %v3776_v2  ;;  %v3777_v43 = vshrl.u32 %v4994_v29, %v3776_v2 }
 0xa16   : > { %v3788_v57 = vshrl.u32 %v4998_v39, %v3776_v2  ;;  %v3791_v19 = vshrl.u32 %v4999_v46, %v3776_v2  ;;  %v3880_v51 = vsub.s32 32, %v3879_v40  ;;  %vm3795_vm8 = vcmp.lt.s32.totalorder %v3774_v32, 3 }
 0xa17   : > { %v3780_v30 = vor.u32 %v3779_v6, %v3778_v15  ;;  %v3783_v38 = vor.u32 %v3782_v23, %v3781_v11  ;;  %v3786_v26 = vor.u32 %v3785_v20, %v3784_v8  ;;  %vm3796_vm9 = vcmp.lt.s32.totalorder %v3774_v32, 4 }
 0xa18   : > { %v3789_v41 = vor.u32 %v3788_v57, %v3787_v28  ;;  %v3792_v18 = vor.u32 %v3791_v19, %v3790_v16  ;;  %v3882_v36 = vshll.u32 %v4994_v29, %v3879_v40  ;;  %v3883_v10 = vshrl.u32 %v4995_v33, %v3880_v51 }
 0xa19   : > { %v3797_v42 = vsel %vm3793_vm4, %v3777_v43, %v3780_v30  ;;  %v3798_v34 = vsel %vm3796_vm9, %v3786_v26, 2102212464  ;;  %v3801_v48 = vsel %vm3793_vm4, %v3780_v30, %v3783_v38  ;;  %v3805_v44 = vsel %vm3793_vm4, %v3783_v38, %v3786_v26 }
 0xa1a   : > { %v3799_v45 = vsel %vm3795_vm8, %v3783_v38, %v3798_v34  ;;  %v3802_v21 = vsel %vm3796_vm9, %v3789_v41, 920167782  ;;  %v3806_v47 = vsel %vm3796_vm9, %v3792_v18, 1326507024  ;;  %v3885_v9 = vshll.u32 %v4995_v33, %v3879_v40 }
 0xa1b   : > { %v3803_v7 = vsel %vm3795_vm8, %v3786_v26, %v3802_v21  ;;  %v3807_v5 = vsel %vm3795_vm8, %v3789_v41, %v3806_v47  ;;  %v3800_v50 = vsel %vm3794_vm7, %v3797_v42, %v3799_v45  ;;  %v3886_v59 = vshrl.u32 %v4996_v35, %v3880_v51 }
 0xa1c   : > { %v3804_v53 = vsel %vm3794_vm7, %v3801_v48, %v3803_v7  ;;  %v3808_v55 = vsel %vm3794_vm7, %v3805_v44, %v3807_v5  ;;  %v3884_v60 = vor.u32 %v3883_v10, %v3882_v36  ;;  %v3888_v63 = vshll.u32 %v4996_v35, %v3879_v40 }
 0xa1d   : > { %v5934_v14 = vmul.u32.u64.low %v5908_v4, %v3808_v55  ;;  %v5935_v52 = vmul.u32.u64.high %v5908_v4, %v3808_v55, %v5934_v14  ;;  %v5938_v58 = vmul.u32.u64.low %v5908_v4, %v3804_v53  ;;  %v5939_v1 = vmul.u32.u64.high %v5908_v4, %v3804_v53, %v5938_v58 }
 0xa1e   : > { %v3887_v61 = vor.u32 %v3886_v59, %v3885_v9  ;;  %v3889_v24 = vshrl.u32 %v4997_v37, %v3880_v51  ;;  %v3891_v25 = vshll.u32 %v4997_v37, %v3879_v40  ;;  %v3892_v32 = vshrl.u32 %v4998_v39, %v3880_v51 }
 0xa1f   : > { %v3895_v2 = vshrl.u32 %v4999_v46, %v3880_v51  ;;  %v3913_v15 = vshll.u32 %v3873_v17, 8  ;;  %v3816_v11 = vmul.u32 %v5908_v4, %v3800_v50  ;;  %v3881_v8 = vshrl.u32 %v4994_v29, %v3880_v51 }
 0xa20   : > { %v3890_v28 = vor.u32 %v3889_v24, %v3888_v63  ;;  %v3894_v16 = vshll.u32 %v4998_v39, %v3879_v40  ;;  %vm3818_vm5 = vc.u32 %v5935_v52, %v5938_v58  ;;  %v3819_v6 = vadd.s32 1, %v5939_v1 }
 0xa21   : > { %v3893_v23 = vor.u32 %v3892_v32, %v3891_v25  ;;  %vm3897_vm6 = vcmp.lt.s32.totalorder %v5911_v13, 1  ;;  %vm3899_vm12 = vcmp.lt.s32.totalorder %v5911_v13, 3  ;;  %vm3900_vm14 = vcmp.lt.s32.totalorder %v5911_v13, 4 }
 0xa22   : > { %v3896_v20 = vor.u32 %v3895_v2, %v3894_v16  ;;  %v3905_v17 = vsel %vm3897_vm6, %v3884_v60, %v3887_v61  ;;  %v3820_v4 = vsel %vm3818_vm5, %v3819_v6, %v5939_v1  ;;  %v3902_v43 = vsel %vm3900_vm14, %v3890_v28, 2102212464 }
 0xa23   : > { %v3906_v57 = vsel %vm3900_vm14, %v3893_v23, 920167782  ;;  %v3909_v19 = vsel %vm3897_vm6, %v3887_v61, %v3890_v28  ;;  %v3821_v30 = vadd.s32 %v3820_v4, %v3816_v11  ;;  %vm3898_vm2 = vcmp.lt.s32.totalorder %v5911_v13, 2 }
 0xa24   : > { %v3907_v40 = vsel %vm3899_vm12, %v3890_v28, %v3906_v57  ;;  %v3910_v38 = vsel %vm3900_vm14, %v3896_v20, 1326507024  ;;  %v3901_v26 = vsel %vm3897_vm6, %v3881_v8, %v3884_v60  ;;  %v3903_v51 = vsel %vm3899_vm12, %v3887_v61, %v3902_v43 }
 0xa25   : > { %v3908_v41 = vsel %vm3898_vm2, %v3905_v17, %v3907_v40  ;;  %v3911_v18 = vsel %vm3899_vm12, %v3893_v23, %v3910_v38  ;;  %v3822_v42 = vadd.s32 536870912, %v3821_v30  ;;  %v3904_v36 = vsel %vm3898_vm2, %v3901_v26, %v3903_v51 }
 0xa26   : > { %v3912_v34 = vsel %vm3898_vm2, %v3909_v19, %v3911_v18  ;;  %v5956_v48 = vmul.u32.u64.low %v3913_v15, %v3908_v41  ;;  %v5957_v44 = vmul.u32.u64.high %v3913_v15, %v3908_v41, %v5956_v48  ;;  %v3920_v13 = vmul.u32 %v3913_v15, %v3904_v36 }
 0xa27   : > { %v5959_v45 = vmul.u32.u64.low %v3913_v15, %v3912_v34  ;;  %v5960_v21 = vmul.u32.u64.high %v3913_v15, %v3912_v34, %v5959_v45  ;;  %v3823_v47 = vshrl.u32 %v3822_v42, 30  ;;  %v3817_v32 = vadd.s32 %v5938_v58, %v5935_v52 }
 0xa28   : > { %v3923_v5 = vadd.s32 1, %v5957_v44  ;;  %vm3762_vm4 = vcmp.le.f32.partialorder %v3761_v3, 0.7853982  ;;  %vm3867_vm7 = vcmp.lt.s32.totalorder %v5898_v62, 0  ;;  %vm3866_vm8 = vcmp.le.f32.partialorder %v3865_v27, 0.7853982 }
 0xa29   : > { %v3824_v7 = vshll.u32 %v3823_v47, 30  ;;  %vm3922_vm10 = vc.u32 %v5960_v21, %v5956_v48  ;;  %v3847_v58 = vsub.s32 4, %v3823_v47  ;;  %vm3853_vm12 = vweird.f32 %v5895_v22 }
 0xa2a   : > { %v3924_v9 = vsel %vm3922_vm10, %v3923_v5, %v5957_v44 }
 0xa2b   : > { %v3825_v10 = vsub.s32 %v3821_v30, %v3824_v7  ;;  %v3925_v50 = vadd.s32 %v3924_v9, %v3920_v13  ;;  %v3921_v30 = vadd.s32 %v5956_v48, %v5960_v21  ;;  %v3848_v45 = vsel %vm3763_vm3, %v3847_v58, %v3823_v47 }
 0xa2c   : > { %v3850_v5 = vsel %vm3762_vm4, 0, %v3848_v45 }
 0xa2d   : > { %v3827_v53 = vsub.s32 0, %v3825_v10  ;;  %v3926_v55 = vadd.s32 536870912, %v3925_v50  ;;  %v3854_v9 = vadd.s32 3, %v3850_v5 }
 0xa2f   : > { %v4720_v59 = vmin.u32 %v3827_v53, %v3825_v10  ;;  %v3927_v14 = vshrl.u32 %v3926_v55, 30  ;;  %v3855_v55 = vand.u32 3, %v3854_v9 }
 0xa31   : > { %v3829_v1 = vclz %v4720_v59  ;;  %v3928_v60 = vshll.u32 %v3927_v14, 30  ;;  %vm3857_vm9 = vcmp.eq.s32.totalorder %v3855_v55, 0  ;;  %vm3860_vm5 = vcmp.eq.s32.totalorder %v3855_v55, 2 }
 0xa32   : > { %vm3856_vm6 = vcmp.lt.s32.totalorder %v3855_v55, 2 }
 0xa33   : > { %v4721_v61 = vadd.s32 4294967294, %v3829_v1  ;;  %v3929_v63 = vsub.s32 %v3925_v50, %v3928_v60 }
 0xa35   : > { %vm4722_vm1 = vcmp.lt.s32.totalorder %v4721_v61, 0  ;;  %v3931_v25 = vsub.s32 0, %v3929_v63 }
 0xa36   : > { %v3832_v24 = vsel %vm4722_vm1, 0, %v4721_v61  ;;  %vm3957_vm1 = vweird.f32 %v5898_v62 }
 0xa37   : > { %v3833_v2 = vsub.s32 32, %v3832_v24  ;;  %v3837_v15 = vsub.s32 4294967266, %v3832_v24  ;;  %v4724_v11 = vmin.u32 %v3931_v25, %v3929_v63  ;;  %v3834_v8 = vshll.u32 %v3825_v10, %v3832_v24 }
 0xa38   : > { %v3951_v10 = vsub.s32 4, %v3927_v14 }
 0xa39   : > { %v3835_v28 = vshrl.u32 %v3817_v32, %v3833_v2  ;;  %v3838_v16 = vadd.s32 127, %v3837_v15  ;;  %v3933_v6 = vclz %v4724_v11 }
 0xa3a   : > { %v3952_v53 = vsel %vm3867_vm7, %v3951_v10, %v3927_v14 }
 0xa3b   : > { %v3836_v23 = vor.u32 %v3835_v28, %v3834_v8  ;;  %v3839_v20 = vshll.u32 %v3838_v16, 23  ;;  %v4725_v17 = vadd.s32 4294967294, %v3933_v6  ;;  %v3954_v1 = vsel %vm3866_vm8, 0, %v3952_v53 }
 0xa3c   : > { %v3958_v24 = vadd.s32 3, %v3954_v1 }
 0xa3d   : > { %v3840_v4 = vor.u32 4788187, %v3839_v20  ;;  %vm4726_vm11 = vcmp.lt.s32.totalorder %v4725_v17, 0  ;;  %v3843_v57 = vcvt.s32.f32 %v3836_v23 }
 0xa3e   : > { %v3936_v19 = vsel %vm4726_vm11, 0, %v4725_v17  ;;  %v3959_v27 = vand.u32 3, %v3958_v24 }
 0xa3f   : > { %v3841_v43 = vand.u32 2147483647, %v3840_v4  ;;  %v3937_v40 = vsub.s32 32, %v3936_v19  ;;  %v3941_v38 = vsub.s32 4294967266, %v3936_v19  ;;  %v3938_v26 = vshll.u32 %v3929_v63, %v3936_v19  ;;  %v3974_v4 = vpop.permute.xlu1 %3973 }
 0xa40   : > { %vm3964_vm14 = vcmp.eq.s32.totalorder %v3959_v27, 2  ;;  %vm3961_vm2 = vcmp.eq.s32.totalorder %v3959_v27, 0  ;;  %vm3960_vm10 = vcmp.lt.s32.totalorder %v3959_v27, 2 }
 0xa41   : > { %v3844_v52 = vmul.f32 %v3843_v57, %v3841_v43  ;;  %v3939_v51 = vshrl.u32 %v3921_v30, %v3937_v40  ;;  %v3942_v41 = vadd.s32 127, %v3941_v38  ;;  %v4727_v40 = vld [vmem:[%s6131_s8 + $0x10] sm:$0xff]  ;;  %v3987_v38 = vpop.permute.xlu0 %3986 }
 0xa43   : > { %v3845_v18 = vxor.u32 2147483648, %v3844_v52  ;;  %v3940_v42 = vor.u32 %v3939_v51, %v3938_v26  ;;  %v3943_v34 = vshll.u32 %v3942_v41, 23 }
 0xa45   : > { %v3846_v44 = vsel %vm3763_vm3, %v3845_v18, %v3844_v52  ;;  %v3944_v48 = vor.u32 4788187, %v3943_v34  ;;  %v3947_v7 = vcvt.s32.f32 %v3940_v42 }
 0xa46   : > { %v3849_v36 = vsel %vm3762_vm4, %v5895_v22, %v3846_v44 }
 0xa47   : > { %4950 = vcosq.f32 %v3849_v36  ;;  %v3945_v21 = vand.u32 2147483647, %v3944_v48 }
 0xa48   : > { %4952 = vsinq.f32 %v3849_v36 }
 0xa49   : > { %v3948_v13 = vmul.f32 %v3947_v7, %v3945_v21 }
 0xa4b   : > { %v3949_v50 = vxor.u32 2147483648, %v3948_v13 }
 0xa4d   : > { %v3950_v3 = vsel %vm3867_vm7, %v3949_v50, %v3948_v13 }
 0xa4e   : > { %v3953_v47 = vsel %vm3866_vm8, %v5898_v62, %v3950_v3 }
 0xa4f   : > { %4954 = vcosq.f32 %v3953_v47 }
 0xa50   : > { %4956 = vsinq.f32 %v3953_v47 }
 0xa51   : > { %v4951_v59 = vpop.eup %4950 }
 0xa52   : > { %v4953_v60 = vpop.eup %4952  ;;  %v3861_v61 = vxor.u32 2147483648, %v4951_v59 }
 0xa53   : > { %v3858_v63 = vxor.u32 2147483648, %v4953_v60 }
 0xa54   : > { %v3862_v32 = vsel %vm3860_vm5, %v3861_v61, %v4953_v60 }
 0xa55   : > { %v3859_v25 = vsel %vm3857_vm9, %v4951_v59, %v3858_v63 }
 0xa56   : > { %v3863_v2 = vsel %vm3856_vm6, %v3859_v25, %v3862_v32 }
 0xa57   : > { %v3864_v11 = vsel %vm3853_vm12, nan, %v3863_v2 }
 0xa58   : > { %v3969_v6 = vmul.f32 %v3864_v11, %v3864_v11 }
 0xa59   : > { %v4955_v15 = vpop.eup %4954 }
 0xa5a   : > { %v4957_v14 = vpop.eup %4956  ;;  %v3965_v8 = vxor.u32 2147483648, %v4955_v15  ;;  %v3976_v57 = vmul.f32 %v3974_v4, %v3969_v6 }
 0xa5b   : > { %v3962_v28 = vxor.u32 2147483648, %v4957_v14 }
 0xa5c   : > { %v3966_v16 = vsel %vm3964_vm14, %v3965_v8, %v4957_v14  ;;  %v3978_v30 = vadd.f32 %v3976_v57, %v5890_v49  ;;  %v4072_v49 = vpop.permute.xlu1 %4071 }
 0xa5d   : > { %v3963_v23 = vsel %vm3961_vm2, %v4955_v15, %v3962_v28 }
 0xa5e   : > { %v3967_v20 = vsel %vm3960_vm10, %v3963_v23, %v3966_v16 }
 0xa5f   : > { %v3968_v17 = vsel %vm3957_vm1, nan, %v3967_v20 }
 0xa60   : > { %v3970_v43 = vmul.f32 %v3968_v17, %v3968_v17 }
 0xa62   : > { %v3977_v19 = vmul.f32 %v3974_v4, %v3970_v43 }
 0xa64   : > { %v3979_v22 = vadd.f32 %v3977_v19, %v5892_v31 }
 0xa66   : > { %3992 = vmatprep.subr.mxu1 %v3979_v22 }
 0xa67   : > { %3993 = vmatpush1.msra.mxu1 %v3978_v30 }
 0xa68   : > { %4729 = vmatmul.mubr.msk.f32.vlgmr.msra.gmra.mrb[6].mxu1 %vm748_vm15, %v4727_v40 }
 0xb3b   : > { %v4058_v62 = vpop.f32.mrb[6].mxu1 }
 0xb3c   : > { %v4059_v52 = vadd.f32 %v4058_v62, %v3987_v38  ;;  %v4060_v58 = vpop.f32.mrb[7].mxu1 }
 0xb3d   : > { %v4061_v26 = vadd.f32 %v4060_v58, %v3987_v38 }
 0xb3e   : > { %v4063_v51 = vmul.f32 %v4059_v52, %v5427_v12 }
 0xb3f   : > { %v4064_v41 = vmul.f32 %v4061_v26, %v5429_v54 }
 0xb40   : > { %v5986_v31 = vadd.f32 %v4063_v51, %v5716_v56 }
 0xb41   : > { %v5989_v18 = vadd.f32 %v4064_v41, %v5719_v0 }
 0xb42   : > { %v5992_v42 = vmul.f32 %v4072_v49, %v5986_v31 }
 0xb43   : > { %v5995_v34 = vmul.f32 %v4072_v49, %v5989_v18 }
 0xb44   : > { %v4076_v44 = vand.u32 2147483647, %v5992_v42  ;;  %v4079_v45 = vand.u32 2139095040, %v5992_v42 }
 0xb45   : > { %v4183_v12 = vand.u32 2139095040, %v5995_v34  ;;  %v4180_v36 = vand.u32 2147483647, %v5995_v34 }
 0xb46   : > { %v4080_v54 = vshrl.u32 %v4079_v45, 23  ;;  %v4083_v56 = vand.u32 8388607, %v4076_v44 }
 0xb47   : > { %v4184_v0 = vshrl.u32 %v4183_v12, 23  ;;  %v4187_v13 = vand.u32 8388607, %v4180_v36 }
 0xb48   : > { %v4730_v48 = vadd.s32 4294967169, %v4080_v54  ;;  %v4084_v5 = vor.u32 8388608, %v4083_v56 }
 0xb49   : > { %v4734_v21 = vadd.s32 4294967169, %v4184_v0  ;;  %v4188_v55 = vor.u32 8388608, %v4187_v13 }
 0xb4a   : > { %v4086_v7 = vadd.s32 1, %v4730_v48  ;;  %v6005_v47 = vshll.u32 %v4084_v5, 8 }
 0xb4b   : > { %v4190_v10 = vadd.s32 1, %v4734_v21 }
 0xb4c   : > { %vm4087_vm11 = vcmp.gt.s32.totalorder %v4086_v7, 0 }
 0xb4d   : > { %v4088_v9 = vsel %vm4087_vm11, %v4086_v7, 0  ;;  %vm4191_vm3 = vcmp.gt.s32.totalorder %v4190_v10, 0 }
 0xb4e   : > { %v4089_v50 = vshrl.u32 %v4088_v9, 5  ;;  %v4090_v3 = vand.u32 31, %v4088_v9  ;;  %v4192_v53 = vsel %vm4191_vm3, %v4190_v10, 0  ;;  %v4228_v9 = vshll.u32 %v4188_v55, 8 }
 0xb4f   : > { %v6008_v60 = vshrl.u32 %v4192_v53, 5  ;;  %v4194_v61 = vand.u32 31, %v4192_v53  ;;  %vm4078_vm3 = vcmp.lt.s32.totalorder %v5992_v42, 0 }
 0xb50   : > { %v4091_v59 = vsub.s32 32, %v4090_v3  ;;  %v4093_v1 = vshll.u32 %v4994_v29, %v4090_v3  ;;  %v4096_v63 = vshll.u32 %v4995_v33, %v4090_v3  ;;  %v4099_v24 = vshll.u32 %v4996_v35, %v4090_v3 }
 0xb51   : > { %v4102_v25 = vshll.u32 %v4997_v37, %v4090_v3  ;;  %v4105_v32 = vshll.u32 %v4998_v39, %v4090_v3  ;;  %vm4108_vm4 = vcmp.lt.s32.totalorder %v4089_v50, 1  ;;  %vm4109_vm7 = vcmp.lt.s32.totalorder %v4089_v50, 2 }
 0xb52   : > { %v4094_v2 = vshrl.u32 %v4995_v33, %v4091_v59  ;;  %v4097_v27 = vshrl.u32 %v4996_v35, %v4091_v59  ;;  %v4100_v15 = vshrl.u32 %v4997_v37, %v4091_v59  ;;  %v4092_v14 = vshrl.u32 %v4994_v29, %v4091_v59 }
 0xb53   : > { %v4103_v11 = vshrl.u32 %v4998_v39, %v4091_v59  ;;  %v4106_v8 = vshrl.u32 %v4999_v46, %v4091_v59  ;;  %v4195_v23 = vsub.s32 32, %v4194_v61  ;;  %vm4110_vm8 = vcmp.lt.s32.totalorder %v4089_v50, 3 }
 0xb54   : > { %v4095_v28 = vor.u32 %v4094_v2, %v4093_v1  ;;  %v4098_v16 = vor.u32 %v4097_v27, %v4096_v63  ;;  %v4101_v6 = vor.u32 %v4100_v15, %v4099_v24  ;;  %vm4111_vm9 = vcmp.lt.s32.totalorder %v4089_v50, 4 }
 0xb55   : > { %v4104_v20 = vor.u32 %v4103_v11, %v4102_v25  ;;  %v4107_v17 = vor.u32 %v4106_v8, %v4105_v32  ;;  %v4197_v38 = vshll.u32 %v4994_v29, %v4194_v61  ;;  %v4198_v58 = vshrl.u32 %v4995_v33, %v4195_v23 }
 0xb56   : > { %v4112_v4 = vsel %vm4108_vm4, %v4092_v14, %v4095_v28  ;;  %v4113_v43 = vsel %vm4111_vm9, %v4101_v6, 2102212464  ;;  %v4116_v57 = vsel %vm4108_vm4, %v4095_v28, %v4098_v16  ;;  %v4120_v19 = vsel %vm4108_vm4, %v4098_v16, %v4101_v6 }
 0xb57   : > { %v4114_v22 = vsel %vm4110_vm8, %v4098_v16, %v4113_v43  ;;  %v4117_v30 = vsel %vm4111_vm9, %v4104_v20, 920167782  ;;  %v4121_v40 = vsel %vm4111_vm9, %v4107_v17, 1326507024  ;;  %v4200_v26 = vshll.u32 %v4995_v33, %v4194_v61 }
 0xb58   : > { %v4118_v62 = vsel %vm4110_vm8, %v4101_v6, %v4117_v30  ;;  %v4122_v52 = vsel %vm4110_vm8, %v4104_v20, %v4121_v40  ;;  %v4115_v51 = vsel %vm4109_vm7, %v4112_v4, %v4114_v22  ;;  %v4201_v45 = vshrl.u32 %v4996_v35, %v4195_v23 }
 0xb59   : > { %v4119_v41 = vsel %vm4109_vm7, %v4116_v57, %v4118_v62  ;;  %v4123_v49 = vsel %vm4109_vm7, %v4120_v19, %v4122_v52  ;;  %v4199_v48 = vor.u32 %v4198_v58, %v4197_v38  ;;  %v4203_v33 = vshll.u32 %v4996_v35, %v4194_v61 }
 0xb5a   : > { %v6031_v12 = vmul.u32.u64.low %v6005_v47, %v4123_v49  ;;  %v6032_v54 = vmul.u32.u64.high %v6005_v47, %v4123_v49, %v6031_v12  ;;  %v6035_v56 = vmul.u32.u64.low %v6005_v47, %v4119_v41  ;;  %v6036_v0 = vmul.u32.u64.high %v6005_v47, %v4119_v41, %v6035_v56 }
 0xb5b   : > { %v4202_v21 = vor.u32 %v4201_v45, %v4200_v26  ;;  %v4204_v7 = vshrl.u32 %v4997_v37, %v4195_v23  ;;  %v4206_v5 = vshll.u32 %v4997_v37, %v4194_v61  ;;  %v4207_v13 = vshrl.u32 %v4998_v39, %v4195_v23 }
 0xb5c   : > { %v4210_v10 = vshrl.u32 %v4999_v46, %v4195_v23  ;;  %v4131_v50 = vmul.u32 %v6005_v47, %v4115_v51  ;;  %v4196_v3 = vshrl.u32 %v4994_v29, %v4195_v23  ;;  %v4209_v59 = vshll.u32 %v4998_v39, %v4194_v61 }
 0xb5d   : > { %v4205_v53 = vor.u32 %v4204_v7, %v4203_v33  ;;  %vm4133_vm5 = vc.u32 %v6032_v54, %v6035_v56  ;;  %v4134_v35 = vadd.s32 1, %v6036_v0  ;;  %v4208_v1 = vor.u32 %v4207_v13, %v4206_v5 }
 0xb5e   : > { %vm4212_vm6 = vcmp.lt.s32.totalorder %v6008_v60, 1  ;;  %v4211_v37 = vor.u32 %v4210_v10, %v4209_v59  ;;  %vm4214_vm12 = vcmp.lt.s32.totalorder %v6008_v60, 3  ;;  %vm4215_vm14 = vcmp.lt.s32.totalorder %v6008_v60, 4 }
 0xb5f   : > { %v4220_v46 = vsel %vm4212_vm6, %v4199_v48, %v4202_v21  ;;  %v4135_v47 = vsel %vm4133_vm5, %v4134_v35, %v6036_v0  ;;  %v4217_v55 = vsel %vm4215_vm14, %v4205_v53, 2102212464  ;;  %v4221_v29 = vsel %vm4215_vm14, %v4208_v1, 920167782 }
 0xb60   : > { %v4224_v63 = vsel %vm4212_vm6, %v4202_v21, %v4205_v53  ;;  %v4136_v24 = vadd.s32 %v4135_v47, %v4131_v50  ;;  %vm4213_vm2 = vcmp.lt.s32.totalorder %v6008_v60, 2  ;;  %v4222_v39 = vsel %vm4214_vm12, %v4205_v53, %v4221_v29 }
 0xb61   : > { %v4225_v61 = vsel %vm4215_vm14, %v4211_v37, 1326507024  ;;  %v4216_v25 = vsel %vm4212_vm6, %v4196_v3, %v4199_v48  ;;  %v4218_v32 = vsel %vm4214_vm12, %v4202_v21, %v4217_v55  ;;  %v4223_v2 = vsel %vm4213_vm2, %v4220_v46, %v4222_v39 }
 0xb62   : > { %v4226_v27 = vsel %vm4214_vm12, %v4208_v1, %v4225_v61  ;;  %v4137_v15 = vadd.s32 536870912, %v4136_v24  ;;  %v6053_v11 = vmul.u32.u64.low %v4228_v9, %v4223_v2  ;;  %v6054_v8 = vmul.u32.u64.high %v4228_v9, %v4223_v2, %v6053_v11 }
 0xb63   : > { %v4227_v14 = vsel %vm4213_vm2, %v4224_v63, %v4226_v27  ;;  %v4219_v23 = vsel %vm4213_vm2, %v4216_v25, %v4218_v32  ;;  %v4132_v41 = vadd.s32 %v6035_v56, %v6032_v54  ;;  %vm4077_vm4 = vcmp.le.f32.partialorder %v4076_v44, 0.7853982 }
 0xb64   : > { %v6056_v28 = vmul.u32.u64.low %v4228_v9, %v4227_v14  ;;  %v6057_v16 = vmul.u32.u64.high %v4228_v9, %v4227_v14, %v6056_v28  ;;  %v4138_v6 = vshrl.u32 %v4137_v15, 30  ;;  %v4238_v17 = vadd.s32 1, %v6054_v8 }
 0xb65   : > { %v4235_v60 = vmul.u32 %v4228_v9, %v4219_v23  ;;  %vm4182_vm7 = vcmp.lt.s32.totalorder %v5995_v34, 0  ;;  %vm4181_vm8 = vcmp.le.f32.partialorder %v4180_v36, 0.7853982  ;;  %vm4168_vm12 = vweird.f32 %v5992_v42 }
 0xb66   : > { %v4139_v20 = vshll.u32 %v4138_v6, 30  ;;  %vm4237_vm10 = vc.u32 %v6057_v16, %v6053_v11  ;;  %v4236_v53 = vadd.s32 %v6053_v11, %v6057_v16  ;;  %v4162_v56 = vsub.s32 4, %v4138_v6 }
 0xb67   : > { %v4239_v43 = vsel %vm4237_vm10, %v4238_v17, %v6054_v8 }
 0xb68   : > { %v4140_v4 = vsub.s32 %v4136_v24, %v4139_v20  ;;  %v4240_v57 = vadd.s32 %v4239_v43, %v4235_v60  ;;  %v4163_v24 = vsel %vm4078_vm3, %v4162_v56, %v4138_v6 }
 0xb69   : > { %v4165_v2 = vsel %vm4077_vm4, 0, %v4163_v24 }
 0xb6a   : > { %v4142_v19 = vsub.s32 0, %v4140_v4  ;;  %v4241_v22 = vadd.s32 536870912, %v4240_v57  ;;  %v4169_v14 = vadd.s32 3, %v4165_v2 }
 0xb6c   : > { %v4731_v30 = vmin.u32 %v4142_v19, %v4140_v4  ;;  %v4242_v40 = vshrl.u32 %v4241_v22, 30  ;;  %v4170_v28 = vand.u32 3, %v4169_v14 }
 0xb6e   : > { %v4144_v38 = vclz %v4731_v30  ;;  %v4243_v62 = vshll.u32 %v4242_v40, 30  ;;  %v4266_v15 = vsub.s32 4, %v4242_v40  ;;  %vm4175_vm9 = vcmp.eq.s32.totalorder %v4170_v28, 2 }
 0xb6f   : > { %vm4172_vm5 = vcmp.eq.s32.totalorder %v4170_v28, 0  ;;  %vm4171_vm6 = vcmp.lt.s32.totalorder %v4170_v28, 2 }
 0xb70   : > { %v4732_v52 = vadd.s32 4294967294, %v4144_v38  ;;  %v4244_v58 = vsub.s32 %v4240_v57, %v4243_v62  ;;  %v4267_v44 = vsel %vm4182_vm7, %v4266_v15, %v4242_v40  ;;  %v4289_v40 = vpop.permute.xlu0 %4288 }
 0xb71   : > { %v4269_v23 = vsel %vm4181_vm8, 0, %v4267_v44 }
 0xb72   : > { %vm4733_vm1 = vcmp.lt.s32.totalorder %v4732_v52, 0  ;;  %v4246_v51 = vsub.s32 0, %v4244_v58  ;;  %v4273_v43 = vadd.s32 3, %v4269_v23 }
 0xb73   : > { %v4147_v26 = vsel %vm4733_vm1, 0, %v4732_v52  ;;  %vm4272_vm1 = vweird.f32 %v5995_v34 }
 0xb74   : > { %v4148_v49 = vsub.s32 32, %v4147_v26  ;;  %v4152_v45 = vsub.s32 4294967266, %v4147_v26  ;;  %v4735_v12 = vmin.u32 %v4246_v51, %v4244_v58  ;;  %v4149_v0 = vshll.u32 %v4140_v4, %v4147_v26 }
 0xb75   : > { %v4274_v30 = vand.u32 3, %v4273_v43 }
 0xb76   : > { %v4150_v48 = vshrl.u32 %v4132_v41, %v4148_v49  ;;  %v4153_v21 = vadd.s32 127, %v4152_v45  ;;  %v4248_v33 = vclz %v4735_v12 }
 0xb77   : > { %vm4279_vm14 = vcmp.eq.s32.totalorder %v4274_v30, 2  ;;  %vm4276_vm2 = vcmp.eq.s32.totalorder %v4274_v30, 0  ;;  %vm4275_vm10 = vcmp.lt.s32.totalorder %v4274_v30, 2 }
 0xb78   : > { %v4151_v7 = vor.u32 %v4150_v48, %v4149_v0  ;;  %v4154_v5 = vshll.u32 %v4153_v21, 23  ;;  %v4736_v13 = vadd.s32 4294967294, %v4248_v33 }
 0xb7a   : > { %v4155_v10 = vor.u32 4788187, %v4154_v5  ;;  %vm4737_vm11 = vcmp.lt.s32.totalorder %v4736_v13, 0  ;;  %v4158_v50 = vcvt.s32.f32 %v4151_v7  ;;  %v4493_v5 = vld [vmem:[%s6136_s13 + $0x8] sm:$0xff] }
 0xb7b   : > { %v4251_v3 = vsel %vm4737_vm11, 0, %v4736_v13 }
 0xb7c   : > { %v4156_v9 = vand.u32 2147483647, %v4155_v10  ;;  %v4252_v59 = vsub.s32 32, %v4251_v3  ;;  %v4256_v35 = vsub.s32 4294967266, %v4251_v3  ;;  %v4253_v1 = vshll.u32 %v4244_v58, %v4251_v3 }
 0xb7e   : > { %v4159_v54 = vmul.f32 %v4158_v50, %v4156_v9  ;;  %v4254_v37 = vshrl.u32 %v4236_v53, %v4252_v59  ;;  %v4257_v46 = vadd.s32 127, %v4256_v35  ;;  %v4739_v50 = vld [vmem:[%s6135_s12 + $0x18] sm:$0xff]  ;;  %v4310_v53 = vld [vmem:[%s6135_s12] sm:$0xff] }
 0xb80   : > { %v4160_v47 = vxor.u32 2147483648, %v4159_v54  ;;  %v4255_v55 = vor.u32 %v4254_v37, %v4253_v1  ;;  %v4258_v29 = vshll.u32 %v4257_v46, 23 }
 0xb82   : > { %v4161_v63 = vsel %vm4078_vm3, %v4160_v47, %v4159_v54  ;;  %v4259_v39 = vor.u32 4788187, %v4258_v29  ;;  %v4262_v32 = vcvt.s32.f32 %v4255_v55  ;;  %v4311_v54 = vld [vmem:[%s6135_s12 + $0x8] sm:$0xff] }
 0xb83   : > { %v4164_v61 = vsel %vm4077_vm4, %v5992_v42, %v4161_v63 }
 0xb84   : > { %4958 = vcosq.f32 %v4164_v61  ;;  %v4260_v25 = vand.u32 2147483647, %v4259_v39 }
 0xb85   : > { %4960 = vsinq.f32 %v4164_v61 }
 0xb86   : > { %v4263_v27 = vmul.f32 %v4262_v32, %v4260_v25 }
 0xb88   : > { %v4264_v11 = vxor.u32 2147483648, %v4263_v27 }
 0xb8a   : > { %v4265_v8 = vsel %vm4182_vm7, %v4264_v11, %v4263_v27 }
 0xb8b   : > { %v4268_v16 = vsel %vm4181_vm8, %v5995_v34, %v4265_v8 }
 0xb8c   : > { %4962 = vcosq.f32 %v4268_v16 }
 0xb8d   : > { %4964 = vsinq.f32 %v4268_v16 }
 0xb8e   : > { %v4959_v6 = vpop.eup %4958 }
 0xb8f   : > { %v4961_v20 = vpop.eup %4960  ;;  %v4176_v17 = vxor.u32 2147483648, %v4959_v6 }
 0xb90   : > { %v4173_v60 = vxor.u32 2147483648, %v4961_v20 }
 0xb91   : > { %v4177_v4 = vsel %vm4175_vm9, %v4176_v17, %v4961_v20 }
 0xb92   : > { %v4174_v57 = vsel %vm4172_vm5, %v4959_v6, %v4173_v60 }
 0xb93   : > { %v4178_v36 = vsel %vm4171_vm6, %v4174_v57, %v4177_v4 }
 0xb94   : > { %v4179_v19 = vsel %vm4168_vm12, nan, %v4178_v36 }
 0xb95   : > { %v4284_v22 = vmul.f32 %v4179_v19, %v4179_v19 }
 0xb96   : > { %v4963_v38 = vpop.eup %4962 }
 0xb97   : > { %v4291_v62 = vmul.f32 %v4289_v40, %v4284_v22  ;;  %v4965_v52 = vpop.eup %4964  ;;  %v4280_v58 = vxor.u32 2147483648, %v4963_v38 }
 0xb98   : > { %v4277_v51 = vxor.u32 2147483648, %v4965_v52 }
 0xb99   : > { %v4293_v26 = vadd.f32 %v4291_v62, %v5986_v31  ;;  %v4281_v41 = vsel %vm4279_vm14, %v4280_v58, %v4965_v52  ;;  %v4738_v31 = vld [vmem:[%s6135_s12 + $0x10] sm:$0xff] }
 0xb9a   : > { %v4278_v49 = vsel %vm4276_vm2, %v4963_v38, %v4277_v51  ;;  %4757 = vmatprep.mubr.msk.f32.mxu1 %vm748_vm15, %v4738_v31 }
 0xb9b   : > { %4297 = vrot.lane.b32.xlu1 %v4293_v26, %s6156_s26  ;;  %v4282_v42 = vsel %vm4275_vm10, %v4278_v49, %v4281_v41 }
 0xb9c   : > { %v4283_v45 = vsel %vm4272_vm1, nan, %v4282_v42 }
 0xb9d   : > { %v4285_v12 = vmul.f32 %v4283_v45, %v4283_v45 }
 0xb9f   : > { %v4292_v0 = vmul.f32 %v4289_v40, %v4285_v12 }
 0xba1   : > { %v4294_v48 = vadd.f32 %v4292_v0, %v5989_v18  ;;  %v4492_v18 = vld [vmem:[%s6136_s13] sm:$0xff] }
 0xba3   : > { %4299 = vrot.lane.b32.xlu0 %v4294_v48, %s6156_s26 }
 0xc0d   : > { %v4298_v21 = vpop.permute.xlu1 %4297 }
 0xc0e   : > { %4305 = vst.msk [vmem:[#allocation2] sm:$0xff] %vm724_vm13, %v4298_v21  ;;  %vm4408_vm13 = vcmask 269312  }
 0xc15   : > { %v4308_v33 = vld [vmem:[#allocation2] sm:$0xff]  ;;  %v4300_v7 = vpop.permute.xlu0 %4299 }
 0xc16   : > { %4317 = vrot.lane.b32.xlu1 %v4308_v33, %s6156_s26  ;;  %v4301_v34 = vsel %vm479_vm0, %v4298_v21, %v4300_v7  ;;  %4307 = vst.msk [vmem:[#allocation2 + $0x10] sm:$0xff] %vm479_vm0, %v4300_v7 }
 0xc17   : > { %4319 = vrot.lane.b32.xlu0 %v4301_v34, %s6156_s26 }
 0xc1a   : > { %4404 = vrot.lane.b32.xlu1 %v4308_v33, %s5016_s27 }
 0xc1b   : > { %4406 = vrot.lane.b32.xlu0 %v4301_v34, %s5016_s27  ;;  %s4620_s27 = sshll.u32 %s467_s25, 4 }
 0xc1c   : > { %s469_s22 = scalar_lea.vmem [#allocation3], %s4620_s27 }
 0xc1e   : > { %4496 = vperm.xlu1 %4909, %v4492_v18  }
 0xc1f   : > { %4501 = vperm.xlu0 %4908, %v4493_v5  }
 0xc88   : > { %v4318_v13 = vpop.permute.xlu1 %4317 }
 0xc89   : > { %v4320_v10 = vpop.permute.xlu0 %4319 }
 0xc8a   : > { %v4321_v9 = vsel %vm479_vm0, %v4318_v13, %v4320_v10 }
 0xc8b   : > { %4755 = vmatprep.subr.mxu1 %v4321_v9 }
 0xc8c   : > { %v4405_v3 = vpop.permute.xlu1 %4404  ;;  %4756 = vmatpush3.msra.mxu1 %v4321_v9 }
 0xc8d   : > { %4758 = vmatmul.mubr.msk.f32.vlgmr.msra.gmra.mrb[8].mxu1 %vm748_vm15, %v4739_v50  ;;  %v4407_v59 = vpop.permute.xlu0 %4406 }
 0xc8e   : > { %v4409_v35 = vsel %vm4408_vm13, %v4405_v3, %v4407_v59  ;;  %4762 = vmatprep.mubr.msk.f32.mxu1 %vm748_vm15, %v4310_v53 }
 0xc8f   : > { %4760 = vmatprep.subr.mxu1 %v4409_v35 }
 0xc90   : > { %4761 = vmatpush3.msra.mxu1 %v4409_v35 }
 0xc95   : > { %4763 = vmatmul.mubr.msk.f32.vlgmr.msra.gmra.mrb[8].mxu1 %vm748_vm15, %v4311_v54 }
 0xc9d   : > { %v4497_v37 = vpop.permute.xlu1 %4496 }
 0xc9e   : > { %v4502_v56 = vpop.permute.xlu0 %4501 }
 0xd66   : > { %4514 = sbr.rel (!%p5117_p4) target bundleno = 3445 (0xd75), region = 80 }
 0xd68   : > { %v4764_v1 = vpop.f32.mrb[8].mxu1 }
 0xd69   : > { %v4505_v46 = vadd.f32 %v4764_v1, %v4502_v56  ;;  %v4483_v47 = vpop.f32.mrb[9].mxu1 }
 0xd6a   : > { %v4504_v55 = vadd.f32 %v4497_v37, %v4483_v47 }
 0xd6b   : > { %4507 = vst [vmem:[%s469_s22 + $0x8] sm:$0xff] %v4505_v46 }
 0xd6c   : > { %4506 = vst [vmem:[%s469_s22] sm:$0xff] %v4504_v55 }
 0xd72   : > { %v4548_v63 = vld [vmem:[%s469_s22 + $0x8] sm:$0xff] }
 0xd73   : > { %v4546_v29 = vld [vmem:[%s469_s22] sm:$0xff]  ;;  %4549 = vst [vmem:[%s4516_s29 + $0x10] sm:$0xff] %v4548_v63 }
 0xd74   : > { %4547 = vst [vmem:[%s4516_s29] sm:$0xff] %v4546_v29 }
 0xd75 PF: > { %s6162_s18 = sld [smem:[#allocation4_spill]]  ;;  %p21_p8 = scmp.ge.s32.totalorder %s5107_s17, 4  }
 0xd76   : > { %s6163_s29 = smov %s4986_s30  ;;  %s6165_s15 = smov %s5107_s17 }
 0xd77   :  { %23 = sbr.rel (!%p21_p8) target bundleno = 4 (0x4), region = 182 }
 0xd7b   : > { %s6164_s30 = smov %s6162_s18 }

</bundles_post_ra>
